<compile_context>
chip_gen: v6e
topology: v6e:2x2x1
jax: 0.10.0
libtpu: 0.0.40
codegen_flags: <defaults>
</compile_context>

<pallas_src>
import functools

import jax
import jax.numpy as jnp
from jax.experimental import pallas as pl
from jax.experimental.pallas import tpu as pltpu


_VMEM_LIMIT = 48 * 1024 * 1024     # <= physical on v5e/v6e (128 MiB) and v7x (64 MiB)
_SQRT_HALF = 0.7071067811865476


def _mosaic(sem):
    return pltpu.CompilerParams(dimension_semantics=sem,
                                vmem_limit_bytes=_VMEM_LIMIT)


def _gelu(y):
    # exact (erf) GELU matches torch.nn.GELU default
    return 0.5 * y * (1.0 + jax.lax.erf(y * _SQRT_HALF))


# ----------------------------------------------------------------------------
# tiling helpers
# ----------------------------------------------------------------------------
def _row_block(M, target=512, mult=8):
    """Largest row tile <= target (multiple of `mult`); single tile if M small."""
    if M <= target:
        return M, 0                        # full-extent block, no padding
    top = (target // mult) * mult
    for cand in range(top, mult - 1, -mult):
        if M % cand == 0 and cand * 2 >= top:
            return cand, 0
    return top, (-M) % top                 # ragged tail -> pad once


def _col_block(N, target=4096, mult=128):
    if N <= target:
        return N
    top = (target // mult) * mult
    for cand in range(top, mult - 1, -mult):
        if N % cand == 0:
            return cand
    return N


def _k_block(K, target=1024, mult=128):
    if K <= target:
        return K
    top = (target // mult) * mult
    for cand in range(top, mult - 1, -mult):
        if K % cand == 0:
            return cand
    return K


# ----------------------------------------------------------------------------
# Pallas kernels
# ----------------------------------------------------------------------------
def _linear_kernel(x_ref, w_ref, b_ref, *rest, act, has_res):
    # single-K-block path (no accumulator scratch needed)
    if has_res:
        r_ref, o_ref = rest
    else:
        (o_ref,) = rest
    y = jnp.dot(x_ref[...].astype(jnp.bfloat16), w_ref[...],
                preferred_element_type=jnp.float32)
    y = y + b_ref[...]
    if act == "gelu":
        y = _gelu(y)
    if has_res:
        y = y + r_ref[...].astype(jnp.float32)     # fused residual epilogue
    o_ref[...] = y.astype(o_ref.dtype)


def _linear_kernel_ktiled(x_ref, w_ref, b_ref, *rest, act, has_res):
    # K-reduction grid axis with f32 VMEM accumulator (large-K linears, e.g. fc2)
    if has_res:
        r_ref, o_ref, acc_ref = rest
    else:
        o_ref, acc_ref = rest
    k = pl.program_id(2)

    @pl.when(k == 0)
    def _():
        acc_ref[...] = jnp.zeros_like(acc_ref)

    acc_ref[...] += jnp.dot(x_ref[...].astype(jnp.bfloat16), w_ref[...],
                            preferred_element_type=jnp.float32)

    @pl.when(k == pl.num_programs(2) - 1)
    def _():
        y = acc_ref[...] + b_ref[...]
        if act == "gelu":
            y = _gelu(y)
        if has_res:
            y = y + r_ref[...].astype(jnp.float32)
        o_ref[...] = y.astype(o_ref.dtype)


def _ln_linear_kernel(x_ref, g_ref, b_ref, w_ref, bias_ref, o_ref, *, eps, act):
    # LayerNorm fused into the following linear (stats in f32, matmul in bf16).
    x = x_ref[...].astype(jnp.float32)
    mu = jnp.mean(x, axis=-1, keepdims=True)
    xc = x - mu
    var = jnp.mean(xc * xc, axis=-1, keepdims=True)
    xn = (xc * jax.lax.rsqrt(var + eps)) * g_ref[...] + b_ref[...]
    y = jnp.dot(xn.astype(jnp.bfloat16), w_ref[...],
                preferred_element_type=jnp.float32)
    y = y + bias_ref[...]
    if act == "gelu":
        y = _gelu(y)
    o_ref[...] = y.astype(o_ref.dtype)


def _layernorm_kernel(x_ref, g_ref, b_ref, o_ref, *, eps):
    x = x_ref[...].astype(jnp.float32)
    mu = jnp.mean(x, axis=-1, keepdims=True)
    xc = x - mu
    var = jnp.mean(xc * xc, axis=-1, keepdims=True)
    y = (xc * jax.lax.rsqrt(var + eps)) * g_ref[...] + b_ref[...]
    o_ref[...] = y.astype(o_ref.dtype)


def _flash_attn_kernel(q_ref, k_ref, v_ref, relh_ref, relw_ref, o_ref,
                       m_sc, l_sc, acc_sc, *, nh, hd, scale, rows, kh):
    ki = pl.program_id(2)

    @pl.when(ki == 0)
    def _init():
        m_sc[...] = jnp.full(m_sc.shape, -jnp.inf, jnp.float32)
        l_sc[...] = jnp.zeros(l_sc.shape, jnp.float32)
        acc_sc[...] = jnp.zeros(acc_sc.shape, jnp.float32)

    q = q_ref[0]                               # (tq, D) bf16
    k = k_ref[0]                               # (tk, D) bf16
    v = v_ref[0]                               # (tk, D) bf16
    for h in range(nh):                        # per-head split in-kernel
        qb = q[:, h * hd:(h + 1) * hd]
        kb = k[:, h * hd:(h + 1) * hd]
        vb = v[:, h * hd:(h + 1) * hd]
        # q @ k^T via dot_general contracting the feature dim (no transpose).
        s = jax.lax.dot_general(qb, kb, (((1,), (1,)), ((), ())),
                                preferred_element_type=jnp.float32) * scale
        # Decomposed rel-pos bias as a single broadcast add (no lane concat loop).
        if rows == kh:                         # single kv tile over the k grid rows
            rh = relh_ref[0, h].astype(jnp.float32)            # (tq, rows)
        else:
            start = pl.multiple_of(ki * rows, rows)
            rh = relh_ref[0, h, :, pl.ds(start, rows)].astype(jnp.float32)
        rw = relw_ref[0, h].astype(jnp.float32)                # (tq, kw)
        bias = (rh[:, :, None] + rw[:, None, :]).reshape(rh.shape[0], -1)
        s = s + bias

        m_prev = m_sc[h]
        m_new = jnp.maximum(m_prev, jnp.max(s, axis=-1, keepdims=True))
        alpha = jnp.exp(m_prev - m_new)
        p = jnp.exp(s - m_new)
        l_sc[h] = alpha * l_sc[h] + jnp.sum(p, axis=-1, keepdims=True)
        acc_sc[h] = alpha * acc_sc[h] + jnp.dot(
            p.astype(jnp.bfloat16), vb, preferred_element_type=jnp.float32)
        m_sc[h] = m_new

    @pl.when(ki == pl.num_programs(2) - 1)
    def _finalize():
        outs = [acc_sc[h] * pl.reciprocal(l_sc[h], approx=True)
                for h in range(nh)]
        # one lane-dense (tq, nh*hd) store; heads packed on the lane dim
        o_ref[0] = jnp.concatenate(outs, axis=1).astype(o_ref.dtype)


def _conv3x3_kernel(x_ref, w_ref, o_ref):
    # 3x3 conv (pad=1, no bias) as an in-kernel 9-tap accumulation on a row strip.
    _, th, Wg, Cout = o_ref.shape
    x = x_ref[0]                               # (th+2, Wg+2, Cin)
    acc = jnp.zeros((th * Wg, Cout), jnp.float32)
    for i in range(3):
        for j in range(3):
            patch = x[i:i + th, j:j + Wg, :].reshape(th * Wg, -1)
            acc = acc + jnp.dot(patch.astype(jnp.bfloat16), w_ref[i, j],
                                preferred_element_type=jnp.float32)
    o_ref[0] = acc.reshape(th, Wg, Cout).astype(o_ref.dtype)


# ----------------------------------------------------------------------------
# Pallas wrappers
# ----------------------------------------------------------------------------
def pallas_linear(x, w, b=None, act=None, residual=None, out_dtype=jnp.float32,
                  block_m=512, block_n=4096, block_k=1024):
    """y = act(x @ w + b) [+ residual]; x:(M,K), w:(K,N) kept/cast bf16."""
    M, K = x.shape
    N = w.shape[1]
    wq = w if w.dtype == jnp.bfloat16 else w.astype(jnp.bfloat16)
    b2 = (jnp.zeros((1, N), jnp.float32) if b is None
          else b.reshape(1, N).astype(jnp.float32))
    mult = 16 if x.dtype == jnp.bfloat16 else 8
    bm, pad = _row_block(M, block_m, mult)
    bn = _col_block(N, block_n)
    bk = _k_block(K, block_k)
    xp = jnp.pad(x, ((0, pad), (0, 0))) if pad else x
    Mp = M + pad
    has_res = residual is not None
    rp = None
    if has_res:
        rp = jnp.pad(residual, ((0, pad), (0, 0))) if pad else residual

    if bk == K:
        in_specs = [
            pl.BlockSpec((bm, K), lambda i, j: (i, 0)),
            pl.BlockSpec((K, bn), lambda i, j: (0, j)),
            pl.BlockSpec((1, bn), lambda i, j: (0, j)),
        ]
        args = [xp, wq, b2]
        if has_res:
            in_specs.append(pl.BlockSpec((bm, bn), lambda i, j: (i, j)))
            args.append(rp)
        out = pl.pallas_call(
            functools.partial(_linear_kernel, act=act, has_res=has_res),
            out_shape=jax.ShapeDtypeStruct((Mp, N), out_dtype),
            grid=(Mp // bm, N // bn),
            in_specs=in_specs,
            out_specs=pl.BlockSpec((bm, bn), lambda i, j: (i, j)),
            compiler_params=_mosaic(("parallel", "parallel")),
        )(*args)
    else:
        in_specs = [
            pl.BlockSpec((bm, bk), lambda i, j, k: (i, k)),
            pl.BlockSpec((bk, bn), lambda i, j, k: (k, j)),
            pl.BlockSpec((1, bn), lambda i, j, k: (0, j)),
        ]
        args = [xp, wq, b2]
        if has_res:
            in_specs.append(pl.BlockSpec((bm, bn), lambda i, j, k: (i, j)))
            args.append(rp)
        out = pl.pallas_call(
            functools.partial(_linear_kernel_ktiled, act=act, has_res=has_res),
            out_shape=jax.ShapeDtypeStruct((Mp, N), out_dtype),
            grid=(Mp // bm, N // bn, K // bk),
            in_specs=in_specs,
            out_specs=pl.BlockSpec((bm, bn), lambda i, j, k: (i, j)),
            scratch_shapes=[pltpu.VMEM((bm, bn), jnp.float32)],
            compiler_params=_mosaic(("parallel", "parallel", "arbitrary")),
        )(*args)
    return out[:M] if pad else out


def pallas_ln_linear(x, gamma, beta, w, b, act=None, eps=1e-6,
                     out_dtype=jnp.float32, block_m=512, block_n=4096):
    """Fused LayerNorm(x) @ w + b (+ GELU). K is the (small) embed dim."""
    M, K = x.shape
    N = w.shape[1]
    wq = w if w.dtype == jnp.bfloat16 else w.astype(jnp.bfloat16)
    b2 = (jnp.zeros((1, N), jnp.float32) if b is None
          else b.reshape(1, N).astype(jnp.float32))
    g2 = gamma.reshape(1, K).astype(jnp.float32)
    be2 = beta.reshape(1, K).astype(jnp.float32)
    mult = 16 if x.dtype == jnp.bfloat16 else 8
    bm, pad = _row_block(M, block_m, mult)
    bn = _col_block(N, block_n)        # full N for qkv / fc1 -> weight streamed once
    xp = jnp.pad(x, ((0, pad), (0, 0))) if pad else x
    Mp = M + pad
    out = pl.pallas_call(
        functools.partial(_ln_linear_kernel, eps=eps, act=act),
        out_shape=jax.ShapeDtypeStruct((Mp, N), out_dtype),
        grid=(Mp // bm, N // bn),
        in_specs=[
            pl.BlockSpec((bm, K), lambda i, j: (i, 0)),
            pl.BlockSpec((1, K), lambda i, j: (0, 0)),
            pl.BlockSpec((1, K), lambda i, j: (0, 0)),
            pl.BlockSpec((K, bn), lambda i, j: (0, j)),
            pl.BlockSpec((1, bn), lambda i, j: (0, j)),
        ],
        out_specs=pl.BlockSpec((bm, bn), lambda i, j: (i, j)),
        compiler_params=_mosaic(("parallel", "parallel")),
    )(xp, g2, be2, wq, b2)
    return out[:M] if pad else out


def pallas_layernorm(x, gamma, beta, eps=1e-6, out_dtype=jnp.float32,
                     block_m=512):
    """LayerNorm over the channel (last) dim; also implements LayerNorm2d."""
    M, C = x.shape
    mult = 16 if x.dtype == jnp.bfloat16 else 8
    bm, pad = _row_block(M, block_m, mult)
    xp = jnp.pad(x, ((0, pad), (0, 0))) if pad else x
    Mp = M + pad
    out = pl.pallas_call(
        functools.partial(_layernorm_kernel, eps=eps),
        out_shape=jax.ShapeDtypeStruct((Mp, C), out_dtype),
        grid=(Mp // bm,),
        in_specs=[
            pl.BlockSpec((bm, C), lambda i: (i, 0)),
            pl.BlockSpec((1, C), lambda i: (0, 0)),
            pl.BlockSpec((1, C), lambda i: (0, 0)),
        ],
        out_specs=pl.BlockSpec((bm, C), lambda i: (i, 0)),
        compiler_params=_mosaic(("parallel",)),
    )(xp, gamma.reshape(1, C).astype(jnp.float32),
      beta.reshape(1, C).astype(jnp.float32))
    return out[:M] if pad else out


def pallas_flash_attention(qkv, rel_h, rel_w, *, nh, hd, scale, grid_hw,
                           q_tile=128, kv_tile=1024):
    """qkv: (Bc, N, 3*D) bf16 packed q|k|v; rel_h/rel_w: (Bc, nh, N, kh/kw) bf16.

    Flash-style attention, grid (batch, q_tile, kv_tile), online softmax in VMEM
    scratch.  q / k / v are DMA'd as three separate lane-blocks of the packed
    qkv (last-dim block index 0/1/2) so nothing is over-fetched.  Output is one
    lane-dense (Bc, N, nh*hd) bf16 slab (no head transpose).
    """
    Bc, N, threeD = qkv.shape
    D = nh * hd
    assert threeD == 3 * D
    kh, kw = grid_hw
    assert kh * kw == N
    tq = N if (N <= q_tile or N % q_tile) else q_tile
    if N <= kv_tile:
        rows = kh                              # single kv tile
    else:
        rows = max(1, kv_tile // kw)
        while rows > 1 and kh % rows:
            rows -= 1
    tk = rows * kw
    num_q, num_kv = N // tq, N // tk

    return pl.pallas_call(
        functools.partial(_flash_attn_kernel, nh=nh, hd=hd, scale=scale,
                          rows=rows, kh=kh),
        out_shape=jax.ShapeDtypeStruct((Bc, N, D), jnp.bfloat16),
        grid=(Bc, num_q, num_kv),
        in_specs=[
            pl.BlockSpec((1, tq, D), lambda b, qi, ki: (b, qi, 0)),    # q cols
            pl.BlockSpec((1, tk, D), lambda b, qi, ki: (b, ki, 1)),    # k cols
            pl.BlockSpec((1, tk, D), lambda b, qi, ki: (b, ki, 2)),    # v cols
            pl.BlockSpec((1, nh, tq, kh), lambda b, qi, ki: (b, 0, qi, 0)),
            pl.BlockSpec((1, nh, tq, kw), lambda b, qi, ki: (b, 0, qi, 0)),
        ],
        out_specs=pl.BlockSpec((1, tq, D), lambda b, qi, ki: (b, qi, 0)),
        scratch_shapes=[
            pltpu.VMEM((nh, tq, 1), jnp.float32),    # m (running max)
            pltpu.VMEM((nh, tq, 1), jnp.float32),    # l (running denom)
            pltpu.VMEM((nh, tq, hd), jnp.float32),   # acc
        ],
        compiler_params=_mosaic(("parallel", "parallel", "arbitrary")),
    )(qkv, qkv, qkv, rel_h, rel_w)


def pallas_conv3x3(y, w, row_tile=16):
    """3x3 conv, pad=1, no bias. y: (B, Hg, Wg, Cin), w: (3,3,Cin,Cout) bf16."""
    B, Hg, Wg, Cin = y.shape
    Cout = w.shape[-1]
    wq = w if w.dtype == jnp.bfloat16 else w.astype(jnp.bfloat16)
    th = min(Hg, row_tile)
    while Hg % th:
        th -= 1
    ns = Hg // th
    yp = jnp.pad(y, ((0, 0), (1, 1), (1, 1), (0, 0)))
    # row strips with 1-row halos (small HBM duplication, bounded VMEM per tile)
    strips = jnp.stack([yp[:, i * th:i * th + th + 2] for i in range(ns)],
                       axis=1).reshape(B * ns, th + 2, Wg + 2, Cin)
    out = pl.pallas_call(
        _conv3x3_kernel,
        out_shape=jax.ShapeDtypeStruct((B * ns, th, Wg, Cout), jnp.float32),
        grid=(B * ns,),
        in_specs=[
            pl.BlockSpec((1, th + 2, Wg + 2, Cin), lambda b: (b, 0, 0, 0)),
            pl.BlockSpec((3, 3, Cin, Cout), lambda b: (0, 0, 0, 0)),
        ],
        out_specs=pl.BlockSpec((1, th, Wg, Cout), lambda b: (b, 0, 0, 0)),
        compiler_params=_mosaic(("parallel",)),
    )(strips, wq)
    return out.reshape(B, Hg, Wg, Cout)


# ----------------------------------------------------------------------------
# JAX glue (reshapes / tiny gathers only)
# ----------------------------------------------------------------------------
def window_partition(x, ws):
    B, H, W, C = x.shape
    pad_h = (ws - H % ws) % ws
    pad_w = (ws - W % ws) % ws
    if pad_h or pad_w:
        x = jnp.pad(x, ((0, 0), (0, pad_h), (0, pad_w), (0, 0)))
    Hp, Wp = H + pad_h, W + pad_w
    x = x.reshape(B, Hp // ws, ws, Wp // ws, ws, C)
    windows = x.transpose(0, 1, 3, 2, 4, 5).reshape(-1, ws, ws, C)
    return windows, (Hp, Wp)


def window_unpartition(windows, ws, pad_hw, hw):
    Hp, Wp = pad_hw
    H, W = hw
    B = windows.shape[0] // ((Hp // ws) * (Wp // ws))
    x = windows.reshape(B, Hp // ws, Wp // ws, ws, ws, -1)
    x = x.transpose(0, 1, 3, 2, 4, 5).reshape(B, Hp, Wp, -1)
    return x[:, :H, :W, :]


def get_rel_pos(q_size, k_size, rel_pos):
    coords = jnp.arange(q_size)[:, None] - jnp.arange(k_size)[None, :] + (k_size - 1)
    return rel_pos[coords]


def rel_pos_tables(q_heads, rel_pos_h, rel_pos_w, hw):
    # TODO(synk): move this q-only einsum into a small Pallas kernel reading just
    # the q lane-block of qkv so the packed qkv slab is not re-read from HBM.
    kh, kw = hw
    Rh = get_rel_pos(kh, kh, rel_pos_h)            # (kh, kh, hd)
    Rw = get_rel_pos(kw, kw, rel_pos_w)            # (kw, kw, hd)
    Bc, N, nh, hd = q_heads.shape
    r_q = q_heads.astype(jnp.float32).reshape(Bc, kh, kw, nh, hd)
    rel_h = jnp.einsum("bhwnc,hkc->bnhwk", r_q, Rh).reshape(Bc, nh, N, kh)
    rel_w = jnp.einsum("bhwnc,wkc->bnhwk", r_q, Rw).reshape(Bc, nh, N, kw)
    return rel_h.astype(jnp.bfloat16), rel_w.astype(jnp.bfloat16)


# ----------------------------------------------------------------------------
# Model
# ----------------------------------------------------------------------------
def vit_block(x, blk, ws, nh, hd, scale):
    B, H, W, D = x.shape
    shortcut = x                                   # residual stream stays f32

    if ws > 0:
        Hc = Wc = ws
        needs_pad = (H % ws != 0) or (W % ws != 0)
        if needs_pad:
            # Reference zero-pads *after* norm1, so LN must run unfused here.
            xn = pallas_layernorm(x.reshape(-1, D), blk["norm1_g"],
                                  blk["norm1_b"], out_dtype=jnp.bfloat16)
            xw, pad_hw = window_partition(xn.reshape(B, H, W, D), ws)
        else:
            # window partition is a pure permutation -> LN fuses into qkv linear
            xw, pad_hw = window_partition(x, ws)
    else:
        Hc, Wc = H, W
        needs_pad = False
        xw, pad_hw = x, (H, W)

    Bc = xw.shape[0]
    Nc = Hc * Wc
    tokens = xw.reshape(Bc * Nc, D)

    if needs_pad:
        qkv = pallas_linear(tokens, blk["qkv_w"], blk["qkv_b"],
                            out_dtype=jnp.bfloat16)
    else:
        qkv = pallas_ln_linear(tokens, blk["norm1_g"], blk["norm1_b"],
                               blk["qkv_w"], blk["qkv_b"],
                               out_dtype=jnp.bfloat16)
    qkv3 = qkv.reshape(Bc, Nc, 3 * D)

    # decomposed rel-pos tables (needs q per head; small JAX glue, bf16)
    q_heads = qkv3[:, :, :D].reshape(Bc, Nc, nh, hd)
    rel_h, rel_w = rel_pos_tables(q_heads, blk["rel_pos_h"], blk["rel_pos_w"],
                                  (Hc, Wc))

    o = pallas_flash_attention(qkv3, rel_h, rel_w, nh=nh, hd=hd, scale=scale,
                               grid_hw=(Hc, Wc))                  # (Bc, Nc, D) bf16

    if ws > 0:
        o = pallas_linear(o.reshape(Bc * Nc, D), blk["proj_w"], blk["proj_b"],
                          out_dtype=jnp.float32)
        o = window_unpartition(o.reshape(Bc, Hc, Wc, D), ws, pad_hw, (H, W))
        x = shortcut + o
    else:
        # global attention: token order unchanged -> fuse residual into proj
        x = pallas_linear(o.reshape(Bc * Nc, D), blk["proj_w"], blk["proj_b"],
                          residual=shortcut.reshape(Bc * Nc, D),
                          out_dtype=jnp.float32).reshape(B, H, W, D)

    # MLP with norm2 fused into fc1 and the residual fused into fc2 (K-tiled)
    t = x.reshape(B * H * W, D)
    h = pallas_ln_linear(t, blk["norm2_g"], blk["norm2_b"],
                         blk["fc1_w"], blk["fc1_b"], act="gelu",
                         out_dtype=jnp.bfloat16)
    y = pallas_linear(h, blk["fc2_w"], blk["fc2_b"], residual=t,
                      out_dtype=jnp.float32)
    return y.reshape(B, H, W, D)


def vit_forward(x, params, cfg):
    B, Cin, Himg, Wimg = x.shape
    p = cfg["patch_size"]
    D = cfg["embed_dim"]
    nh = cfg["num_heads"]
    hd = D // nh
    scale = hd ** -0.5
    Hg, Wg = Himg // p, Wimg // p
    Cn = cfg["out_chans"]

    # --- patch_embed: Conv2d(k=stride=patch) == unfold + matmul (NHWC tokens) ---
    cols = x.reshape(B, Cin, Hg, p, Wg, p).transpose(0, 2, 4, 1, 3, 5)
    cols = cols.reshape(B * Hg * Wg, Cin * p * p)
    tok = pallas_linear(cols, params["patch_w"], params["patch_b"])
    x_nhwc = tok.reshape(B, Hg, Wg, D) + params["pos_embed"]
    # pos_drop / patch_drop / norm_pre are identities for samvit in eval mode.

    # --- transformer blocks ---
    for i, blk in enumerate(params["blocks"]):
        x_nhwc = vit_block(x_nhwc, blk, cfg["window_sizes"][i], nh, hd, scale)

    # --- neck: 1x1 conv -> LayerNorm2d -> 3x3 conv -> LayerNorm2d ---
    t = x_nhwc.reshape(B * Hg * Wg, D)
    y = pallas_linear(t, params["neck_conv1_w"], None)             # 1x1 conv, no bias
    y = pallas_layernorm(y, params["neck_ln1_g"], params["neck_ln1_b"],
                         out_dtype=jnp.bfloat16)                   # feeds a matmul
    z = pallas_conv3x3(y.reshape(B, Hg, Wg, Cn), params["neck_conv2_w"])
    z = pallas_layernorm(z.reshape(B * Hg * Wg, Cn),
                         params["neck_ln2_g"], params["neck_ln2_b"])
    return z.reshape(B, Hg, Wg, Cn).transpose(0, 3, 1, 2)          # back to NCHW


# ----------------------------------------------------------------------------
# Deterministic synthetic parameters (matmul weights pre-laid-out + bf16)
# ----------------------------------------------------------------------------
def init_params(key, cfg):
    # TODO(synk): pretrained timm checkpoint loading replaced by deterministic
    # init (a real checkpoint would be converted once to these layouts/dtypes).
    D = cfg["embed_dim"]
    p = cfg["patch_size"]
    Cin = cfg["in_chans"]
    hd = D // cfg["num_heads"]
    hidden = int(D * cfg["mlp_ratio"])
    Hg = cfg["img_size"] // p
    Cn = cfg["out_chans"]
    bf = jnp.bfloat16

    keys = iter(jax.random.split(key, 64 + 16 * cfg["depth"]))

    def nrm(shape, s=0.02, dtype=jnp.float32):
        return (s * jax.random.normal(next(keys), shape)).astype(dtype)

    params = {
        "patch_w": nrm((Cin * p * p, D), dtype=bf),
        "patch_b": nrm((D,)),
        "pos_embed": nrm((1, Hg, Hg, D)),
        "blocks": [],
        "neck_conv1_w": nrm((D, Cn), dtype=bf),
        "neck_ln1_g": jnp.ones((Cn,), jnp.float32),
        "neck_ln1_b": jnp.zeros((Cn,), jnp.float32),
        "neck_conv2_w": nrm((3, 3, Cn, Cn), dtype=bf),
        "neck_ln2_g": jnp.ones((Cn,), jnp.float32),
        "neck_ln2_b": jnp.zeros((Cn,), jnp.float32),
    }
    for i in range(cfg["depth"]):
        ws = cfg["window_sizes"][i]
        S = ws if ws > 0 else Hg
        params["blocks"].append({
            "norm1_g": jnp.ones((D,), jnp.float32),
            "norm1_b": jnp.zeros((D,), jnp.float32),
            "qkv_w": nrm((D, 3 * D), dtype=bf),
            "qkv_b": nrm((3 * D,)),
            "proj_w": nrm((D, D), dtype=bf),
            "proj_b": nrm((D,)),
            "norm2_g": jnp.ones((D,), jnp.float32),
            "norm2_b": jnp.zeros((D,), jnp.float32),
            "fc1_w": nrm((D, hidden), dtype=bf),
            "fc1_b": nrm((hidden,)),
            "fc2_w": nrm((hidden, D), dtype=bf),
            "fc2_b": nrm((D,)),
            "rel_pos_h": nrm((2 * S - 1, hd)),
            "rel_pos_w": nrm((2 * S - 1, hd)),
        })
    return params


# ----------------------------------------------------------------------------
if __name__ == "__main__":
    cfg = dict(
        img_size=32,
        patch_size=8,          # -> 4x4 token grid
        in_chans=3,
        embed_dim=128,         # lane-aligned so q/k/v lane-block split applies
        depth=2,
        num_heads=2,
        mlp_ratio=4.0,
        out_chans=32,
        window_sizes=[2, 0],   # block 0: windowed attention, block 1: global
    )
    key = jax.random.PRNGKey(0)
    kp, kx = jax.random.split(key)
    params = init_params(kp, cfg)
    x = jax.random.normal(kx, (2, 3, 32, 32), dtype=jnp.float32)

    fwd = jax.jit(lambda inp, prm: vit_forward(inp, prm, cfg))
    out = jax.block_until_ready(fwd(x, params))

    assert out.shape == (2, cfg["out_chans"], 4, 4), out.shape
    assert bool(jnp.all(jnp.isfinite(out)))
    print("KERNEL_OK")
</pallas_src>

<mosaic_0001>
module attributes {stable_mosaic.version = 11 : i64} {
  func.func @_linear_kernel(%arg0: i32, %arg1: i32, %arg2: memref<32x192xf32, #tpu.memory_space<vmem>>, %arg3: memref<192x128xbf16, #tpu.memory_space<vmem>>, %arg4: memref<1x128xf32, #tpu.memory_space<vmem>>, %arg5: memref<32x128xf32, #tpu.memory_space<vmem>>) attributes {dimension_semantics = [#tpu.dimension_semantics<parallel>, #tpu.dimension_semantics<parallel>], iteration_bounds = array<i64: 1, 1>, scalar_prefetch = 0 : i64, scratch_operands = 0 : i64, tpu.core_type = #tpu.core_type<tc>, window_params = [{transform_indices = @transform_0, window_bounds = array<i64: 32, 192>}, {transform_indices = @transform_1, window_bounds = array<i64: 192, 128>}, {transform_indices = @transform_2, window_bounds = array<i64: 1, 128>}, {transform_indices = @transform_3, window_bounds = array<i64: 32, 128>}]} {
    %c0 = arith.constant 0 : index
    %c0_0 = arith.constant 0 : index
    %0 = vector.load %arg2[%c0, %c0_0] : memref<32x192xf32, #tpu.memory_space<vmem>>, vector<32x192xf32>
    %1 = arith.truncf %0 : vector<32x192xf32> to vector<32x192xbf16>
    %c0_1 = arith.constant 0 : index
    %c0_2 = arith.constant 0 : index
    %2 = vector.load %arg3[%c0_1, %c0_2] : memref<192x128xbf16, #tpu.memory_space<vmem>>, vector<192x128xbf16>
    %cst = arith.constant dense<0.000000e+00> : vector<32x128xf32>
    %3 = tpu.matmul %1, %2, %cst {dimension_numbers = #tpu.dot_dimension_numbers<[1], [0], [0], [1], [0, 0, 1, 1], [], []>} : vector<32x192xbf16>, vector<192x128xbf16>, vector<32x128xf32> -> vector<32x128xf32>
    %c0_3 = arith.constant 0 : index
    %c0_4 = arith.constant 0 : index
    %4 = vector.load %arg4[%c0_3, %c0_4] : memref<1x128xf32, #tpu.memory_space<vmem>>, vector<1x128xf32>
    %5 = vector.broadcast %4 : vector<1x128xf32> to vector<32x128xf32>
    %6 = arith.addf %3, %5 : vector<32x128xf32>
    %c0_5 = arith.constant 0 : index
    %c0_6 = arith.constant 0 : index
    %7 = vector.load %arg5[%c0_5, %c0_6] : memref<32x128xf32, #tpu.memory_space<vmem>>, vector<32x128xf32>
    tpu.vector_store %arg5[%c0_5, %c0_6], %6 {strides = array<i32>} : memref<32x128xf32, #tpu.memory_space<vmem>>, vector<32x128xf32>,
    return
  }
  func.func @transform_0(%arg0: i32, %arg1: i32) -> (i32, i32) {
    %c0_i32 = arith.constant 0 : i32
    %c0_i32_0 = arith.constant 0 : i32
    return %arg0, %c0_i32 : i32, i32
  }
  func.func @transform_1(%arg0: i32, %arg1: i32) -> (i32, i32) {
    %c0_i32 = arith.constant 0 : i32
    %c0_i32_0 = arith.constant 0 : i32
    return %c0_i32, %arg1 : i32, i32
  }
  func.func @transform_2(%arg0: i32, %arg1: i32) -> (i32, i32) {
    %c0_i32 = arith.constant 0 : i32
    %c0_i32_0 = arith.constant 0 : i32
    return %c0_i32, %arg1 : i32, i32
  }
  func.func @transform_3(%arg0: i32, %arg1: i32) -> (i32, i32) {
    %c0_i32 = arith.constant 0 : i32
    return %arg0, %arg1 : i32, i32
  }
}

module attributes {stable_mosaic.version = 11 : i64} {
  func.func @_ln_linear_kernel(%arg0: i32, %arg1: i32, %arg2: memref<32x128xf32, #tpu.memory_space<vmem>>, %arg3: memref<1x128xf32, #tpu.memory_space<vmem>>, %arg4: memref<1x128xf32, #tpu.memory_space<vmem>>, %arg5: memref<128x384xbf16, #tpu.memory_space<vmem>>, %arg6: memref<1x384xf32, #tpu.memory_space<vmem>>, %arg7: memref<32x384xbf16, #tpu.memory_space<vmem>>) attributes {dimension_semantics = [#tpu.dimension_semantics<parallel>, #tpu.dimension_semantics<parallel>], iteration_bounds = array<i64: 1, 1>, scalar_prefetch = 0 : i64, scratch_operands = 0 : i64, tpu.core_type = #tpu.core_type<tc>, window_params = [{transform_indices = @transform_0, window_bounds = array<i64: 32, 128>}, {pipeline_mode = #tpu.pipeline_mode<synchronous>, transform_indices = @transform_1, window_bounds = array<i64: 1, 128>}, {pipeline_mode = #tpu.pipeline_mode<synchronous>, transform_indices = @transform_2, window_bounds = array<i64: 1, 128>}, {transform_indices = @transform_3, window_bounds = array<i64: 128, 384>}, {transform_indices = @transform_4, window_bounds = array<i64: 1, 384>}, {transform_indices = @transform_5, window_bounds = array<i64: 32, 384>}]} {
    %c0 = arith.constant 0 : index
    %c0_0 = arith.constant 0 : index
    %0 = vector.load %arg2[%c0, %c0_0] : memref<32x128xf32, #tpu.memory_space<vmem>>, vector<32x128xf32>
    %cst = arith.constant dense<0.000000e+00> : vector<32xf32>
    %1 = vector.multi_reduction <add>, %0, %cst [1] : vector<32x128xf32> to vector<32xf32>
    %2 = vector.shape_cast %1 : vector<32xf32> to vector<32x1xf32>
    %cst_1 = arith.constant 1.280000e+02 : f32
    %3 = vector.broadcast %cst_1 : f32 to vector<32x1xf32>
    %4 = arith.divf %2, %3 : vector<32x1xf32>
    %5 = vector.broadcast %4 : vector<32x1xf32> to vector<32x128xf32>
    %6 = arith.subf %0, %5 : vector<32x128xf32>
    %7 = arith.mulf %6, %6 : vector<32x128xf32>
    %cst_2 = arith.constant dense<0.000000e+00> : vector<32xf32>
    %8 = vector.multi_reduction <add>, %7, %cst_2 [1] : vector<32x128xf32> to vector<32xf32>
    %9 = vector.shape_cast %8 : vector<32xf32> to vector<32x1xf32>
    %cst_3 = arith.constant 1.280000e+02 : f32
    %10 = vector.broadcast %cst_3 : f32 to vector<32x1xf32>
    %11 = arith.divf %9, %10 : vector<32x1xf32>
    %cst_4 = arith.constant 9.99999997E-7 : f32
    %12 = vector.broadcast %cst_4 : f32 to vector<32x1xf32>
    %13 = arith.addf %11, %12 : vector<32x1xf32>
    %14 = math.rsqrt %13 : vector<32x1xf32>
    %15 = vector.broadcast %14 : vector<32x1xf32> to vector<32x128xf32>
    %16 = arith.mulf %6, %15 : vector<32x128xf32>
    %c0_5 = arith.constant 0 : index
    %c0_6 = arith.constant 0 : index
    %17 = vector.load %arg3[%c0_5, %c0_6] : memref<1x128xf32, #tpu.memory_space<vmem>>, vector<1x128xf32>
    %18 = vector.broadcast %17 : vector<1x128xf32> to vector<32x128xf32>
    %19 = arith.mulf %16, %18 : vector<32x128xf32>
    %c0_7 = arith.constant 0 : index
    %c0_8 = arith.constant 0 : index
    %20 = vector.load %arg4[%c0_7, %c0_8] : memref<1x128xf32, #tpu.memory_space<vmem>>, vector<1x128xf32>
    %21 = vector.broadcast %20 : vector<1x128xf32> to vector<32x128xf32>
    %22 = arith.addf %19, %21 : vector<32x128xf32>
    %23 = arith.truncf %22 : vector<32x128xf32> to vector<32x128xbf16>
    %c0_9 = arith.constant 0 : index
    %c0_10 = arith.constant 0 : index
    %24 = vector.load %arg5[%c0_9, %c0_10] : memref<128x384xbf16, #tpu.memory_space<vmem>>, vector<128x384xbf16>
    %cst_11 = arith.constant dense<0.000000e+00> : vector<32x384xf32>
    %25 = tpu.matmul %23, %24, %cst_11 {dimension_numbers = #tpu.dot_dimension_numbers<[1], [0], [0], [1], [0, 0, 1, 1], [], []>} : vector<32x128xbf16>, vector<128x384xbf16>, vector<32x384xf32> -> vector<32x384xf32>
    %c0_12 = arith.constant 0 : index
    %c0_13 = arith.constant 0 : index
    %26 = vector.load %arg6[%c0_12, %c0_13] : memref<1x384xf32, #tpu.memory_space<vmem>>, vector<1x384xf32>
    %27 = vector.broadcast %26 : vector<1x384xf32> to vector<32x384xf32>
    %28 = arith.addf %25, %27 : vector<32x384xf32>
    %29 = arith.truncf %28 : vector<32x384xf32> to vector<32x384xbf16>
    %c0_14 = arith.constant 0 : index
    %c0_15 = arith.constant 0 : index
    %30 = vector.load %arg7[%c0_14, %c0_15] : memref<32x384xbf16, #tpu.memory_space<vmem>>, vector<32x384xbf16>
    tpu.vector_store %arg7[%c0_14, %c0_15], %29 {strides = array<i32>} : memref<32x384xbf16, #tpu.memory_space<vmem>>, vector<32x384xbf16>,
    return
  }
  func.func @transform_0(%arg0: i32, %arg1: i32) -> (i32, i32) {
    %c0_i32 = arith.constant 0 : i32
    %c0_i32_0 = arith.constant 0 : i32
    return %arg0, %c0_i32 : i32, i32
  }
  func.func @transform_1(%arg0: i32, %arg1: i32) -> (i32, i32) {
    %c0_i32 = arith.constant 0 : i32
    %c0_i32_0 = arith.constant 0 : i32
    %c0_i32_1 = arith.constant 0 : i32
    return %c0_i32, %c0_i32_0 : i32, i32
  }
  func.func @transform_2(%arg0: i32, %arg1: i32) -> (i32, i32) {
    %c0_i32 = arith.constant 0 : i32
    %c0_i32_0 = arith.constant 0 : i32
    %c0_i32_1 = arith.constant 0 : i32
    return %c0_i32, %c0_i32_0 : i32, i32
  }
  func.func @transform_3(%arg0: i32, %arg1: i32) -> (i32, i32) {
    %c0_i32 = arith.constant 0 : i32
    %c0_i32_0 = arith.constant 0 : i32
    return %c0_i32, %arg1 : i32, i32
  }
  func.func @transform_4(%arg0: i32, %arg1: i32) -> (i32, i32) {
    %c0_i32 = arith.constant 0 : i32
    %c0_i32_0 = arith.constant 0 : i32
    return %c0_i32, %arg1 : i32, i32
  }
  func.func @transform_5(%arg0: i32, %arg1: i32) -> (i32, i32) {
    %c0_i32 = arith.constant 0 : i32
    return %arg0, %arg1 : i32, i32
  }
}

module attributes {stable_mosaic.version = 11 : i64} {
  func.func @_linear_kernel(%arg0: i32, %arg1: i32, %arg2: memref<32x128xbf16, #tpu.memory_space<vmem>>, %arg3: memref<128x128xbf16, #tpu.memory_space<vmem>>, %arg4: memref<1x128xf32, #tpu.memory_space<vmem>>, %arg5: memref<32x128xf32, #tpu.memory_space<vmem>>) attributes {dimension_semantics = [#tpu.dimension_semantics<parallel>, #tpu.dimension_semantics<parallel>], iteration_bounds = array<i64: 1, 1>, scalar_prefetch = 0 : i64, scratch_operands = 0 : i64, tpu.core_type = #tpu.core_type<tc>, window_params = [{transform_indices = @transform_0, window_bounds = array<i64: 32, 128>}, {transform_indices = @transform_1, window_bounds = array<i64: 128, 128>}, {transform_indices = @transform_2, window_bounds = array<i64: 1, 128>}, {transform_indices = @transform_3, window_bounds = array<i64: 32, 128>}]} {
    %c0 = arith.constant 0 : index
    %c0_0 = arith.constant 0 : index
    %0 = vector.load %arg2[%c0, %c0_0] : memref<32x128xbf16, #tpu.memory_space<vmem>>, vector<32x128xbf16>
    %c0_1 = arith.constant 0 : index
    %c0_2 = arith.constant 0 : index
    %1 = vector.load %arg3[%c0_1, %c0_2] : memref<128x128xbf16, #tpu.memory_space<vmem>>, vector<128x128xbf16>
    %cst = arith.constant dense<0.000000e+00> : vector<32x128xf32>
    %2 = tpu.matmul %0, %1, %cst {dimension_numbers = #tpu.dot_dimension_numbers<[1], [0], [0], [1], [0, 0, 1, 1], [], []>} : vector<32x128xbf16>, vector<128x128xbf16>, vector<32x128xf32> -> vector<32x128xf32>
    %c0_3 = arith.constant 0 : index
    %c0_4 = arith.constant 0 : index
    %3 = vector.load %arg4[%c0_3, %c0_4] : memref<1x128xf32, #tpu.memory_space<vmem>>, vector<1x128xf32>
    %4 = vector.broadcast %3 : vector<1x128xf32> to vector<32x128xf32>
    %5 = arith.addf %2, %4 : vector<32x128xf32>
    %c0_5 = arith.constant 0 : index
    %c0_6 = arith.constant 0 : index
    %6 = vector.load %arg5[%c0_5, %c0_6] : memref<32x128xf32, #tpu.memory_space<vmem>>, vector<32x128xf32>
    tpu.vector_store %arg5[%c0_5, %c0_6], %5 {strides = array<i32>} : memref<32x128xf32, #tpu.memory_space<vmem>>, vector<32x128xf32>,
    return
  }
  func.func @transform_0(%arg0: i32, %arg1: i32) -> (i32, i32) {
    %c0_i32 = arith.constant 0 : i32
    %c0_i32_0 = arith.constant 0 : i32
    return %arg0, %c0_i32 : i32, i32
  }
  func.func @transform_1(%arg0: i32, %arg1: i32) -> (i32, i32) {
    %c0_i32 = arith.constant 0 : i32
    %c0_i32_0 = arith.constant 0 : i32
    return %c0_i32, %arg1 : i32, i32
  }
  func.func @transform_2(%arg0: i32, %arg1: i32) -> (i32, i32) {
    %c0_i32 = arith.constant 0 : i32
    %c0_i32_0 = arith.constant 0 : i32
    return %c0_i32, %arg1 : i32, i32
  }
  func.func @transform_3(%arg0: i32, %arg1: i32) -> (i32, i32) {
    %c0_i32 = arith.constant 0 : i32
    return %arg0, %arg1 : i32, i32
  }
}

module attributes {stable_mosaic.version = 11 : i64} {
  func.func @_flash_attn_kernel(%arg0: i32, %arg1: i32, %arg2: i32, %arg3: memref<1x4x128xbf16, #tpu.memory_space<vmem>>, %arg4: memref<1x4x128xbf16, #tpu.memory_space<vmem>>, %arg5: memref<1x4x128xbf16, #tpu.memory_space<vmem>>, %arg6: memref<1x2x4x2xbf16, #tpu.memory_space<vmem>>, %arg7: memref<1x2x4x2xbf16, #tpu.memory_space<vmem>>, %arg8: memref<1x4x128xbf16, #tpu.memory_space<vmem>>, %arg9: memref<2x4x1xf32, #tpu.memory_space<vmem>>, %arg10: memref<2x4x1xf32, #tpu.memory_space<vmem>>, %arg11: memref<2x4x64xf32, #tpu.memory_space<vmem>>) attributes {dimension_semantics = [#tpu.dimension_semantics<parallel>, #tpu.dimension_semantics<parallel>, #tpu.dimension_semantics<arbitrary>], iteration_bounds = array<i64: 8, 1, 1>, scalar_prefetch = 0 : i64, scratch_operands = 3 : i64, tpu.core_type = #tpu.core_type<tc>, window_params = [{transform_indices = @transform_0, window_bounds = array<i64: 1, 4, 128>}, {transform_indices = @transform_1, window_bounds = array<i64: 1, 4, 128>}, {transform_indices = @transform_2, window_bounds = array<i64: 1, 4, 128>}, {transform_indices = @transform_3, window_bounds = array<i64: 1, 2, 4, 2>}, {transform_indices = @transform_4, window_bounds = array<i64: 1, 2, 4, 2>}, {transform_indices = @transform_5, window_bounds = array<i64: 1, 4, 128>}]} {
    %c0_i32 = arith.constant 0 : i32
    %0 = arith.cmpi eq, %arg2, %c0_i32 : i32
    %1 = arith.extui %0 : i1 to i32
    %c0_i32_0 = arith.constant 0 : i32
    %2 = arith.cmpi ne, %1, %c0_i32_0 : i32
    scf.if %2 {
      %cst_71 = arith.constant 0xFF800000 : f32
      %114 = vector.broadcast %cst_71 : f32 to vector<2x4x1xf32>
      %c0_72 = arith.constant 0 : index
      %c0_73 = arith.constant 0 : index
      %c0_74 = arith.constant 0 : index
      %115 = vector.load %arg9[%c0_72, %c0_73, %c0_74] : memref<2x4x1xf32, #tpu.memory_space<vmem>>, vector<2x4x1xf32>
      tpu.vector_store %arg9[%c0_72, %c0_73, %c0_74], %114 {strides = array<i32>} : memref<2x4x1xf32, #tpu.memory_space<vmem>>, vector<2x4x1xf32>,
      %cst_75 = arith.constant 0.000000e+00 : f32
      %116 = vector.broadcast %cst_75 : f32 to vector<2x4x1xf32>
      %c0_76 = arith.constant 0 : index
      %c0_77 = arith.constant 0 : index
      %c0_78 = arith.constant 0 : index
      %117 = vector.load %arg10[%c0_76, %c0_77, %c0_78] : memref<2x4x1xf32, #tpu.memory_space<vmem>>, vector<2x4x1xf32>
      tpu.vector_store %arg10[%c0_76, %c0_77, %c0_78], %116 {strides = array<i32>} : memref<2x4x1xf32, #tpu.memory_space<vmem>>, vector<2x4x1xf32>,
      %cst_79 = arith.constant 0.000000e+00 : f32
      %118 = vector.broadcast %cst_79 : f32 to vector<2x4x64xf32>
      %c0_80 = arith.constant 0 : index
      %c0_81 = arith.constant 0 : index
      %c0_82 = arith.constant 0 : index
      %119 = vector.load %arg11[%c0_80, %c0_81, %c0_82] : memref<2x4x64xf32, #tpu.memory_space<vmem>>, vector<2x4x64xf32>
      tpu.vector_store %arg11[%c0_80, %c0_81, %c0_82], %118 {strides = array<i32>} : memref<2x4x64xf32, #tpu.memory_space<vmem>>, vector<2x4x64xf32>,
    } else {
    }
    %c0 = arith.constant 0 : index
    %c0_1 = arith.constant 0 : index
    %c0_2 = arith.constant 0 : index
    %3 = vector.load %arg3[%c0, %c0_1, %c0_2] : memref<1x4x128xbf16, #tpu.memory_space<vmem>>, vector<1x4x128xbf16>
    %4 = vector.shape_cast %3 : vector<1x4x128xbf16> to vector<4x128xbf16>
    %c0_3 = arith.constant 0 : index
    %c0_4 = arith.constant 0 : index
    %c0_5 = arith.constant 0 : index
    %5 = vector.load %arg4[%c0_3, %c0_4, %c0_5] : memref<1x4x128xbf16, #tpu.memory_space<vmem>>, vector<1x4x128xbf16>
    %6 = vector.shape_cast %5 : vector<1x4x128xbf16> to vector<4x128xbf16>
    %c0_6 = arith.constant 0 : index
    %c0_7 = arith.constant 0 : index
    %c0_8 = arith.constant 0 : index
    %7 = vector.load %arg5[%c0_6, %c0_7, %c0_8] : memref<1x4x128xbf16, #tpu.memory_space<vmem>>, vector<1x4x128xbf16>
    %8 = vector.shape_cast %7 : vector<1x4x128xbf16> to vector<4x128xbf16>
    %9 = vector.extract_strided_slice %4 {offsets = [0, 0], sizes = [4, 64], strides = [1, 1]} : vector<4x128xbf16> to vector<4x64xbf16>
    %10 = vector.extract_strided_slice %6 {offsets = [0, 0], sizes = [4, 64], strides = [1, 1]} : vector<4x128xbf16> to vector<4x64xbf16>
    %11 = vector.extract_strided_slice %8 {offsets = [0, 0], sizes = [4, 64], strides = [1, 1]} : vector<4x128xbf16> to vector<4x64xbf16>
    %cst = arith.constant dense<0.000000e+00> : vector<4x4xf32>
    %12 = tpu.matmul %9, %10, %cst {dimension_numbers = #tpu.dot_dimension_numbers<[1], [1], [0], [0], [0, 0, 1, 0], [], []>} : vector<4x64xbf16>, vector<4x64xbf16>, vector<4x4xf32> -> vector<4x4xf32>
    %cst_9 = arith.constant 1.250000e-01 : f32
    %13 = vector.broadcast %cst_9 : f32 to vector<4x4xf32>
    %14 = arith.mulf %12, %13 : vector<4x4xf32>
    %c0_10 = arith.constant 0 : index
    %c0_11 = arith.constant 0 : index
    %c0_12 = arith.constant 0 : index
    %c0_13 = arith.constant 0 : index
    %15 = vector.load %arg6[%c0_10, %c0_11, %c0_12, %c0_13] : memref<1x2x4x2xbf16, #tpu.memory_space<vmem>>, vector<1x1x4x2xbf16>
    %16 = vector.shape_cast %15 : vector<1x1x4x2xbf16> to vector<4x2xbf16>
    %17 = arith.extf %16 : vector<4x2xbf16> to vector<4x2xf32>
    %c0_14 = arith.constant 0 : index
    %c0_15 = arith.constant 0 : index
    %c0_16 = arith.constant 0 : index
    %c0_17 = arith.constant 0 : index
    %18 = vector.load %arg7[%c0_14, %c0_15, %c0_16, %c0_17] : memref<1x2x4x2xbf16, #tpu.memory_space<vmem>>, vector<1x1x4x2xbf16>
    %19 = vector.shape_cast %18 : vector<1x1x4x2xbf16> to vector<4x2xbf16>
    %20 = arith.extf %19 : vector<4x2xbf16> to vector<4x2xf32>
    %21 = vector.shape_cast %17 : vector<4x2xf32> to vector<4x2x1xf32>
    %22 = vector.shape_cast %20 : vector<4x2xf32> to vector<4x1x2xf32>
    %23 = vector.broadcast %21 : vector<4x2x1xf32> to vector<4x2x2xf32>
    %24 = vector.broadcast %22 : vector<4x1x2xf32> to vector<4x2x2xf32>
    %25 = arith.addf %23, %24 : vector<4x2x2xf32>
    %26 = vector.shape_cast %25 : vector<4x2x2xf32> to vector<4x4xf32>
    %27 = arith.addf %14, %26 : vector<4x4xf32>
    %c0_18 = arith.constant 0 : index
    %c0_19 = arith.constant 0 : index
    %c0_20 = arith.constant 0 : index
    %28 = vector.load %arg9[%c0_18, %c0_19, %c0_20] : memref<2x4x1xf32, #tpu.memory_space<vmem>>, vector<1x4x1xf32>
    %29 = vector.shape_cast %28 : vector<1x4x1xf32> to vector<4x1xf32>
    %cst_21 = arith.constant dense<0xFF800000> : vector<4xf32>
    %30 = vector.multi_reduction <maximumf>, %27, %cst_21 [1] : vector<4x4xf32> to vector<4xf32>
    %31 = vector.shape_cast %30 : vector<4xf32> to vector<4x1xf32>
    %32 = arith.maximumf %29, %31 : vector<4x1xf32>
    %33 = arith.subf %29, %32 : vector<4x1xf32>
    %34 = math.exp %33 : vector<4x1xf32>
    %35 = vector.broadcast %32 : vector<4x1xf32> to vector<4x4xf32>
    %36 = arith.subf %27, %35 : vector<4x4xf32>
    %37 = math.exp %36 : vector<4x4xf32>
    %c0_22 = arith.constant 0 : index
    %c0_23 = arith.constant 0 : index
    %c0_24 = arith.constant 0 : index
    %38 = vector.load %arg10[%c0_22, %c0_23, %c0_24] : memref<2x4x1xf32, #tpu.memory_space<vmem>>, vector<1x4x1xf32>
    %39 = vector.shape_cast %38 : vector<1x4x1xf32> to vector<4x1xf32>
    %40 = arith.mulf %34, %39 : vector<4x1xf32>
    %cst_25 = arith.constant dense<0.000000e+00> : vector<4xf32>
    %41 = vector.multi_reduction <add>, %37, %cst_25 [1] : vector<4x4xf32> to vector<4xf32>
    %42 = vector.shape_cast %41 : vector<4xf32> to vector<4x1xf32>
    %43 = arith.addf %40, %42 : vector<4x1xf32>
    %c0_26 = arith.constant 0 : index
    %c0_27 = arith.constant 0 : index
    %c0_28 = arith.constant 0 : index
    %44 = vector.load %arg10[%c0_26, %c0_27, %c0_28] : memref<2x4x1xf32, #tpu.memory_space<vmem>>, vector<1x4x1xf32>
    %45 = vector.shape_cast %44 : vector<1x4x1xf32> to vector<4x1xf32>
    %46 = vector.shape_cast %43 : vector<4x1xf32> to vector<1x4x1xf32>
    tpu.vector_store %arg10[%c0_26, %c0_27, %c0_28], %46 {strides = array<i32>} : memref<2x4x1xf32, #tpu.memory_space<vmem>>, vector<1x4x1xf32>,
    %c0_29 = arith.constant 0 : index
    %c0_30 = arith.constant 0 : index
    %c0_31 = arith.constant 0 : index
    %47 = vector.load %arg11[%c0_29, %c0_30, %c0_31] : memref<2x4x64xf32, #tpu.memory_space<vmem>>, vector<1x4x64xf32>
    %48 = vector.shape_cast %47 : vector<1x4x64xf32> to vector<4x64xf32>
    %49 = vector.broadcast %34 : vector<4x1xf32> to vector<4x64xf32>
    %50 = arith.mulf %49, %48 : vector<4x64xf32>
    %51 = arith.truncf %37 : vector<4x4xf32> to vector<4x4xbf16>
    %cst_32 = arith.constant dense<0.000000e+00> : vector<4x64xf32>
    %52 = tpu.matmul %51, %11, %cst_32 {dimension_numbers = #tpu.dot_dimension_numbers<[1], [0], [0], [1], [0, 0, 1, 1], [], []>} : vector<4x4xbf16>, vector<4x64xbf16>, vector<4x64xf32> -> vector<4x64xf32>
    %53 = arith.addf %50, %52 : vector<4x64xf32>
    %c0_33 = arith.constant 0 : index
    %c0_34 = arith.constant 0 : index
    %c0_35 = arith.constant 0 : index
    %54 = vector.load %arg11[%c0_33, %c0_34, %c0_35] : memref<2x4x64xf32, #tpu.memory_space<vmem>>, vector<1x4x64xf32>
    %55 = vector.shape_cast %54 : vector<1x4x64xf32> to vector<4x64xf32>
    %56 = vector.shape_cast %53 : vector<4x64xf32> to vector<1x4x64xf32>
    tpu.vector_store %arg11[%c0_33, %c0_34, %c0_35], %56 {strides = array<i32>} : memref<2x4x64xf32, #tpu.memory_space<vmem>>, vector<1x4x64xf32>,
    %c0_36 = arith.constant 0 : index
    %c0_37 = arith.constant 0 : index
    %c0_38 = arith.constant 0 : index
    %57 = vector.load %arg9[%c0_36, %c0_37, %c0_38] : memref<2x4x1xf32, #tpu.memory_space<vmem>>, vector<1x4x1xf32>
    %58 = vector.shape_cast %57 : vector<1x4x1xf32> to vector<4x1xf32>
    %59 = vector.shape_cast %32 : vector<4x1xf32> to vector<1x4x1xf32>
    tpu.vector_store %arg9[%c0_36, %c0_37, %c0_38], %59 {strides = array<i32>} : memref<2x4x1xf32, #tpu.memory_space<vmem>>, vector<1x4x1xf32>,
    %60 = vector.extract_strided_slice %4 {offsets = [0, 64], sizes = [4, 64], strides = [1, 1]} : vector<4x128xbf16> to vector<4x64xbf16>
    %61 = vector.extract_strided_slice %6 {offsets = [0, 64], sizes = [4, 64], strides = [1, 1]} : vector<4x128xbf16> to vector<4x64xbf16>
    %62 = vector.extract_strided_slice %8 {offsets = [0, 64], sizes = [4, 64], strides = [1, 1]} : vector<4x128xbf16> to vector<4x64xbf16>
    %cst_39 = arith.constant dense<0.000000e+00> : vector<4x4xf32>
    %63 = tpu.matmul %60, %61, %cst_39 {dimension_numbers = #tpu.dot_dimension_numbers<[1], [1], [0], [0], [0, 0, 1, 0], [], []>} : vector<4x64xbf16>, vector<4x64xbf16>, vector<4x4xf32> -> vector<4x4xf32>
    %cst_40 = arith.constant 1.250000e-01 : f32
    %64 = vector.broadcast %cst_40 : f32 to vector<4x4xf32>
    %65 = arith.mulf %63, %64 : vector<4x4xf32>
    %c0_41 = arith.constant 0 : index
    %c1 = arith.constant 1 : index
    %c0_42 = arith.constant 0 : index
    %c0_43 = arith.constant 0 : index
    %66 = vector.load %arg6[%c0_41, %c1, %c0_42, %c0_43] : memref<1x2x4x2xbf16, #tpu.memory_space<vmem>>, vector<1x1x4x2xbf16>
    %67 = vector.shape_cast %66 : vector<1x1x4x2xbf16> to vector<4x2xbf16>
    %68 = arith.extf %67 : vector<4x2xbf16> to vector<4x2xf32>
    %c0_44 = arith.constant 0 : index
    %c1_45 = arith.constant 1 : index
    %c0_46 = arith.constant 0 : index
    %c0_47 = arith.constant 0 : index
    %69 = vector.load %arg7[%c0_44, %c1_45, %c0_46, %c0_47] : memref<1x2x4x2xbf16, #tpu.memory_space<vmem>>, vector<1x1x4x2xbf16>
    %70 = vector.shape_cast %69 : vector<1x1x4x2xbf16> to vector<4x2xbf16>
    %71 = arith.extf %70 : vector<4x2xbf16> to vector<4x2xf32>
    %72 = vector.shape_cast %68 : vector<4x2xf32> to vector<4x2x1xf32>
    %73 = vector.shape_cast %71 : vector<4x2xf32> to vector<4x1x2xf32>
    %74 = vector.broadcast %72 : vector<4x2x1xf32> to vector<4x2x2xf32>
    %75 = vector.broadcast %73 : vector<4x1x2xf32> to vector<4x2x2xf32>
    %76 = arith.addf %74, %75 : vector<4x2x2xf32>
    %77 = vector.shape_cast %76 : vector<4x2x2xf32> to vector<4x4xf32>
    %78 = arith.addf %65, %77 : vector<4x4xf32>
    %c1_48 = arith.constant 1 : index
    %c0_49 = arith.constant 0 : index
    %c0_50 = arith.constant 0 : index
    %79 = vector.load %arg9[%c1_48, %c0_49, %c0_50] : memref<2x4x1xf32, #tpu.memory_space<vmem>>, vector<1x4x1xf32>
    %80 = vector.shape_cast %79 : vector<1x4x1xf32> to vector<4x1xf32>
    %cst_51 = arith.constant dense<0xFF800000> : vector<4xf32>
    %81 = vector.multi_reduction <maximumf>, %78, %cst_51 [1] : vector<4x4xf32> to vector<4xf32>
    %82 = vector.shape_cast %81 : vector<4xf32> to vector<4x1xf32>
    %83 = arith.maximumf %80, %82 : vector<4x1xf32>
    %84 = arith.subf %80, %83 : vector<4x1xf32>
    %85 = math.exp %84 : vector<4x1xf32>
    %86 = vector.broadcast %83 : vector<4x1xf32> to vector<4x4xf32>
    %87 = arith.subf %78, %86 : vector<4x4xf32>
    %88 = math.exp %87 : vector<4x4xf32>
    %c1_52 = arith.constant 1 : index
    %c0_53 = arith.constant 0 : index
    %c0_54 = arith.constant 0 : index
    %89 = vector.load %arg10[%c1_52, %c0_53, %c0_54] : memref<2x4x1xf32, #tpu.memory_space<vmem>>, vector<1x4x1xf32>
    %90 = vector.shape_cast %89 : vector<1x4x1xf32> to vector<4x1xf32>
    %91 = arith.mulf %85, %90 : vector<4x1xf32>
    %cst_55 = arith.constant dense<0.000000e+00> : vector<4xf32>
    %92 = vector.multi_reduction <add>, %88, %cst_55 [1] : vector<4x4xf32> to vector<4xf32>
    %93 = vector.shape_cast %92 : vector<4xf32> to vector<4x1xf32>
    %94 = arith.addf %91, %93 : vector<4x1xf32>
    %c1_56 = arith.constant 1 : index
    %c0_57 = arith.constant 0 : index
    %c0_58 = arith.constant 0 : index
    %95 = vector.load %arg10[%c1_56, %c0_57, %c0_58] : memref<2x4x1xf32, #tpu.memory_space<vmem>>, vector<1x4x1xf32>
    %96 = vector.shape_cast %95 : vector<1x4x1xf32> to vector<4x1xf32>
    %97 = vector.shape_cast %94 : vector<4x1xf32> to vector<1x4x1xf32>
    tpu.vector_store %arg10[%c1_56, %c0_57, %c0_58], %97 {strides = array<i32>} : memref<2x4x1xf32, #tpu.memory_space<vmem>>, vector<1x4x1xf32>,
    %c1_59 = arith.constant 1 : index
    %c0_60 = arith.constant 0 : index
    %c0_61 = arith.constant 0 : index
    %98 = vector.load %arg11[%c1_59, %c0_60, %c0_61] : memref<2x4x64xf32, #tpu.memory_space<vmem>>, vector<1x4x64xf32>
    %99 = vector.shape_cast %98 : vector<1x4x64xf32> to vector<4x64xf32>
    %100 = vector.broadcast %85 : vector<4x1xf32> to vector<4x64xf32>
    %101 = arith.mulf %100, %99 : vector<4x64xf32>
    %102 = arith.truncf %88 : vector<4x4xf32> to vector<4x4xbf16>
    %cst_62 = arith.constant dense<0.000000e+00> : vector<4x64xf32>
    %103 = tpu.matmul %102, %62, %cst_62 {dimension_numbers = #tpu.dot_dimension_numbers<[1], [0], [0], [1], [0, 0, 1, 1], [], []>} : vector<4x4xbf16>, vector<4x64xbf16>, vector<4x64xf32> -> vector<4x64xf32>
    %104 = arith.addf %101, %103 : vector<4x64xf32>
    %c1_63 = arith.constant 1 : index
    %c0_64 = arith.constant 0 : index
    %c0_65 = arith.constant 0 : index
    %105 = vector.load %arg11[%c1_63, %c0_64, %c0_65] : memref<2x4x64xf32, #tpu.memory_space<vmem>>, vector<1x4x64xf32>
    %106 = vector.shape_cast %105 : vector<1x4x64xf32> to vector<4x64xf32>
    %107 = vector.shape_cast %104 : vector<4x64xf32> to vector<1x4x64xf32>
    tpu.vector_store %arg11[%c1_63, %c0_64, %c0_65], %107 {strides = array<i32>} : memref<2x4x64xf32, #tpu.memory_space<vmem>>, vector<1x4x64xf32>,
    %c1_66 = arith.constant 1 : index
    %c0_67 = arith.constant 0 : index
    %c0_68 = arith.constant 0 : index
    %108 = vector.load %arg9[%c1_66, %c0_67, %c0_68] : memref<2x4x1xf32, #tpu.memory_space<vmem>>, vector<1x4x1xf32>
    %109 = vector.shape_cast %108 : vector<1x4x1xf32> to vector<4x1xf32>
    %110 = vector.shape_cast %83 : vector<4x1xf32> to vector<1x4x1xf32>
    tpu.vector_store %arg9[%c1_66, %c0_67, %c0_68], %110 {strides = array<i32>} : memref<2x4x1xf32, #tpu.memory_space<vmem>>, vector<1x4x1xf32>,
    %c0_i32_69 = arith.constant 0 : i32
    %111 = arith.cmpi eq, %arg2, %c0_i32_69 : i32
    %112 = arith.extui %111 : i1 to i32
    %c0_i32_70 = arith.constant 0 : i32
    %113 = arith.cmpi ne, %112, %c0_i32_70 : i32
    scf.if %113 {
      %c0_71 = arith.constant 0 : index
      %c0_72 = arith.constant 0 : index
      %c0_73 = arith.constant 0 : index
      %114 = vector.load %arg11[%c0_71, %c0_72, %c0_73] : memref<2x4x64xf32, #tpu.memory_space<vmem>>, vector<1x4x64xf32>
      %115 = vector.shape_cast %114 : vector<1x4x64xf32> to vector<4x64xf32>
      %c0_74 = arith.constant 0 : index
      %c0_75 = arith.constant 0 : index
      %c0_76 = arith.constant 0 : index
      %116 = vector.load %arg10[%c0_74, %c0_75, %c0_76] : memref<2x4x1xf32, #tpu.memory_space<vmem>>, vector<1x4x1xf32>
      %117 = vector.shape_cast %116 : vector<1x4x1xf32> to vector<4x1xf32>
      %118 = tpu.reciprocal %117 {approx = true} : vector<4x1xf32> -> vector<4x1xf32>
      %119 = vector.broadcast %118 : vector<4x1xf32> to vector<4x64xf32>
      %120 = arith.mulf %115, %119 : vector<4x64xf32>
      %c1_77 = arith.constant 1 : index
      %c0_78 = arith.constant 0 : index
      %c0_79 = arith.constant 0 : index
      %121 = vector.load %arg11[%c1_77, %c0_78, %c0_79] : memref<2x4x64xf32, #tpu.memory_space<vmem>>, vector<1x4x64xf32>
      %122 = vector.shape_cast %121 : vector<1x4x64xf32> to vector<4x64xf32>
      %c1_80 = arith.constant 1 : index
      %c0_81 = arith.constant 0 : index
      %c0_82 = arith.constant 0 : index
      %123 = vector.load %arg10[%c1_80, %c0_81, %c0_82] : memref<2x4x1xf32, #tpu.memory_space<vmem>>, vector<1x4x1xf32>
      %124 = vector.shape_cast %123 : vector<1x4x1xf32> to vector<4x1xf32>
      %125 = tpu.reciprocal %124 {approx = true} : vector<4x1xf32> -> vector<4x1xf32>
      %126 = vector.broadcast %125 : vector<4x1xf32> to vector<4x64xf32>
      %127 = arith.mulf %122, %126 : vector<4x64xf32>
      %128 = tpu.concatenate %120, %127 in 1 : vector<4x64xf32>, vector<4x64xf32> -> vector<4x128xf32>
      %129 = arith.truncf %128 : vector<4x128xf32> to vector<4x128xbf16>
      %c0_83 = arith.constant 0 : index
      %c0_84 = arith.constant 0 : index
      %c0_85 = arith.constant 0 : index
      %130 = vector.load %arg8[%c0_83, %c0_84, %c0_85] : memref<1x4x128xbf16, #tpu.memory_space<vmem>>, vector<1x4x128xbf16>
      %131 = vector.shape_cast %130 : vector<1x4x128xbf16> to vector<4x128xbf16>
      %132 = vector.shape_cast %129 : vector<4x128xbf16> to vector<1x4x128xbf16>
      tpu.vector_store %arg8[%c0_83, %c0_84, %c0_85], %132 {strides = array<i32>} : memref<1x4x128xbf16, #tpu.memory_space<vmem>>, vector<1x4x128xbf16>,
    } else {
    }
    return
  }
  func.func @transform_0(%arg0: i32, %arg1: i32, %arg2: i32) -> (i32, i32, i32) {
    %c0_i32 = arith.constant 0 : i32
    %c0_i32_0 = arith.constant 0 : i32
    return %arg0, %arg1, %c0_i32 : i32, i32, i32
  }
  func.func @transform_1(%arg0: i32, %arg1: i32, %arg2: i32) -> (i32, i32, i32) {
    %c1_i32 = arith.constant 1 : i32
    %c0_i32 = arith.constant 0 : i32
    return %arg0, %arg2, %c1_i32 : i32, i32, i32
  }
  func.func @transform_2(%arg0: i32, %arg1: i32, %arg2: i32) -> (i32, i32, i32) {
    %c2_i32 = arith.constant 2 : i32
    %c0_i32 = arith.constant 0 : i32
    return %arg0, %arg2, %c2_i32 : i32, i32, i32
  }
  func.func @transform_3(%arg0: i32, %arg1: i32, %arg2: i32) -> (i32, i32, i32, i32) {
    %c0_i32 = arith.constant 0 : i32
    %c0_i32_0 = arith.constant 0 : i32
    %c0_i32_1 = arith.constant 0 : i32
    return %arg0, %c0_i32, %arg1, %c0_i32_0 : i32, i32, i32, i32
  }
  func.func @transform_4(%arg0: i32, %arg1: i32, %arg2: i32) -> (i32, i32, i32, i32) {
    %c0_i32 = arith.constant 0 : i32
    %c0_i32_0 = arith.constant 0 : i32
    %c0_i32_1 = arith.constant 0 : i32
    return %arg0, %c0_i32, %arg1, %c0_i32_0 : i32, i32, i32, i32
  }
  func.func @transform_5(%arg0: i32, %arg1: i32, %arg2: i32) -> (i32, i32, i32) {
    %c0_i32 = arith.constant 0 : i32
    %c0_i32_0 = arith.constant 0 : i32
    return %arg0, %arg1, %c0_i32 : i32, i32, i32
  }
}

module attributes {stable_mosaic.version = 11 : i64} {
  func.func @_ln_linear_kernel(%arg0: i32, %arg1: i32, %arg2: memref<32x128xf32, #tpu.memory_space<vmem>>, %arg3: memref<1x128xf32, #tpu.memory_space<vmem>>, %arg4: memref<1x128xf32, #tpu.memory_space<vmem>>, %arg5: memref<128x512xbf16, #tpu.memory_space<vmem>>, %arg6: memref<1x512xf32, #tpu.memory_space<vmem>>, %arg7: memref<32x512xbf16, #tpu.memory_space<vmem>>) attributes {dimension_semantics = [#tpu.dimension_semantics<parallel>, #tpu.dimension_semantics<parallel>], iteration_bounds = array<i64: 1, 1>, scalar_prefetch = 0 : i64, scratch_operands = 0 : i64, tpu.core_type = #tpu.core_type<tc>, window_params = [{transform_indices = @transform_0, window_bounds = array<i64: 32, 128>}, {pipeline_mode = #tpu.pipeline_mode<synchronous>, transform_indices = @transform_1, window_bounds = array<i64: 1, 128>}, {pipeline_mode = #tpu.pipeline_mode<synchronous>, transform_indices = @transform_2, window_bounds = array<i64: 1, 128>}, {transform_indices = @transform_3, window_bounds = array<i64: 128, 512>}, {transform_indices = @transform_4, window_bounds = array<i64: 1, 512>}, {transform_indices = @transform_5, window_bounds = array<i64: 32, 512>}]} {
    %c0 = arith.constant 0 : index
    %c0_0 = arith.constant 0 : index
    %0 = vector.load %arg2[%c0, %c0_0] : memref<32x128xf32, #tpu.memory_space<vmem>>, vector<32x128xf32>
    %cst = arith.constant dense<0.000000e+00> : vector<32xf32>
    %1 = vector.multi_reduction <add>, %0, %cst [1] : vector<32x128xf32> to vector<32xf32>
    %2 = vector.shape_cast %1 : vector<32xf32> to vector<32x1xf32>
    %cst_1 = arith.constant 1.280000e+02 : f32
    %3 = vector.broadcast %cst_1 : f32 to vector<32x1xf32>
    %4 = arith.divf %2, %3 : vector<32x1xf32>
    %5 = vector.broadcast %4 : vector<32x1xf32> to vector<32x128xf32>
    %6 = arith.subf %0, %5 : vector<32x128xf32>
    %7 = arith.mulf %6, %6 : vector<32x128xf32>
    %cst_2 = arith.constant dense<0.000000e+00> : vector<32xf32>
    %8 = vector.multi_reduction <add>, %7, %cst_2 [1] : vector<32x128xf32> to vector<32xf32>
    %9 = vector.shape_cast %8 : vector<32xf32> to vector<32x1xf32>
    %cst_3 = arith.constant 1.280000e+02 : f32
    %10 = vector.broadcast %cst_3 : f32 to vector<32x1xf32>
    %11 = arith.divf %9, %10 : vector<32x1xf32>
    %cst_4 = arith.constant 9.99999997E-7 : f32
    %12 = vector.broadcast %cst_4 : f32 to vector<32x1xf32>
    %13 = arith.addf %11, %12 : vector<32x1xf32>
    %14 = math.rsqrt %13 : vector<32x1xf32>
    %15 = vector.broadcast %14 : vector<32x1xf32> to vector<32x128xf32>
    %16 = arith.mulf %6, %15 : vector<32x128xf32>
    %c0_5 = arith.constant 0 : index
    %c0_6 = arith.constant 0 : index
    %17 = vector.load %arg3[%c0_5, %c0_6] : memref<1x128xf32, #tpu.memory_space<vmem>>, vector<1x128xf32>
    %18 = vector.broadcast %17 : vector<1x128xf32> to vector<32x128xf32>
    %19 = arith.mulf %16, %18 : vector<32x128xf32>
    %c0_7 = arith.constant 0 : index
    %c0_8 = arith.constant 0 : index
    %20 = vector.load %arg4[%c0_7, %c0_8] : memref<1x128xf32, #tpu.memory_space<vmem>>, vector<1x128xf32>
    %21 = vector.broadcast %20 : vector<1x128xf32> to vector<32x128xf32>
    %22 = arith.addf %19, %21 : vector<32x128xf32>
    %23 = arith.truncf %22 : vector<32x128xf32> to vector<32x128xbf16>
    %c0_9 = arith.constant 0 : index
    %c0_10 = arith.constant 0 : index
    %24 = vector.load %arg5[%c0_9, %c0_10] : memref<128x512xbf16, #tpu.memory_space<vmem>>, vector<128x512xbf16>
    %cst_11 = arith.constant dense<0.000000e+00> : vector<32x512xf32>
    %25 = tpu.matmul %23, %24, %cst_11 {dimension_numbers = #tpu.dot_dimension_numbers<[1], [0], [0], [1], [0, 0, 1, 1], [], []>} : vector<32x128xbf16>, vector<128x512xbf16>, vector<32x512xf32> -> vector<32x512xf32>
    %c0_12 = arith.constant 0 : index
    %c0_13 = arith.constant 0 : index
    %26 = vector.load %arg6[%c0_12, %c0_13] : memref<1x512xf32, #tpu.memory_space<vmem>>, vector<1x512xf32>
    %27 = vector.broadcast %26 : vector<1x512xf32> to vector<32x512xf32>
    %28 = arith.addf %25, %27 : vector<32x512xf32>
    %cst_14 = arith.constant 5.000000e-01 : f32
    %29 = vector.broadcast %cst_14 : f32 to vector<32x512xf32>
    %30 = arith.mulf %29, %28 : vector<32x512xf32>
    %cst_15 = arith.constant 0.707106769 : f32
    %31 = vector.broadcast %cst_15 : f32 to vector<32x512xf32>
    %32 = arith.mulf %28, %31 : vector<32x512xf32>
    %33 = math.erf %32 : vector<32x512xf32>
    %cst_16 = arith.constant 1.000000e+00 : f32
    %34 = vector.broadcast %cst_16 : f32 to vector<32x512xf32>
    %35 = arith.addf %34, %33 : vector<32x512xf32>
    %36 = arith.mulf %30, %35 : vector<32x512xf32>
    %37 = arith.truncf %36 : vector<32x512xf32> to vector<32x512xbf16>
    %c0_17 = arith.constant 0 : index
    %c0_18 = arith.constant 0 : index
    %38 = vector.load %arg7[%c0_17, %c0_18] : memref<32x512xbf16, #tpu.memory_space<vmem>>, vector<32x512xbf16>
    tpu.vector_store %arg7[%c0_17, %c0_18], %37 {strides = array<i32>} : memref<32x512xbf16, #tpu.memory_space<vmem>>, vector<32x512xbf16>,
    return
  }
  func.func @transform_0(%arg0: i32, %arg1: i32) -> (i32, i32) {
    %c0_i32 = arith.constant 0 : i32
    %c0_i32_0 = arith.constant 0 : i32
    return %arg0, %c0_i32 : i32, i32
  }
  func.func @transform_1(%arg0: i32, %arg1: i32) -> (i32, i32) {
    %c0_i32 = arith.constant 0 : i32
    %c0_i32_0 = arith.constant 0 : i32
    %c0_i32_1 = arith.constant 0 : i32
    return %c0_i32, %c0_i32_0 : i32, i32
  }
  func.func @transform_2(%arg0: i32, %arg1: i32) -> (i32, i32) {
    %c0_i32 = arith.constant 0 : i32
    %c0_i32_0 = arith.constant 0 : i32
    %c0_i32_1 = arith.constant 0 : i32
    return %c0_i32, %c0_i32_0 : i32, i32
  }
  func.func @transform_3(%arg0: i32, %arg1: i32) -> (i32, i32) {
    %c0_i32 = arith.constant 0 : i32
    %c0_i32_0 = arith.constant 0 : i32
    return %c0_i32, %arg1 : i32, i32
  }
  func.func @transform_4(%arg0: i32, %arg1: i32) -> (i32, i32) {
    %c0_i32 = arith.constant 0 : i32
    %c0_i32_0 = arith.constant 0 : i32
    return %c0_i32, %arg1 : i32, i32
  }
  func.func @transform_5(%arg0: i32, %arg1: i32) -> (i32, i32) {
    %c0_i32 = arith.constant 0 : i32
    return %arg0, %arg1 : i32, i32
  }
}

module attributes {stable_mosaic.version = 11 : i64} {
  func.func @_linear_kernel(%arg0: i32, %arg1: i32, %arg2: memref<32x512xbf16, #tpu.memory_space<vmem>>, %arg3: memref<512x128xbf16, #tpu.memory_space<vmem>>, %arg4: memref<1x128xf32, #tpu.memory_space<vmem>>, %arg5: memref<32x128xf32, #tpu.memory_space<vmem>>, %arg6: memref<32x128xf32, #tpu.memory_space<vmem>>) attributes {dimension_semantics = [#tpu.dimension_semantics<parallel>, #tpu.dimension_semantics<parallel>], iteration_bounds = array<i64: 1, 1>, scalar_prefetch = 0 : i64, scratch_operands = 0 : i64, tpu.core_type = #tpu.core_type<tc>, window_params = [{transform_indices = @transform_0, window_bounds = array<i64: 32, 512>}, {transform_indices = @transform_1, window_bounds = array<i64: 512, 128>}, {transform_indices = @transform_2, window_bounds = array<i64: 1, 128>}, {transform_indices = @transform_3, window_bounds = array<i64: 32, 128>}, {transform_indices = @transform_4, window_bounds = array<i64: 32, 128>}]} {
    %c0 = arith.constant 0 : index
    %c0_0 = arith.constant 0 : index
    %0 = vector.load %arg2[%c0, %c0_0] : memref<32x512xbf16, #tpu.memory_space<vmem>>, vector<32x512xbf16>
    %c0_1 = arith.constant 0 : index
    %c0_2 = arith.constant 0 : index
    %1 = vector.load %arg3[%c0_1, %c0_2] : memref<512x128xbf16, #tpu.memory_space<vmem>>, vector<512x128xbf16>
    %cst = arith.constant dense<0.000000e+00> : vector<32x128xf32>
    %2 = tpu.matmul %0, %1, %cst {dimension_numbers = #tpu.dot_dimension_numbers<[1], [0], [0], [1], [0, 0, 1, 1], [], []>} : vector<32x512xbf16>, vector<512x128xbf16>, vector<32x128xf32> -> vector<32x128xf32>
    %c0_3 = arith.constant 0 : index
    %c0_4 = arith.constant 0 : index
    %3 = vector.load %arg4[%c0_3, %c0_4] : memref<1x128xf32, #tpu.memory_space<vmem>>, vector<1x128xf32>
    %4 = vector.broadcast %3 : vector<1x128xf32> to vector<32x128xf32>
    %5 = arith.addf %2, %4 : vector<32x128xf32>
    %c0_5 = arith.constant 0 : index
    %c0_6 = arith.constant 0 : index
    %6 = vector.load %arg5[%c0_5, %c0_6] : memref<32x128xf32, #tpu.memory_space<vmem>>, vector<32x128xf32>
    %7 = arith.addf %5, %6 : vector<32x128xf32>
    %c0_7 = arith.constant 0 : index
    %c0_8 = arith.constant 0 : index
    %8 = vector.load %arg6[%c0_7, %c0_8] : memref<32x128xf32, #tpu.memory_space<vmem>>, vector<32x128xf32>
    tpu.vector_store %arg6[%c0_7, %c0_8], %7 {strides = array<i32>} : memref<32x128xf32, #tpu.memory_space<vmem>>, vector<32x128xf32>,
    return
  }
  func.func @transform_0(%arg0: i32, %arg1: i32) -> (i32, i32) {
    %c0_i32 = arith.constant 0 : i32
    %c0_i32_0 = arith.constant 0 : i32
    return %arg0, %c0_i32 : i32, i32
  }
  func.func @transform_1(%arg0: i32, %arg1: i32) -> (i32, i32) {
    %c0_i32 = arith.constant 0 : i32
    %c0_i32_0 = arith.constant 0 : i32
    return %c0_i32, %arg1 : i32, i32
  }
  func.func @transform_2(%arg0: i32, %arg1: i32) -> (i32, i32) {
    %c0_i32 = arith.constant 0 : i32
    %c0_i32_0 = arith.constant 0 : i32
    return %c0_i32, %arg1 : i32, i32
  }
  func.func @transform_3(%arg0: i32, %arg1: i32) -> (i32, i32) {
    %c0_i32 = arith.constant 0 : i32
    return %arg0, %arg1 : i32, i32
  }
  func.func @transform_4(%arg0: i32, %arg1: i32) -> (i32, i32) {
    %c0_i32 = arith.constant 0 : i32
    return %arg0, %arg1 : i32, i32
  }
}

module attributes {stable_mosaic.version = 11 : i64} {
  func.func @_flash_attn_kernel(%arg0: i32, %arg1: i32, %arg2: i32, %arg3: memref<1x16x128xbf16, #tpu.memory_space<vmem>>, %arg4: memref<1x16x128xbf16, #tpu.memory_space<vmem>>, %arg5: memref<1x16x128xbf16, #tpu.memory_space<vmem>>, %arg6: memref<1x2x16x4xbf16, #tpu.memory_space<vmem>>, %arg7: memref<1x2x16x4xbf16, #tpu.memory_space<vmem>>, %arg8: memref<1x16x128xbf16, #tpu.memory_space<vmem>>, %arg9: memref<2x16x1xf32, #tpu.memory_space<vmem>>, %arg10: memref<2x16x1xf32, #tpu.memory_space<vmem>>, %arg11: memref<2x16x64xf32, #tpu.memory_space<vmem>>) attributes {dimension_semantics = [#tpu.dimension_semantics<parallel>, #tpu.dimension_semantics<parallel>, #tpu.dimension_semantics<arbitrary>], iteration_bounds = array<i64: 2, 1, 1>, scalar_prefetch = 0 : i64, scratch_operands = 3 : i64, tpu.core_type = #tpu.core_type<tc>, window_params = [{transform_indices = @transform_0, window_bounds = array<i64: 1, 16, 128>}, {transform_indices = @transform_1, window_bounds = array<i64: 1, 16, 128>}, {transform_indices = @transform_2, window_bounds = array<i64: 1, 16, 128>}, {transform_indices = @transform_3, window_bounds = array<i64: 1, 2, 16, 4>}, {transform_indices = @transform_4, window_bounds = array<i64: 1, 2, 16, 4>}, {transform_indices = @transform_5, window_bounds = array<i64: 1, 16, 128>}]} {
    %c0_i32 = arith.constant 0 : i32
    %0 = arith.cmpi eq, %arg2, %c0_i32 : i32
    %1 = arith.extui %0 : i1 to i32
    %c0_i32_0 = arith.constant 0 : i32
    %2 = arith.cmpi ne, %1, %c0_i32_0 : i32
    scf.if %2 {
      %cst_71 = arith.constant 0xFF800000 : f32
      %114 = vector.broadcast %cst_71 : f32 to vector<2x16x1xf32>
      %c0_72 = arith.constant 0 : index
      %c0_73 = arith.constant 0 : index
      %c0_74 = arith.constant 0 : index
      %115 = vector.load %arg9[%c0_72, %c0_73, %c0_74] : memref<2x16x1xf32, #tpu.memory_space<vmem>>, vector<2x16x1xf32>
      tpu.vector_store %arg9[%c0_72, %c0_73, %c0_74], %114 {strides = array<i32>} : memref<2x16x1xf32, #tpu.memory_space<vmem>>, vector<2x16x1xf32>,
      %cst_75 = arith.constant 0.000000e+00 : f32
      %116 = vector.broadcast %cst_75 : f32 to vector<2x16x1xf32>
      %c0_76 = arith.constant 0 : index
      %c0_77 = arith.constant 0 : index
      %c0_78 = arith.constant 0 : index
      %117 = vector.load %arg10[%c0_76, %c0_77, %c0_78] : memref<2x16x1xf32, #tpu.memory_space<vmem>>, vector<2x16x1xf32>
      tpu.vector_store %arg10[%c0_76, %c0_77, %c0_78], %116 {strides = array<i32>} : memref<2x16x1xf32, #tpu.memory_space<vmem>>, vector<2x16x1xf32>,
      %cst_79 = arith.constant 0.000000e+00 : f32
      %118 = vector.broadcast %cst_79 : f32 to vector<2x16x64xf32>
      %c0_80 = arith.constant 0 : index
      %c0_81 = arith.constant 0 : index
      %c0_82 = arith.constant 0 : index
      %119 = vector.load %arg11[%c0_80, %c0_81, %c0_82] : memref<2x16x64xf32, #tpu.memory_space<vmem>>, vector<2x16x64xf32>
      tpu.vector_store %arg11[%c0_80, %c0_81, %c0_82], %118 {strides = array<i32>} : memref<2x16x64xf32, #tpu.memory_space<vmem>>, vector<2x16x64xf32>,
    } else {
    }
    %c0 = arith.constant 0 : index
    %c0_1 = arith.constant 0 : index
    %c0_2 = arith.constant 0 : index
    %3 = vector.load %arg3[%c0, %c0_1, %c0_2] : memref<1x16x128xbf16, #tpu.memory_space<vmem>>, vector<1x16x128xbf16>
    %4 = vector.shape_cast %3 : vector<1x16x128xbf16> to vector<16x128xbf16>
    %c0_3 = arith.constant 0 : index
    %c0_4 = arith.constant 0 : index
    %c0_5 = arith.constant 0 : index
    %5 = vector.load %arg4[%c0_3, %c0_4, %c0_5] : memref<1x16x128xbf16, #tpu.memory_space<vmem>>, vector<1x16x128xbf16>
    %6 = vector.shape_cast %5 : vector<1x16x128xbf16> to vector<16x128xbf16>
    %c0_6 = arith.constant 0 : index
    %c0_7 = arith.constant 0 : index
    %c0_8 = arith.constant 0 : index
    %7 = vector.load %arg5[%c0_6, %c0_7, %c0_8] : memref<1x16x128xbf16, #tpu.memory_space<vmem>>, vector<1x16x128xbf16>
    %8 = vector.shape_cast %7 : vector<1x16x128xbf16> to vector<16x128xbf16>
    %9 = vector.extract_strided_slice %4 {offsets = [0, 0], sizes = [16, 64], strides = [1, 1]} : vector<16x128xbf16> to vector<16x64xbf16>
    %10 = vector.extract_strided_slice %6 {offsets = [0, 0], sizes = [16, 64], strides = [1, 1]} : vector<16x128xbf16> to vector<16x64xbf16>
    %11 = vector.extract_strided_slice %8 {offsets = [0, 0], sizes = [16, 64], strides = [1, 1]} : vector<16x128xbf16> to vector<16x64xbf16>
    %cst = arith.constant dense<0.000000e+00> : vector<16x16xf32>
    %12 = tpu.matmul %9, %10, %cst {dimension_numbers = #tpu.dot_dimension_numbers<[1], [1], [0], [0], [0, 0, 1, 0], [], []>} : vector<16x64xbf16>, vector<16x64xbf16>, vector<16x16xf32> -> vector<16x16xf32>
    %cst_9 = arith.constant 1.250000e-01 : f32
    %13 = vector.broadcast %cst_9 : f32 to vector<16x16xf32>
    %14 = arith.mulf %12, %13 : vector<16x16xf32>
    %c0_10 = arith.constant 0 : index
    %c0_11 = arith.constant 0 : index
    %c0_12 = arith.constant 0 : index
    %c0_13 = arith.constant 0 : index
    %15 = vector.load %arg6[%c0_10, %c0_11, %c0_12, %c0_13] : memref<1x2x16x4xbf16, #tpu.memory_space<vmem>>, vector<1x1x16x4xbf16>
    %16 = vector.shape_cast %15 : vector<1x1x16x4xbf16> to vector<16x4xbf16>
    %17 = arith.extf %16 : vector<16x4xbf16> to vector<16x4xf32>
    %c0_14 = arith.constant 0 : index
    %c0_15 = arith.constant 0 : index
    %c0_16 = arith.constant 0 : index
    %c0_17 = arith.constant 0 : index
    %18 = vector.load %arg7[%c0_14, %c0_15, %c0_16, %c0_17] : memref<1x2x16x4xbf16, #tpu.memory_space<vmem>>, vector<1x1x16x4xbf16>
    %19 = vector.shape_cast %18 : vector<1x1x16x4xbf16> to vector<16x4xbf16>
    %20 = arith.extf %19 : vector<16x4xbf16> to vector<16x4xf32>
    %21 = vector.shape_cast %17 : vector<16x4xf32> to vector<16x4x1xf32>
    %22 = vector.shape_cast %20 : vector<16x4xf32> to vector<16x1x4xf32>
    %23 = vector.broadcast %21 : vector<16x4x1xf32> to vector<16x4x4xf32>
    %24 = vector.broadcast %22 : vector<16x1x4xf32> to vector<16x4x4xf32>
    %25 = arith.addf %23, %24 : vector<16x4x4xf32>
    %26 = vector.shape_cast %25 : vector<16x4x4xf32> to vector<16x16xf32>
    %27 = arith.addf %14, %26 : vector<16x16xf32>
    %c0_18 = arith.constant 0 : index
    %c0_19 = arith.constant 0 : index
    %c0_20 = arith.constant 0 : index
    %28 = vector.load %arg9[%c0_18, %c0_19, %c0_20] : memref<2x16x1xf32, #tpu.memory_space<vmem>>, vector<1x16x1xf32>
    %29 = vector.shape_cast %28 : vector<1x16x1xf32> to vector<16x1xf32>
    %cst_21 = arith.constant dense<0xFF800000> : vector<16xf32>
    %30 = vector.multi_reduction <maximumf>, %27, %cst_21 [1] : vector<16x16xf32> to vector<16xf32>
    %31 = vector.shape_cast %30 : vector<16xf32> to vector<16x1xf32>
    %32 = arith.maximumf %29, %31 : vector<16x1xf32>
    %33 = arith.subf %29, %32 : vector<16x1xf32>
    %34 = math.exp %33 : vector<16x1xf32>
    %35 = vector.broadcast %32 : vector<16x1xf32> to vector<16x16xf32>
    %36 = arith.subf %27, %35 : vector<16x16xf32>
    %37 = math.exp %36 : vector<16x16xf32>
    %c0_22 = arith.constant 0 : index
    %c0_23 = arith.constant 0 : index
    %c0_24 = arith.constant 0 : index
    %38 = vector.load %arg10[%c0_22, %c0_23, %c0_24] : memref<2x16x1xf32, #tpu.memory_space<vmem>>, vector<1x16x1xf32>
    %39 = vector.shape_cast %38 : vector<1x16x1xf32> to vector<16x1xf32>
    %40 = arith.mulf %34, %39 : vector<16x1xf32>
    %cst_25 = arith.constant dense<0.000000e+00> : vector<16xf32>
    %41 = vector.multi_reduction <add>, %37, %cst_25 [1] : vector<16x16xf32> to vector<16xf32>
    %42 = vector.shape_cast %41 : vector<16xf32> to vector<16x1xf32>
    %43 = arith.addf %40, %42 : vector<16x1xf32>
    %c0_26 = arith.constant 0 : index
    %c0_27 = arith.constant 0 : index
    %c0_28 = arith.constant 0 : index
    %44 = vector.load %arg10[%c0_26, %c0_27, %c0_28] : memref<2x16x1xf32, #tpu.memory_space<vmem>>, vector<1x16x1xf32>
    %45 = vector.shape_cast %44 : vector<1x16x1xf32> to vector<16x1xf32>
    %46 = vector.shape_cast %43 : vector<16x1xf32> to vector<1x16x1xf32>
    tpu.vector_store %arg10[%c0_26, %c0_27, %c0_28], %46 {strides = array<i32>} : memref<2x16x1xf32, #tpu.memory_space<vmem>>, vector<1x16x1xf32>,
    %c0_29 = arith.constant 0 : index
    %c0_30 = arith.constant 0 : index
    %c0_31 = arith.constant 0 : index
    %47 = vector.load %arg11[%c0_29, %c0_30, %c0_31] : memref<2x16x64xf32, #tpu.memory_space<vmem>>, vector<1x16x64xf32>
    %48 = vector.shape_cast %47 : vector<1x16x64xf32> to vector<16x64xf32>
    %49 = vector.broadcast %34 : vector<16x1xf32> to vector<16x64xf32>
    %50 = arith.mulf %49, %48 : vector<16x64xf32>
    %51 = arith.truncf %37 : vector<16x16xf32> to vector<16x16xbf16>
    %cst_32 = arith.constant dense<0.000000e+00> : vector<16x64xf32>
    %52 = tpu.matmul %51, %11, %cst_32 {dimension_numbers = #tpu.dot_dimension_numbers<[1], [0], [0], [1], [0, 0, 1, 1], [], []>} : vector<16x16xbf16>, vector<16x64xbf16>, vector<16x64xf32> -> vector<16x64xf32>
    %53 = arith.addf %50, %52 : vector<16x64xf32>
    %c0_33 = arith.constant 0 : index
    %c0_34 = arith.constant 0 : index
    %c0_35 = arith.constant 0 : index
    %54 = vector.load %arg11[%c0_33, %c0_34, %c0_35] : memref<2x16x64xf32, #tpu.memory_space<vmem>>, vector<1x16x64xf32>
    %55 = vector.shape_cast %54 : vector<1x16x64xf32> to vector<16x64xf32>
    %56 = vector.shape_cast %53 : vector<16x64xf32> to vector<1x16x64xf32>
    tpu.vector_store %arg11[%c0_33, %c0_34, %c0_35], %56 {strides = array<i32>} : memref<2x16x64xf32, #tpu.memory_space<vmem>>, vector<1x16x64xf32>,
    %c0_36 = arith.constant 0 : index
    %c0_37 = arith.constant 0 : index
    %c0_38 = arith.constant 0 : index
    %57 = vector.load %arg9[%c0_36, %c0_37, %c0_38] : memref<2x16x1xf32, #tpu.memory_space<vmem>>, vector<1x16x1xf32>
    %58 = vector.shape_cast %57 : vector<1x16x1xf32> to vector<16x1xf32>
    %59 = vector.shape_cast %32 : vector<16x1xf32> to vector<1x16x1xf32>
    tpu.vector_store %arg9[%c0_36, %c0_37, %c0_38], %59 {strides = array<i32>} : memref<2x16x1xf32, #tpu.memory_space<vmem>>, vector<1x16x1xf32>,
    %60 = vector.extract_strided_slice %4 {offsets = [0, 64], sizes = [16, 64], strides = [1, 1]} : vector<16x128xbf16> to vector<16x64xbf16>
    %61 = vector.extract_strided_slice %6 {offsets = [0, 64], sizes = [16, 64], strides = [1, 1]} : vector<16x128xbf16> to vector<16x64xbf16>
    %62 = vector.extract_strided_slice %8 {offsets = [0, 64], sizes = [16, 64], strides = [1, 1]} : vector<16x128xbf16> to vector<16x64xbf16>
    %cst_39 = arith.constant dense<0.000000e+00> : vector<16x16xf32>
    %63 = tpu.matmul %60, %61, %cst_39 {dimension_numbers = #tpu.dot_dimension_numbers<[1], [1], [0], [0], [0, 0, 1, 0], [], []>} : vector<16x64xbf16>, vector<16x64xbf16>, vector<16x16xf32> -> vector<16x16xf32>
    %cst_40 = arith.constant 1.250000e-01 : f32
    %64 = vector.broadcast %cst_40 : f32 to vector<16x16xf32>
    %65 = arith.mulf %63, %64 : vector<16x16xf32>
    %c0_41 = arith.constant 0 : index
    %c1 = arith.constant 1 : index
    %c0_42 = arith.constant 0 : index
    %c0_43 = arith.constant 0 : index
    %66 = vector.load %arg6[%c0_41, %c1, %c0_42, %c0_43] : memref<1x2x16x4xbf16, #tpu.memory_space<vmem>>, vector<1x1x16x4xbf16>
    %67 = vector.shape_cast %66 : vector<1x1x16x4xbf16> to vector<16x4xbf16>
    %68 = arith.extf %67 : vector<16x4xbf16> to vector<16x4xf32>
    %c0_44 = arith.constant 0 : index
    %c1_45 = arith.constant 1 : index
    %c0_46 = arith.constant 0 : index
    %c0_47 = arith.constant 0 : index
    %69 = vector.load %arg7[%c0_44, %c1_45, %c0_46, %c0_47] : memref<1x2x16x4xbf16, #tpu.memory_space<vmem>>, vector<1x1x16x4xbf16>
    %70 = vector.shape_cast %69 : vector<1x1x16x4xbf16> to vector<16x4xbf16>
    %71 = arith.extf %70 : vector<16x4xbf16> to vector<16x4xf32>
    %72 = vector.shape_cast %68 : vector<16x4xf32> to vector<16x4x1xf32>
    %73 = vector.shape_cast %71 : vector<16x4xf32> to vector<16x1x4xf32>
    %74 = vector.broadcast %72 : vector<16x4x1xf32> to vector<16x4x4xf32>
    %75 = vector.broadcast %73 : vector<16x1x4xf32> to vector<16x4x4xf32>
    %76 = arith.addf %74, %75 : vector<16x4x4xf32>
    %77 = vector.shape_cast %76 : vector<16x4x4xf32> to vector<16x16xf32>
    %78 = arith.addf %65, %77 : vector<16x16xf32>
    %c1_48 = arith.constant 1 : index
    %c0_49 = arith.constant 0 : index
    %c0_50 = arith.constant 0 : index
    %79 = vector.load %arg9[%c1_48, %c0_49, %c0_50] : memref<2x16x1xf32, #tpu.memory_space<vmem>>, vector<1x16x1xf32>
    %80 = vector.shape_cast %79 : vector<1x16x1xf32> to vector<16x1xf32>
    %cst_51 = arith.constant dense<0xFF800000> : vector<16xf32>
    %81 = vector.multi_reduction <maximumf>, %78, %cst_51 [1] : vector<16x16xf32> to vector<16xf32>
    %82 = vector.shape_cast %81 : vector<16xf32> to vector<16x1xf32>
    %83 = arith.maximumf %80, %82 : vector<16x1xf32>
    %84 = arith.subf %80, %83 : vector<16x1xf32>
    %85 = math.exp %84 : vector<16x1xf32>
    %86 = vector.broadcast %83 : vector<16x1xf32> to vector<16x16xf32>
    %87 = arith.subf %78, %86 : vector<16x16xf32>
    %88 = math.exp %87 : vector<16x16xf32>
    %c1_52 = arith.constant 1 : index
    %c0_53 = arith.constant 0 : index
    %c0_54 = arith.constant 0 : index
    %89 = vector.load %arg10[%c1_52, %c0_53, %c0_54] : memref<2x16x1xf32, #tpu.memory_space<vmem>>, vector<1x16x1xf32>
    %90 = vector.shape_cast %89 : vector<1x16x1xf32> to vector<16x1xf32>
    %91 = arith.mulf %85, %90 : vector<16x1xf32>
    %cst_55 = arith.constant dense<0.000000e+00> : vector<16xf32>
    %92 = vector.multi_reduction <add>, %88, %cst_55 [1] : vector<16x16xf32> to vector<16xf32>
    %93 = vector.shape_cast %92 : vector<16xf32> to vector<16x1xf32>
    %94 = arith.addf %91, %93 : vector<16x1xf32>
    %c1_56 = arith.constant 1 : index
    %c0_57 = arith.constant 0 : index
    %c0_58 = arith.constant 0 : index
    %95 = vector.load %arg10[%c1_56, %c0_57, %c0_58] : memref<2x16x1xf32, #tpu.memory_space<vmem>>, vector<1x16x1xf32>
    %96 = vector.shape_cast %95 : vector<1x16x1xf32> to vector<16x1xf32>
    %97 = vector.shape_cast %94 : vector<16x1xf32> to vector<1x16x1xf32>
    tpu.vector_store %arg10[%c1_56, %c0_57, %c0_58], %97 {strides = array<i32>} : memref<2x16x1xf32, #tpu.memory_space<vmem>>, vector<1x16x1xf32>,
    %c1_59 = arith.constant 1 : index
    %c0_60 = arith.constant 0 : index
    %c0_61 = arith.constant 0 : index
    %98 = vector.load %arg11[%c1_59, %c0_60, %c0_61] : memref<2x16x64xf32, #tpu.memory_space<vmem>>, vector<1x16x64xf32>
    %99 = vector.shape_cast %98 : vector<1x16x64xf32> to vector<16x64xf32>
    %100 = vector.broadcast %85 : vector<16x1xf32> to vector<16x64xf32>
    %101 = arith.mulf %100, %99 : vector<16x64xf32>
    %102 = arith.truncf %88 : vector<16x16xf32> to vector<16x16xbf16>
    %cst_62 = arith.constant dense<0.000000e+00> : vector<16x64xf32>
    %103 = tpu.matmul %102, %62, %cst_62 {dimension_numbers = #tpu.dot_dimension_numbers<[1], [0], [0], [1], [0, 0, 1, 1], [], []>} : vector<16x16xbf16>, vector<16x64xbf16>, vector<16x64xf32> -> vector<16x64xf32>
    %104 = arith.addf %101, %103 : vector<16x64xf32>
    %c1_63 = arith.constant 1 : index
    %c0_64 = arith.constant 0 : index
    %c0_65 = arith.constant 0 : index
    %105 = vector.load %arg11[%c1_63, %c0_64, %c0_65] : memref<2x16x64xf32, #tpu.memory_space<vmem>>, vector<1x16x64xf32>
    %106 = vector.shape_cast %105 : vector<1x16x64xf32> to vector<16x64xf32>
    %107 = vector.shape_cast %104 : vector<16x64xf32> to vector<1x16x64xf32>
    tpu.vector_store %arg11[%c1_63, %c0_64, %c0_65], %107 {strides = array<i32>} : memref<2x16x64xf32, #tpu.memory_space<vmem>>, vector<1x16x64xf32>,
    %c1_66 = arith.constant 1 : index
    %c0_67 = arith.constant 0 : index
    %c0_68 = arith.constant 0 : index
    %108 = vector.load %arg9[%c1_66, %c0_67, %c0_68] : memref<2x16x1xf32, #tpu.memory_space<vmem>>, vector<1x16x1xf32>
    %109 = vector.shape_cast %108 : vector<1x16x1xf32> to vector<16x1xf32>
    %110 = vector.shape_cast %83 : vector<16x1xf32> to vector<1x16x1xf32>
    tpu.vector_store %arg9[%c1_66, %c0_67, %c0_68], %110 {strides = array<i32>} : memref<2x16x1xf32, #tpu.memory_space<vmem>>, vector<1x16x1xf32>,
    %c0_i32_69 = arith.constant 0 : i32
    %111 = arith.cmpi eq, %arg2, %c0_i32_69 : i32
    %112 = arith.extui %111 : i1 to i32
    %c0_i32_70 = arith.constant 0 : i32
    %113 = arith.cmpi ne, %112, %c0_i32_70 : i32
    scf.if %113 {
      %c0_71 = arith.constant 0 : index
      %c0_72 = arith.constant 0 : index
      %c0_73 = arith.constant 0 : index
      %114 = vector.load %arg11[%c0_71, %c0_72, %c0_73] : memref<2x16x64xf32, #tpu.memory_space<vmem>>, vector<1x16x64xf32>
      %115 = vector.shape_cast %114 : vector<1x16x64xf32> to vector<16x64xf32>
      %c0_74 = arith.constant 0 : index
      %c0_75 = arith.constant 0 : index
      %c0_76 = arith.constant 0 : index
      %116 = vector.load %arg10[%c0_74, %c0_75, %c0_76] : memref<2x16x1xf32, #tpu.memory_space<vmem>>, vector<1x16x1xf32>
      %117 = vector.shape_cast %116 : vector<1x16x1xf32> to vector<16x1xf32>
      %118 = tpu.reciprocal %117 {approx = true} : vector<16x1xf32> -> vector<16x1xf32>
      %119 = vector.broadcast %118 : vector<16x1xf32> to vector<16x64xf32>
      %120 = arith.mulf %115, %119 : vector<16x64xf32>
      %c1_77 = arith.constant 1 : index
      %c0_78 = arith.constant 0 : index
      %c0_79 = arith.constant 0 : index
      %121 = vector.load %arg11[%c1_77, %c0_78, %c0_79] : memref<2x16x64xf32, #tpu.memory_space<vmem>>, vector<1x16x64xf32>
      %122 = vector.shape_cast %121 : vector<1x16x64xf32> to vector<16x64xf32>
      %c1_80 = arith.constant 1 : index
      %c0_81 = arith.constant 0 : index
      %c0_82 = arith.constant 0 : index
      %123 = vector.load %arg10[%c1_80, %c0_81, %c0_82] : memref<2x16x1xf32, #tpu.memory_space<vmem>>, vector<1x16x1xf32>
      %124 = vector.shape_cast %123 : vector<1x16x1xf32> to vector<16x1xf32>
      %125 = tpu.reciprocal %124 {approx = true} : vector<16x1xf32> -> vector<16x1xf32>
      %126 = vector.broadcast %125 : vector<16x1xf32> to vector<16x64xf32>
      %127 = arith.mulf %122, %126 : vector<16x64xf32>
      %128 = tpu.concatenate %120, %127 in 1 : vector<16x64xf32>, vector<16x64xf32> -> vector<16x128xf32>
      %129 = arith.truncf %128 : vector<16x128xf32> to vector<16x128xbf16>
      %c0_83 = arith.constant 0 : index
      %c0_84 = arith.constant 0 : index
      %c0_85 = arith.constant 0 : index
      %130 = vector.load %arg8[%c0_83, %c0_84, %c0_85] : memref<1x16x128xbf16, #tpu.memory_space<vmem>>, vector<1x16x128xbf16>
      %131 = vector.shape_cast %130 : vector<1x16x128xbf16> to vector<16x128xbf16>
      %132 = vector.shape_cast %129 : vector<16x128xbf16> to vector<1x16x128xbf16>
      tpu.vector_store %arg8[%c0_83, %c0_84, %c0_85], %132 {strides = array<i32>} : memref<1x16x128xbf16, #tpu.memory_space<vmem>>, vector<1x16x128xbf16>,
    } else {
    }
    return
  }
  func.func @transform_0(%arg0: i32, %arg1: i32, %arg2: i32) -> (i32, i32, i32) {
    %c0_i32 = arith.constant 0 : i32
    %c0_i32_0 = arith.constant 0 : i32
    return %arg0, %arg1, %c0_i32 : i32, i32, i32
  }
  func.func @transform_1(%arg0: i32, %arg1: i32, %arg2: i32) -> (i32, i32, i32) {
    %c1_i32 = arith.constant 1 : i32
    %c0_i32 = arith.constant 0 : i32
    return %arg0, %arg2, %c1_i32 : i32, i32, i32
  }
  func.func @transform_2(%arg0: i32, %arg1: i32, %arg2: i32) -> (i32, i32, i32) {
    %c2_i32 = arith.constant 2 : i32
    %c0_i32 = arith.constant 0 : i32
    return %arg0, %arg2, %c2_i32 : i32, i32, i32
  }
  func.func @transform_3(%arg0: i32, %arg1: i32, %arg2: i32) -> (i32, i32, i32, i32) {
    %c0_i32 = arith.constant 0 : i32
    %c0_i32_0 = arith.constant 0 : i32
    %c0_i32_1 = arith.constant 0 : i32
    return %arg0, %c0_i32, %arg1, %c0_i32_0 : i32, i32, i32, i32
  }
  func.func @transform_4(%arg0: i32, %arg1: i32, %arg2: i32) -> (i32, i32, i32, i32) {
    %c0_i32 = arith.constant 0 : i32
    %c0_i32_0 = arith.constant 0 : i32
    %c0_i32_1 = arith.constant 0 : i32
    return %arg0, %c0_i32, %arg1, %c0_i32_0 : i32, i32, i32, i32
  }
  func.func @transform_5(%arg0: i32, %arg1: i32, %arg2: i32) -> (i32, i32, i32) {
    %c0_i32 = arith.constant 0 : i32
    %c0_i32_0 = arith.constant 0 : i32
    return %arg0, %arg1, %c0_i32 : i32, i32, i32
  }
}

module attributes {stable_mosaic.version = 11 : i64} {
  func.func @_linear_kernel(%arg0: i32, %arg1: i32, %arg2: memref<32x128xf32, #tpu.memory_space<vmem>>, %arg3: memref<128x32xbf16, #tpu.memory_space<vmem>>, %arg4: memref<1x32xf32, #tpu.memory_space<vmem>>, %arg5: memref<32x32xf32, #tpu.memory_space<vmem>>) attributes {dimension_semantics = [#tpu.dimension_semantics<parallel>, #tpu.dimension_semantics<parallel>], iteration_bounds = array<i64: 1, 1>, scalar_prefetch = 0 : i64, scratch_operands = 0 : i64, tpu.core_type = #tpu.core_type<tc>, window_params = [{transform_indices = @transform_0, window_bounds = array<i64: 32, 128>}, {transform_indices = @transform_1, window_bounds = array<i64: 128, 32>}, {transform_indices = @transform_2, window_bounds = array<i64: 1, 32>}, {transform_indices = @transform_3, window_bounds = array<i64: 32, 32>}]} {
    %c0 = arith.constant 0 : index
    %c0_0 = arith.constant 0 : index
    %0 = vector.load %arg2[%c0, %c0_0] : memref<32x128xf32, #tpu.memory_space<vmem>>, vector<32x128xf32>
    %1 = arith.truncf %0 : vector<32x128xf32> to vector<32x128xbf16>
    %c0_1 = arith.constant 0 : index
    %c0_2 = arith.constant 0 : index
    %2 = vector.load %arg3[%c0_1, %c0_2] : memref<128x32xbf16, #tpu.memory_space<vmem>>, vector<128x32xbf16>
    %cst = arith.constant dense<0.000000e+00> : vector<32x32xf32>
    %3 = tpu.matmul %1, %2, %cst {dimension_numbers = #tpu.dot_dimension_numbers<[1], [0], [0], [1], [0, 0, 1, 1], [], []>} : vector<32x128xbf16>, vector<128x32xbf16>, vector<32x32xf32> -> vector<32x32xf32>
    %c0_3 = arith.constant 0 : index
    %c0_4 = arith.constant 0 : index
    %4 = vector.load %arg4[%c0_3, %c0_4] : memref<1x32xf32, #tpu.memory_space<vmem>>, vector<1x32xf32>
    %5 = vector.broadcast %4 : vector<1x32xf32> to vector<32x32xf32>
    %6 = arith.addf %3, %5 : vector<32x32xf32>
    %c0_5 = arith.constant 0 : index
    %c0_6 = arith.constant 0 : index
    %7 = vector.load %arg5[%c0_5, %c0_6] : memref<32x32xf32, #tpu.memory_space<vmem>>, vector<32x32xf32>
    tpu.vector_store %arg5[%c0_5, %c0_6], %6 {strides = array<i32>} : memref<32x32xf32, #tpu.memory_space<vmem>>, vector<32x32xf32>,
    return
  }
  func.func @transform_0(%arg0: i32, %arg1: i32) -> (i32, i32) {
    %c0_i32 = arith.constant 0 : i32
    %c0_i32_0 = arith.constant 0 : i32
    return %arg0, %c0_i32 : i32, i32
  }
  func.func @transform_1(%arg0: i32, %arg1: i32) -> (i32, i32) {
    %c0_i32 = arith.constant 0 : i32
    %c0_i32_0 = arith.constant 0 : i32
    return %c0_i32, %arg1 : i32, i32
  }
  func.func @transform_2(%arg0: i32, %arg1: i32) -> (i32, i32) {
    %c0_i32 = arith.constant 0 : i32
    %c0_i32_0 = arith.constant 0 : i32
    return %c0_i32, %arg1 : i32, i32
  }
  func.func @transform_3(%arg0: i32, %arg1: i32) -> (i32, i32) {
    %c0_i32 = arith.constant 0 : i32
    return %arg0, %arg1 : i32, i32
  }
}

module attributes {stable_mosaic.version = 11 : i64} {
  func.func @_layernorm_kernel(%arg0: i32, %arg1: memref<32x32xf32, #tpu.memory_space<vmem>>, %arg2: memref<1x32xf32, #tpu.memory_space<vmem>>, %arg3: memref<1x32xf32, #tpu.memory_space<vmem>>, %arg4: memref<32x32xbf16, #tpu.memory_space<vmem>>) attributes {dimension_semantics = [#tpu.dimension_semantics<parallel>], iteration_bounds = array<i64: 1>, scalar_prefetch = 0 : i64, scratch_operands = 0 : i64, tpu.core_type = #tpu.core_type<tc>, window_params = [{transform_indices = @transform_0, window_bounds = array<i64: 32, 32>}, {pipeline_mode = #tpu.pipeline_mode<synchronous>, transform_indices = @transform_1, window_bounds = array<i64: 1, 32>}, {pipeline_mode = #tpu.pipeline_mode<synchronous>, transform_indices = @transform_2, window_bounds = array<i64: 1, 32>}, {transform_indices = @transform_3, window_bounds = array<i64: 32, 32>}]} {
    %c0 = arith.constant 0 : index
    %c0_0 = arith.constant 0 : index
    %0 = vector.load %arg1[%c0, %c0_0] : memref<32x32xf32, #tpu.memory_space<vmem>>, vector<32x32xf32>
    %cst = arith.constant dense<0.000000e+00> : vector<32xf32>
    %1 = vector.multi_reduction <add>, %0, %cst [1] : vector<32x32xf32> to vector<32xf32>
    %2 = vector.shape_cast %1 : vector<32xf32> to vector<32x1xf32>
    %cst_1 = arith.constant 3.200000e+01 : f32
    %3 = vector.broadcast %cst_1 : f32 to vector<32x1xf32>
    %4 = arith.divf %2, %3 : vector<32x1xf32>
    %5 = vector.broadcast %4 : vector<32x1xf32> to vector<32x32xf32>
    %6 = arith.subf %0, %5 : vector<32x32xf32>
    %7 = arith.mulf %6, %6 : vector<32x32xf32>
    %cst_2 = arith.constant dense<0.000000e+00> : vector<32xf32>
    %8 = vector.multi_reduction <add>, %7, %cst_2 [1] : vector<32x32xf32> to vector<32xf32>
    %9 = vector.shape_cast %8 : vector<32xf32> to vector<32x1xf32>
    %cst_3 = arith.constant 3.200000e+01 : f32
    %10 = vector.broadcast %cst_3 : f32 to vector<32x1xf32>
    %11 = arith.divf %9, %10 : vector<32x1xf32>
    %cst_4 = arith.constant 9.99999997E-7 : f32
    %12 = vector.broadcast %cst_4 : f32 to vector<32x1xf32>
    %13 = arith.addf %11, %12 : vector<32x1xf32>
    %14 = math.rsqrt %13 : vector<32x1xf32>
    %15 = vector.broadcast %14 : vector<32x1xf32> to vector<32x32xf32>
    %16 = arith.mulf %6, %15 : vector<32x32xf32>
    %c0_5 = arith.constant 0 : index
    %c0_6 = arith.constant 0 : index
    %17 = vector.load %arg2[%c0_5, %c0_6] : memref<1x32xf32, #tpu.memory_space<vmem>>, vector<1x32xf32>
    %18 = vector.broadcast %17 : vector<1x32xf32> to vector<32x32xf32>
    %19 = arith.mulf %16, %18 : vector<32x32xf32>
    %c0_7 = arith.constant 0 : index
    %c0_8 = arith.constant 0 : index
    %20 = vector.load %arg3[%c0_7, %c0_8] : memref<1x32xf32, #tpu.memory_space<vmem>>, vector<1x32xf32>
    %21 = vector.broadcast %20 : vector<1x32xf32> to vector<32x32xf32>
    %22 = arith.addf %19, %21 : vector<32x32xf32>
    %23 = arith.truncf %22 : vector<32x32xf32> to vector<32x32xbf16>
    %c0_9 = arith.constant 0 : index
    %c0_10 = arith.constant 0 : index
    %24 = vector.load %arg4[%c0_9, %c0_10] : memref<32x32xbf16, #tpu.memory_space<vmem>>, vector<32x32xbf16>
    tpu.vector_store %arg4[%c0_9, %c0_10], %23 {strides = array<i32>} : memref<32x32xbf16, #tpu.memory_space<vmem>>, vector<32x32xbf16>,
    return
  }
  func.func @transform_0(%arg0: i32) -> (i32, i32) {
    %c0_i32 = arith.constant 0 : i32
    %c0_i32_0 = arith.constant 0 : i32
    return %arg0, %c0_i32 : i32, i32
  }
  func.func @transform_1(%arg0: i32) -> (i32, i32) {
    %c0_i32 = arith.constant 0 : i32
    %c0_i32_0 = arith.constant 0 : i32
    %c0_i32_1 = arith.constant 0 : i32
    return %c0_i32, %c0_i32_0 : i32, i32
  }
  func.func @transform_2(%arg0: i32) -> (i32, i32) {
    %c0_i32 = arith.constant 0 : i32
    %c0_i32_0 = arith.constant 0 : i32
    %c0_i32_1 = arith.constant 0 : i32
    return %c0_i32, %c0_i32_0 : i32, i32
  }
  func.func @transform_3(%arg0: i32) -> (i32, i32) {
    %c0_i32 = arith.constant 0 : i32
    %c0_i32_0 = arith.constant 0 : i32
    return %arg0, %c0_i32 : i32, i32
  }
}

module attributes {stable_mosaic.version = 11 : i64} {
  func.func @_linear_kernel(%arg0: i32, %arg1: i32, %arg2: memref<32x128xbf16, #tpu.memory_space<vmem>>, %arg3: memref<128x128xbf16, #tpu.memory_space<vmem>>, %arg4: memref<1x128xf32, #tpu.memory_space<vmem>>, %arg5: memref<32x128xf32, #tpu.memory_space<vmem>>, %arg6: memref<32x128xf32, #tpu.memory_space<vmem>>) attributes {dimension_semantics = [#tpu.dimension_semantics<parallel>, #tpu.dimension_semantics<parallel>], iteration_bounds = array<i64: 1, 1>, scalar_prefetch = 0 : i64, scratch_operands = 0 : i64, tpu.core_type = #tpu.core_type<tc>, window_params = [{transform_indices = @transform_0, window_bounds = array<i64: 32, 128>}, {transform_indices = @transform_1, window_bounds = array<i64: 128, 128>}, {transform_indices = @transform_2, window_bounds = array<i64: 1, 128>}, {transform_indices = @transform_3, window_bounds = array<i64: 32, 128>}, {transform_indices = @transform_4, window_bounds = array<i64: 32, 128>}]} {
    %c0 = arith.constant 0 : index
    %c0_0 = arith.constant 0 : index
    %0 = vector.load %arg2[%c0, %c0_0] : memref<32x128xbf16, #tpu.memory_space<vmem>>, vector<32x128xbf16>
    %c0_1 = arith.constant 0 : index
    %c0_2 = arith.constant 0 : index
    %1 = vector.load %arg3[%c0_1, %c0_2] : memref<128x128xbf16, #tpu.memory_space<vmem>>, vector<128x128xbf16>
    %cst = arith.constant dense<0.000000e+00> : vector<32x128xf32>
    %2 = tpu.matmul %0, %1, %cst {dimension_numbers = #tpu.dot_dimension_numbers<[1], [0], [0], [1], [0, 0, 1, 1], [], []>} : vector<32x128xbf16>, vector<128x128xbf16>, vector<32x128xf32> -> vector<32x128xf32>
    %c0_3 = arith.constant 0 : index
    %c0_4 = arith.constant 0 : index
    %3 = vector.load %arg4[%c0_3, %c0_4] : memref<1x128xf32, #tpu.memory_space<vmem>>, vector<1x128xf32>
    %4 = vector.broadcast %3 : vector<1x128xf32> to vector<32x128xf32>
    %5 = arith.addf %2, %4 : vector<32x128xf32>
    %c0_5 = arith.constant 0 : index
    %c0_6 = arith.constant 0 : index
    %6 = vector.load %arg5[%c0_5, %c0_6] : memref<32x128xf32, #tpu.memory_space<vmem>>, vector<32x128xf32>
    %7 = arith.addf %5, %6 : vector<32x128xf32>
    %c0_7 = arith.constant 0 : index
    %c0_8 = arith.constant 0 : index
    %8 = vector.load %arg6[%c0_7, %c0_8] : memref<32x128xf32, #tpu.memory_space<vmem>>, vector<32x128xf32>
    tpu.vector_store %arg6[%c0_7, %c0_8], %7 {strides = array<i32>} : memref<32x128xf32, #tpu.memory_space<vmem>>, vector<32x128xf32>,
    return
  }
  func.func @transform_0(%arg0: i32, %arg1: i32) -> (i32, i32) {
    %c0_i32 = arith.constant 0 : i32
    %c0_i32_0 = arith.constant 0 : i32
    return %arg0, %c0_i32 : i32, i32
  }
  func.func @transform_1(%arg0: i32, %arg1: i32) -> (i32, i32) {
    %c0_i32 = arith.constant 0 : i32
    %c0_i32_0 = arith.constant 0 : i32
    return %c0_i32, %arg1 : i32, i32
  }
  func.func @transform_2(%arg0: i32, %arg1: i32) -> (i32, i32) {
    %c0_i32 = arith.constant 0 : i32
    %c0_i32_0 = arith.constant 0 : i32
    return %c0_i32, %arg1 : i32, i32
  }
  func.func @transform_3(%arg0: i32, %arg1: i32) -> (i32, i32) {
    %c0_i32 = arith.constant 0 : i32
    return %arg0, %arg1 : i32, i32
  }
  func.func @transform_4(%arg0: i32, %arg1: i32) -> (i32, i32) {
    %c0_i32 = arith.constant 0 : i32
    return %arg0, %arg1 : i32, i32
  }
}

module attributes {stable_mosaic.version = 11 : i64} {
  func.func @_conv3x3_kernel(%arg0: i32, %arg1: memref<1x6x6x32xbf16, #tpu.memory_space<vmem>>, %arg2: memref<3x3x32x32xbf16, #tpu.memory_space<vmem>>, %arg3: memref<1x4x4x32xf32, #tpu.memory_space<vmem>>) attributes {dimension_semantics = [#tpu.dimension_semantics<parallel>], iteration_bounds = array<i64: 2>, scalar_prefetch = 0 : i64, scratch_operands = 0 : i64, tpu.core_type = #tpu.core_type<tc>, window_params = [{transform_indices = @transform_0, window_bounds = array<i64: 1, 6, 6, 32>}, {pipeline_mode = #tpu.pipeline_mode<synchronous>, transform_indices = @transform_1, window_bounds = array<i64: 3, 3, 32, 32>}, {transform_indices = @transform_2, window_bounds = array<i64: 1, 4, 4, 32>}]} {
    %c0 = arith.constant 0 : index
    %c0_0 = arith.constant 0 : index
    %c0_1 = arith.constant 0 : index
    %c0_2 = arith.constant 0 : index
    %0 = vector.load %arg1[%c0, %c0_0, %c0_1, %c0_2] : memref<1x6x6x32xbf16, #tpu.memory_space<vmem>>, vector<1x6x6x32xbf16>
    %1 = vector.shape_cast %0 : vector<1x6x6x32xbf16> to vector<6x6x32xbf16>
    %cst = arith.constant 0.000000e+00 : f32
    %2 = vector.broadcast %cst : f32 to vector<16x32xf32>
    %3 = vector.extract_strided_slice %1 {offsets = [0, 0, 0], sizes = [4, 4, 32], strides = [1, 1, 1]} : vector<6x6x32xbf16> to vector<4x4x32xbf16>
    %4 = vector.shape_cast %3 : vector<4x4x32xbf16> to vector<16x32xbf16>
    %c0_3 = arith.constant 0 : index
    %c0_4 = arith.constant 0 : index
    %c0_5 = arith.constant 0 : index
    %c0_6 = arith.constant 0 : index
    %5 = vector.load %arg2[%c0_3, %c0_4, %c0_5, %c0_6] : memref<3x3x32x32xbf16, #tpu.memory_space<vmem>>, vector<1x1x32x32xbf16>
    %6 = vector.shape_cast %5 : vector<1x1x32x32xbf16> to vector<32x32xbf16>
    %cst_7 = arith.constant dense<0.000000e+00> : vector<16x32xf32>
    %7 = tpu.matmul %4, %6, %cst_7 {dimension_numbers = #tpu.dot_dimension_numbers<[1], [0], [0], [1], [0, 0, 1, 1], [], []>} : vector<16x32xbf16>, vector<32x32xbf16>, vector<16x32xf32> -> vector<16x32xf32>
    %8 = arith.addf %2, %7 : vector<16x32xf32>
    %9 = vector.extract_strided_slice %1 {offsets = [0, 1, 0], sizes = [4, 4, 32], strides = [1, 1, 1]} : vector<6x6x32xbf16> to vector<4x4x32xbf16>
    %10 = vector.shape_cast %9 : vector<4x4x32xbf16> to vector<16x32xbf16>
    %c0_8 = arith.constant 0 : index
    %c1 = arith.constant 1 : index
    %c0_9 = arith.constant 0 : index
    %c0_10 = arith.constant 0 : index
    %11 = vector.load %arg2[%c0_8, %c1, %c0_9, %c0_10] : memref<3x3x32x32xbf16, #tpu.memory_space<vmem>>, vector<1x1x32x32xbf16>
    %12 = vector.shape_cast %11 : vector<1x1x32x32xbf16> to vector<32x32xbf16>
    %cst_11 = arith.constant dense<0.000000e+00> : vector<16x32xf32>
    %13 = tpu.matmul %10, %12, %cst_11 {dimension_numbers = #tpu.dot_dimension_numbers<[1], [0], [0], [1], [0, 0, 1, 1], [], []>} : vector<16x32xbf16>, vector<32x32xbf16>, vector<16x32xf32> -> vector<16x32xf32>
    %14 = arith.addf %8, %13 : vector<16x32xf32>
    %15 = vector.extract_strided_slice %1 {offsets = [0, 2, 0], sizes = [4, 4, 32], strides = [1, 1, 1]} : vector<6x6x32xbf16> to vector<4x4x32xbf16>
    %16 = vector.shape_cast %15 : vector<4x4x32xbf16> to vector<16x32xbf16>
    %c0_12 = arith.constant 0 : index
    %c2 = arith.constant 2 : index
    %c0_13 = arith.constant 0 : index
    %c0_14 = arith.constant 0 : index
    %17 = vector.load %arg2[%c0_12, %c2, %c0_13, %c0_14] : memref<3x3x32x32xbf16, #tpu.memory_space<vmem>>, vector<1x1x32x32xbf16>
    %18 = vector.shape_cast %17 : vector<1x1x32x32xbf16> to vector<32x32xbf16>
    %cst_15 = arith.constant dense<0.000000e+00> : vector<16x32xf32>
    %19 = tpu.matmul %16, %18, %cst_15 {dimension_numbers = #tpu.dot_dimension_numbers<[1], [0], [0], [1], [0, 0, 1, 1], [], []>} : vector<16x32xbf16>, vector<32x32xbf16>, vector<16x32xf32> -> vector<16x32xf32>
    %20 = arith.addf %14, %19 : vector<16x32xf32>
    %21 = vector.extract_strided_slice %1 {offsets = [1, 0, 0], sizes = [4, 4, 32], strides = [1, 1, 1]} : vector<6x6x32xbf16> to vector<4x4x32xbf16>
    %22 = vector.shape_cast %21 : vector<4x4x32xbf16> to vector<16x32xbf16>
    %c1_16 = arith.constant 1 : index
    %c0_17 = arith.constant 0 : index
    %c0_18 = arith.constant 0 : index
    %c0_19 = arith.constant 0 : index
    %23 = vector.load %arg2[%c1_16, %c0_17, %c0_18, %c0_19] : memref<3x3x32x32xbf16, #tpu.memory_space<vmem>>, vector<1x1x32x32xbf16>
    %24 = vector.shape_cast %23 : vector<1x1x32x32xbf16> to vector<32x32xbf16>
    %cst_20 = arith.constant dense<0.000000e+00> : vector<16x32xf32>
    %25 = tpu.matmul %22, %24, %cst_20 {dimension_numbers = #tpu.dot_dimension_numbers<[1], [0], [0], [1], [0, 0, 1, 1], [], []>} : vector<16x32xbf16>, vector<32x32xbf16>, vector<16x32xf32> -> vector<16x32xf32>
    %26 = arith.addf %20, %25 : vector<16x32xf32>
    %27 = vector.extract_strided_slice %1 {offsets = [1, 1, 0], sizes = [4, 4, 32], strides = [1, 1, 1]} : vector<6x6x32xbf16> to vector<4x4x32xbf16>
    %28 = vector.shape_cast %27 : vector<4x4x32xbf16> to vector<16x32xbf16>
    %c1_21 = arith.constant 1 : index
    %c1_22 = arith.constant 1 : index
    %c0_23 = arith.constant 0 : index
    %c0_24 = arith.constant 0 : index
    %29 = vector.load %arg2[%c1_21, %c1_22, %c0_23, %c0_24] : memref<3x3x32x32xbf16, #tpu.memory_space<vmem>>, vector<1x1x32x32xbf16>
    %30 = vector.shape_cast %29 : vector<1x1x32x32xbf16> to vector<32x32xbf16>
    %cst_25 = arith.constant dense<0.000000e+00> : vector<16x32xf32>
    %31 = tpu.matmul %28, %30, %cst_25 {dimension_numbers = #tpu.dot_dimension_numbers<[1], [0], [0], [1], [0, 0, 1, 1], [], []>} : vector<16x32xbf16>, vector<32x32xbf16>, vector<16x32xf32> -> vector<16x32xf32>
    %32 = arith.addf %26, %31 : vector<16x32xf32>
    %33 = vector.extract_strided_slice %1 {offsets = [1, 2, 0], sizes = [4, 4, 32], strides = [1, 1, 1]} : vector<6x6x32xbf16> to vector<4x4x32xbf16>
    %34 = vector.shape_cast %33 : vector<4x4x32xbf16> to vector<16x32xbf16>
    %c1_26 = arith.constant 1 : index
    %c2_27 = arith.constant 2 : index
    %c0_28 = arith.constant 0 : index
    %c0_29 = arith.constant 0 : index
    %35 = vector.load %arg2[%c1_26, %c2_27, %c0_28, %c0_29] : memref<3x3x32x32xbf16, #tpu.memory_space<vmem>>, vector<1x1x32x32xbf16>
    %36 = vector.shape_cast %35 : vector<1x1x32x32xbf16> to vector<32x32xbf16>
    %cst_30 = arith.constant dense<0.000000e+00> : vector<16x32xf32>
    %37 = tpu.matmul %34, %36, %cst_30 {dimension_numbers = #tpu.dot_dimension_numbers<[1], [0], [0], [1], [0, 0, 1, 1], [], []>} : vector<16x32xbf16>, vector<32x32xbf16>, vector<16x32xf32> -> vector<16x32xf32>
    %38 = arith.addf %32, %37 : vector<16x32xf32>
    %39 = vector.extract_strided_slice %1 {offsets = [2, 0, 0], sizes = [4, 4, 32], strides = [1, 1, 1]} : vector<6x6x32xbf16> to vector<4x4x32xbf16>
    %40 = vector.shape_cast %39 : vector<4x4x32xbf16> to vector<16x32xbf16>
    %c2_31 = arith.constant 2 : index
    %c0_32 = arith.constant 0 : index
    %c0_33 = arith.constant 0 : index
    %c0_34 = arith.constant 0 : index
    %41 = vector.load %arg2[%c2_31, %c0_32, %c0_33, %c0_34] : memref<3x3x32x32xbf16, #tpu.memory_space<vmem>>, vector<1x1x32x32xbf16>
    %42 = vector.shape_cast %41 : vector<1x1x32x32xbf16> to vector<32x32xbf16>
    %cst_35 = arith.constant dense<0.000000e+00> : vector<16x32xf32>
    %43 = tpu.matmul %40, %42, %cst_35 {dimension_numbers = #tpu.dot_dimension_numbers<[1], [0], [0], [1], [0, 0, 1, 1], [], []>} : vector<16x32xbf16>, vector<32x32xbf16>, vector<16x32xf32> -> vector<16x32xf32>
    %44 = arith.addf %38, %43 : vector<16x32xf32>
    %45 = vector.extract_strided_slice %1 {offsets = [2, 1, 0], sizes = [4, 4, 32], strides = [1, 1, 1]} : vector<6x6x32xbf16> to vector<4x4x32xbf16>
    %46 = vector.shape_cast %45 : vector<4x4x32xbf16> to vector<16x32xbf16>
    %c2_36 = arith.constant 2 : index
    %c1_37 = arith.constant 1 : index
    %c0_38 = arith.constant 0 : index
    %c0_39 = arith.constant 0 : index
    %47 = vector.load %arg2[%c2_36, %c1_37, %c0_38, %c0_39] : memref<3x3x32x32xbf16, #tpu.memory_space<vmem>>, vector<1x1x32x32xbf16>
    %48 = vector.shape_cast %47 : vector<1x1x32x32xbf16> to vector<32x32xbf16>
    %cst_40 = arith.constant dense<0.000000e+00> : vector<16x32xf32>
    %49 = tpu.matmul %46, %48, %cst_40 {dimension_numbers = #tpu.dot_dimension_numbers<[1], [0], [0], [1], [0, 0, 1, 1], [], []>} : vector<16x32xbf16>, vector<32x32xbf16>, vector<16x32xf32> -> vector<16x32xf32>
    %50 = arith.addf %44, %49 : vector<16x32xf32>
    %51 = vector.extract_strided_slice %1 {offsets = [2, 2, 0], sizes = [4, 4, 32], strides = [1, 1, 1]} : vector<6x6x32xbf16> to vector<4x4x32xbf16>
    %52 = vector.shape_cast %51 : vector<4x4x32xbf16> to vector<16x32xbf16>
    %c2_41 = arith.constant 2 : index
    %c2_42 = arith.constant 2 : index
    %c0_43 = arith.constant 0 : index
    %c0_44 = arith.constant 0 : index
    %53 = vector.load %arg2[%c2_41, %c2_42, %c0_43, %c0_44] : memref<3x3x32x32xbf16, #tpu.memory_space<vmem>>, vector<1x1x32x32xbf16>
    %54 = vector.shape_cast %53 : vector<1x1x32x32xbf16> to vector<32x32xbf16>
    %cst_45 = arith.constant dense<0.000000e+00> : vector<16x32xf32>
    %55 = tpu.matmul %52, %54, %cst_45 {dimension_numbers = #tpu.dot_dimension_numbers<[1], [0], [0], [1], [0, 0, 1, 1], [], []>} : vector<16x32xbf16>, vector<32x32xbf16>, vector<16x32xf32> -> vector<16x32xf32>
    %56 = arith.addf %50, %55 : vector<16x32xf32>
    %57 = vector.shape_cast %56 : vector<16x32xf32> to vector<4x4x32xf32>
    %c0_46 = arith.constant 0 : index
    %c0_47 = arith.constant 0 : index
    %c0_48 = arith.constant 0 : index
    %c0_49 = arith.constant 0 : index
    %58 = vector.load %arg3[%c0_46, %c0_47, %c0_48, %c0_49] : memref<1x4x4x32xf32, #tpu.memory_space<vmem>>, vector<1x4x4x32xf32>
    %59 = vector.shape_cast %58 : vector<1x4x4x32xf32> to vector<4x4x32xf32>
    %60 = vector.shape_cast %57 : vector<4x4x32xf32> to vector<1x4x4x32xf32>
    tpu.vector_store %arg3[%c0_46, %c0_47, %c0_48, %c0_49], %60 {strides = array<i32>} : memref<1x4x4x32xf32, #tpu.memory_space<vmem>>, vector<1x4x4x32xf32>,
    return
  }
  func.func @transform_0(%arg0: i32) -> (i32, i32, i32, i32) {
    %c0_i32 = arith.constant 0 : i32
    %c0_i32_0 = arith.constant 0 : i32
    %c0_i32_1 = arith.constant 0 : i32
    %c0_i32_2 = arith.constant 0 : i32
    return %arg0, %c0_i32, %c0_i32_0, %c0_i32_1 : i32, i32, i32, i32
  }
  func.func @transform_1(%arg0: i32) -> (i32, i32, i32, i32) {
    %c0_i32 = arith.constant 0 : i32
    %c0_i32_0 = arith.constant 0 : i32
    %c0_i32_1 = arith.constant 0 : i32
    %c0_i32_2 = arith.constant 0 : i32
    %c0_i32_3 = arith.constant 0 : i32
    return %c0_i32, %c0_i32_0, %c0_i32_1, %c0_i32_2 : i32, i32, i32, i32
  }
  func.func @transform_2(%arg0: i32) -> (i32, i32, i32, i32) {
    %c0_i32 = arith.constant 0 : i32
    %c0_i32_0 = arith.constant 0 : i32
    %c0_i32_1 = arith.constant 0 : i32
    %c0_i32_2 = arith.constant 0 : i32
    return %arg0, %c0_i32, %c0_i32_0, %c0_i32_1 : i32, i32, i32, i32
  }
}

module attributes {stable_mosaic.version = 11 : i64} {
  func.func @_layernorm_kernel(%arg0: i32, %arg1: memref<32x32xf32, #tpu.memory_space<vmem>>, %arg2: memref<1x32xf32, #tpu.memory_space<vmem>>, %arg3: memref<1x32xf32, #tpu.memory_space<vmem>>, %arg4: memref<32x32xf32, #tpu.memory_space<vmem>>) attributes {dimension_semantics = [#tpu.dimension_semantics<parallel>], iteration_bounds = array<i64: 1>, scalar_prefetch = 0 : i64, scratch_operands = 0 : i64, tpu.core_type = #tpu.core_type<tc>, window_params = [{transform_indices = @transform_0, window_bounds = array<i64: 32, 32>}, {pipeline_mode = #tpu.pipeline_mode<synchronous>, transform_indices = @transform_1, window_bounds = array<i64: 1, 32>}, {pipeline_mode = #tpu.pipeline_mode<synchronous>, transform_indices = @transform_2, window_bounds = array<i64: 1, 32>}, {transform_indices = @transform_3, window_bounds = array<i64: 32, 32>}]} {
    %c0 = arith.constant 0 : index
    %c0_0 = arith.constant 0 : index
    %0 = vector.load %arg1[%c0, %c0_0] : memref<32x32xf32, #tpu.memory_space<vmem>>, vector<32x32xf32>
    %cst = arith.constant dense<0.000000e+00> : vector<32xf32>
    %1 = vector.multi_reduction <add>, %0, %cst [1] : vector<32x32xf32> to vector<32xf32>
    %2 = vector.shape_cast %1 : vector<32xf32> to vector<32x1xf32>
    %cst_1 = arith.constant 3.200000e+01 : f32
    %3 = vector.broadcast %cst_1 : f32 to vector<32x1xf32>
    %4 = arith.divf %2, %3 : vector<32x1xf32>
    %5 = vector.broadcast %4 : vector<32x1xf32> to vector<32x32xf32>
    %6 = arith.subf %0, %5 : vector<32x32xf32>
    %7 = arith.mulf %6, %6 : vector<32x32xf32>
    %cst_2 = arith.constant dense<0.000000e+00> : vector<32xf32>
    %8 = vector.multi_reduction <add>, %7, %cst_2 [1] : vector<32x32xf32> to vector<32xf32>
    %9 = vector.shape_cast %8 : vector<32xf32> to vector<32x1xf32>
    %cst_3 = arith.constant 3.200000e+01 : f32
    %10 = vector.broadcast %cst_3 : f32 to vector<32x1xf32>
    %11 = arith.divf %9, %10 : vector<32x1xf32>
    %cst_4 = arith.constant 9.99999997E-7 : f32
    %12 = vector.broadcast %cst_4 : f32 to vector<32x1xf32>
    %13 = arith.addf %11, %12 : vector<32x1xf32>
    %14 = math.rsqrt %13 : vector<32x1xf32>
    %15 = vector.broadcast %14 : vector<32x1xf32> to vector<32x32xf32>
    %16 = arith.mulf %6, %15 : vector<32x32xf32>
    %c0_5 = arith.constant 0 : index
    %c0_6 = arith.constant 0 : index
    %17 = vector.load %arg2[%c0_5, %c0_6] : memref<1x32xf32, #tpu.memory_space<vmem>>, vector<1x32xf32>
    %18 = vector.broadcast %17 : vector<1x32xf32> to vector<32x32xf32>
    %19 = arith.mulf %16, %18 : vector<32x32xf32>
    %c0_7 = arith.constant 0 : index
    %c0_8 = arith.constant 0 : index
    %20 = vector.load %arg3[%c0_7, %c0_8] : memref<1x32xf32, #tpu.memory_space<vmem>>, vector<1x32xf32>
    %21 = vector.broadcast %20 : vector<1x32xf32> to vector<32x32xf32>
    %22 = arith.addf %19, %21 : vector<32x32xf32>
    %c0_9 = arith.constant 0 : index
    %c0_10 = arith.constant 0 : index
    %23 = vector.load %arg4[%c0_9, %c0_10] : memref<32x32xf32, #tpu.memory_space<vmem>>, vector<32x32xf32>
    tpu.vector_store %arg4[%c0_9, %c0_10], %22 {strides = array<i32>} : memref<32x32xf32, #tpu.memory_space<vmem>>, vector<32x32xf32>,
    return
  }
  func.func @transform_0(%arg0: i32) -> (i32, i32) {
    %c0_i32 = arith.constant 0 : i32
    %c0_i32_0 = arith.constant 0 : i32
    return %arg0, %c0_i32 : i32, i32
  }
  func.func @transform_1(%arg0: i32) -> (i32, i32) {
    %c0_i32 = arith.constant 0 : i32
    %c0_i32_0 = arith.constant 0 : i32
    %c0_i32_1 = arith.constant 0 : i32
    return %c0_i32, %c0_i32_0 : i32, i32
  }
  func.func @transform_2(%arg0: i32) -> (i32, i32) {
    %c0_i32 = arith.constant 0 : i32
    %c0_i32_0 = arith.constant 0 : i32
    %c0_i32_1 = arith.constant 0 : i32
    return %c0_i32, %c0_i32_0 : i32, i32
  }
  func.func @transform_3(%arg0: i32) -> (i32, i32) {
    %c0_i32 = arith.constant 0 : i32
    %c0_i32_0 = arith.constant 0 : i32
    return %arg0, %c0_i32 : i32, i32
  }
}

</mosaic_0001>

<bundles_post_ra>
// kernel: _lambda_.15
= control target key start
LH: loop header
LB: loop body
LE: loop exit
PB: predicated region body
PF: predicated region fallthrough
CT: control target
= control target key end

     0   :  { %v246_v0 = vmov 0   ;;  %vm130_vm0 = vcmask 523264   ;;  %s366_s1 = inlined_call_operand.vmem [shape: bf16[192,128], index: 1, kind: input, shape index: {}]   ;;  %s367_s0 = inlined_call_operand.vmem [shape: f32[32,192], index: 0, kind: input, shape index: {}]   ;;  %s368_s2 = inlined_call_operand.vmem [shape: f32[1,128], index: 2, kind: input, shape index: {}]   ;;  %s369_s3 = inlined_call_operand.vmem [shape: f32[32,128], index: 3, kind: output, shape index: {}]  }
   0x1   :  { %137 = vmatprep.subr.bf16.mxu0 %v246_v0  ;;  %209 = vmatprep.subr.bf16.mxu1 %v246_v0  ;;  %v234_v1 = vld [vmem:[%s366_s1 + $0x38] sm:$0xff]   ;;  %v235_v2 = vld [vmem:[%s366_s1 + $0x30] sm:$0xff]   ;;  %v236_v3 = vld [vmem:[%s366_s1 + $0x28] sm:$0xff]  }
   0x2   :  { %138 = vmatpush1.bf16.msra.mxu0 %v234_v1  ;;  %221 = vmatpush1.bf16.msra.mxu1 %v234_v1  ;;  %v237_v4 = vld [vmem:[%s366_s1 + $0x20] sm:$0xff]   ;;  %v16_v5 = vld [vmem:[%s367_s0 + $0x8] sm:$0xff]  ;;  %v18_v6 = vld [vmem:[%s367_s0 + $0x18] sm:$0xff] }
   0x3   :  { %139 = vmatprep.subr.bf16.mxu0 %v246_v0  ;;  %210 = vmatprep.subr.bf16.mxu1 %v246_v0  ;;  %v20_v7 = vld [vmem:[%s367_s0 + $0x28] sm:$0xff]  ;;  %v24_v8 = vpack.c.bf16 %v18_v6, %v16_v5  ;;  %v22_v9 = vld [vmem:[%s367_s0 + $0x38] sm:$0xff]  ;;  %v239_v12 = vld [vmem:[%s366_s1 + $0x10] sm:$0xff]  }
   0x4   :  { %v238_v10 = vld [vmem:[%s366_s1 + $0x18] sm:$0xff]   ;;  %v26_v11 = vpack.c.bf16 %v22_v9, %v20_v7  ;;  %v240_v13 = vld [vmem:[%s366_s1 + $0x8] sm:$0xff]   ;;  %v241_v14 = vld [vmem:[%s366_s1] sm:$0xff]  }
   0x5   :  { %207 = vmatprep.mubr.msk.bf16.mxu0 %vm130_vm0, %v24_v8  ;;  %v242_v15 = vld [vmem:[%s366_s1 + $0x58] sm:$0xff]   ;;  %v243_v16 = vld [vmem:[%s366_s1 + $0x50] sm:$0xff]   ;;  %v244_v17 = vld [vmem:[%s366_s1 + $0x48] sm:$0xff]  }
   0x6   :  { %140 = vmatpush1.bf16.msra.mxu0 %v235_v2  ;;  %222 = vmatpush1.bf16.msra.mxu1 %v235_v2  ;;  %v245_v18 = vld [vmem:[%s366_s1 + $0x40] sm:$0xff]   ;;  %v17_v20 = vld [vmem:[%s367_s0 + $0x10] sm:$0xff] }
   0x7   :  { %141 = vmatprep.subr.bf16.mxu0 %v246_v0  ;;  %211 = vmatprep.subr.bf16.mxu1 %v246_v0  ;;  %v15_v19 = vld [vmem:[%s367_s0] sm:$0xff]  ;;  %v21_v22 = vld [vmem:[%s367_s0 + $0x30] sm:$0xff] }
   0x8   :  { %208 = vmatprep.mubr.msk.bf16.mxu1 %vm130_vm0, %v26_v11  ;;  %v19_v21 = vld [vmem:[%s367_s0 + $0x20] sm:$0xff]  ;;  %v23_v23 = vpack.c.bf16 %v17_v20, %v15_v19 }
   0x9   :  { %v25_v24 = vpack.c.bf16 %v21_v22, %v19_v21  ;;  %v194_v25 = vld [vmem:[%s368_s2] ss:$0 sm:$0xff] }
   0xa   :  { %142 = vmatpush1.bf16.msra.mxu0 %v236_v3  ;;  %223 = vmatpush1.bf16.msra.mxu1 %v236_v3 }
   0xb   :  { %143 = vmatprep.subr.bf16.mxu0 %v246_v0  ;;  %212 = vmatprep.subr.bf16.mxu1 %v246_v0 }
   0xe   :  { %144 = vmatpush1.bf16.msra.mxu0 %v237_v4  ;;  %224 = vmatpush1.bf16.msra.mxu1 %v237_v4 }
   0xf   :  { %145 = vmatprep.subr.bf16.mxu0 %v246_v0  ;;  %213 = vmatprep.subr.bf16.mxu1 %v246_v0 }
  0x12   :  { %146 = vmatpush1.bf16.msra.mxu0 %v238_v10  ;;  %225 = vmatpush1.bf16.msra.mxu1 %v238_v10 }
  0x13   :  { %147 = vmatprep.subr.bf16.mxu0 %v246_v0  ;;  %214 = vmatprep.subr.bf16.mxu1 %v246_v0 }
  0x16   :  { %148 = vmatpush1.bf16.msra.mxu0 %v239_v12  ;;  %226 = vmatpush1.bf16.msra.mxu1 %v239_v12 }
  0x17   :  { %149 = vmatprep.subr.bf16.mxu0 %v246_v0  ;;  %215 = vmatprep.subr.bf16.mxu1 %v246_v0 }
  0x1a   :  { %150 = vmatpush1.bf16.msra.mxu0 %v240_v13  ;;  %227 = vmatpush1.bf16.msra.mxu1 %v240_v13 }
  0x1b   :  { %151 = vmatprep.subr.bf16.mxu0 %v246_v0  ;;  %216 = vmatprep.subr.bf16.mxu1 %v246_v0 }
  0x1e   :  { %152 = vmatpush1.bf16.msra.mxu0 %v241_v14  ;;  %228 = vmatpush1.bf16.msra.mxu1 %v241_v14 }
  0x1f   :  { %161 = vmatprep.subr.bf16.mxu0 %v246_v0  ;;  %217 = vmatprep.subr.bf16.mxu1 %v246_v0 }
  0x22   :  { %162 = vmatpush2.bf16.msra.mxu0 %v242_v15  ;;  %229 = vmatpush2.bf16.msra.mxu1 %v242_v15 }
  0x23   :  { %163 = vmatprep.subr.bf16.mxu0 %v246_v0  ;;  %218 = vmatprep.subr.bf16.mxu1 %v246_v0 }
  0x26   :  { %164 = vmatpush2.bf16.msra.mxu0 %v243_v16  ;;  %230 = vmatpush2.bf16.msra.mxu1 %v243_v16 }
  0x27   :  { %165 = vmatprep.subr.bf16.mxu0 %v246_v0  ;;  %219 = vmatprep.subr.bf16.mxu1 %v246_v0 }
  0x2a   :  { %166 = vmatpush2.bf16.msra.mxu0 %v244_v17  ;;  %231 = vmatpush2.bf16.msra.mxu1 %v244_v17 }
  0x2b   :  { %167 = vmatprep.subr.bf16.mxu0 %v246_v0  ;;  %220 = vmatprep.subr.bf16.mxu1 %v246_v0 }
  0x2e   :  { %168 = vmatpush2.bf16.msra.mxu0 %v245_v18  ;;  %232 = vmatpush2.bf16.msra.mxu1 %v245_v18 }
  0x31   :  { %170 = vmatmul.mubr.bf16.vlgmr.msra.gmra.mxu0 %v23_v23  ;;  %178 = vmatmul.mubr.bf16.vlgmr.msra.gmra.mxu1 %v25_v24 }
  0xf1   :  { %v171_v26 = vpop.f32.mrf.mxu0  ;;  %v179_v27 = vpop.f32.mrf.mxu1 }
  0xf2   :  { %v172_v28 = vadd.f32 %v194_v25, %v171_v26  ;;  %v180_v29 = vadd.f32 %v194_v25, %v179_v27 }
  0xf3   :  { %v173_v30 = vpop.f32.mrf.mxu0  ;;  %v181_v31 = vpop.f32.mrf.mxu1 }
  0xf4   :  { %186 = vst [vmem:[%s369_s3] sm:$0xff] %v172_v28  ;;  %188 = vst [vmem:[%s369_s3 + $0x10] sm:$0xff] %v180_v29 }
  0xf5   :  { %v174_v32 = vpop.f32.mrf.mxu0  ;;  %v182_v33 = vpop.f32.mrf.mxu1 }
  0xf6   :  { %v175_v34 = vadd.f32 %v194_v25, %v174_v32  ;;  %v183_v35 = vadd.f32 %v194_v25, %v182_v33 }
  0xf7   :  { %v176_v36 = vpop.f32.mrf.mxu0  ;;  %v184_v37 = vpop.f32.mrf.mxu1 }
  0xf8   :  { %187 = vst [vmem:[%s369_s3 + $0x8] sm:$0xff] %v175_v34  ;;  %189 = vst [vmem:[%s369_s3 + $0x18] sm:$0xff] %v183_v35 }

// kernel: _lambda_.16
= control target key start
LH: loop header
LB: loop body
LE: loop exit
PB: predicated region body
PF: predicated region fallthrough
CT: control target
= control target key end

     0   :  { %v538_v39 = vmov 0   ;;  %s706_s0 = inlined_call_operand.vmem [shape: f32[32,128], index: 0, kind: input, shape index: {}]   ;;  %s707_s3 = inlined_call_operand.vmem [shape: bf16[128,384], index: 3, kind: input, shape index: {}]   ;;  %s708_s1 = inlined_call_operand.vmem [shape: f32[1,128], index: 1, kind: input, shape index: {}]   ;;  %s709_s2 = inlined_call_operand.vmem [shape: f32[1,128], index: 2, kind: input, shape index: {}]   ;;  %s710_s4 = inlined_call_operand.vmem [shape: f32[1,384], index: 4, kind: input, shape index: {}]   ;;  %s711_s5 = inlined_call_operand.vmem [shape: bf16[32,384], index: 5, kind: output, shape index: {}]  }
   0x1   :  { %v21_v0 = vld [vmem:[%s706_s0] sm:$0xff]  ;;  %v23_v1 = vld [vmem:[%s706_s0 + $0x10] sm:$0xff]  ;;  %v22_v2 = vld [vmem:[%s706_s0 + $0x8] sm:$0xff]  ;;  %303 = vmatprep.mubr.bf16.mxu0 %v538_v39 }
   0x2   :  { %25 = vadd.xlane.f32.xlu0 %v21_v0  ;;  %29 = vadd.xlane.f32.xlu1 %v23_v1  ;;  %v24_v3 = vld [vmem:[%s706_s0 + $0x18] sm:$0xff]  ;;  %v500_v5 = vld [vmem:[%s707_s3 + $0xa8] ss:$12 sps:$4 sm:$0xff]   ;;  %v509_v28 = vld [vmem:[%s707_s3 + $0x64] ss:$12 sps:$4 sm:$0xff]  }
   0x3   :  { %v498_v4 = vld [vmem:[%s707_s3 + $0xac] ss:$12 sps:$4 sm:$0xff]   ;;  %v501_v22 = vld [vmem:[%s707_s3 + $0x94] ss:$12 sps:$4 sm:$0xff]   ;;  %v503_v23 = vld [vmem:[%s707_s3 + $0xb0] ss:$12 sps:$4 sm:$0xff]  }
   0x4   :  { %271 = vmatprep.subr.bf16.mxu0 %v498_v4  ;;  %v504_v24 = vld [vmem:[%s707_s3 + $0x90] ss:$12 sps:$4 sm:$0xff]   ;;  %477 = vmatprep.subr.bf16.mxu1 %v503_v23  ;;  %v507_v26 = vld [vmem:[%s707_s3 + $0x98] ss:$12 sps:$4 sm:$0xff]   ;;  %v511_v29 = vld [vmem:[%s707_s3 + $0x80] ss:$12 sps:$4 sm:$0xff]  }
   0x5   :  { %272 = vmatpush1.bf16.msra.mxu0 %v500_v5  ;;  %478 = vmatpush3.bf16.msra.mxu1 %v503_v23  ;;  %v505_v25 = vld [vmem:[%s707_s3 + $0x7c] ss:$12 sps:$4 sm:$0xff]   ;;  %v508_v27 = vld [vmem:[%s707_s3 + $0x78] ss:$12 sps:$4 sm:$0xff]   ;;  %v512_v30 = vld [vmem:[%s707_s3 + $0x60] ss:$12 sps:$4 sm:$0xff]  }
   0x6   :  { %27 = vadd.xlane.f32.xlu0 %v22_v2  ;;  %31 = vadd.xlane.f32.xlu1 %v24_v3  ;;  %v513_v31 = vld [vmem:[%s707_s3 + $0x4c] ss:$12 sps:$4 sm:$0xff]   ;;  %v515_v32 = vld [vmem:[%s707_s3 + $0x68] ss:$12 sps:$4 sm:$0xff]   ;;  %v519_v35 = vld [vmem:[%s707_s3 + $0x50] ss:$12 sps:$4 sm:$0xff]  }
   0x7   :  { %273 = vmatprep.subr.bf16.mxu0 %v501_v22  ;;  %479 = vmatprep.subr.bf16.mxu1 %v507_v26  ;;  %v516_v33 = vld [vmem:[%s707_s3 + $0x48] ss:$12 sps:$4 sm:$0xff]   ;;  %v520_v36 = vld [vmem:[%s707_s3 + $0x30] ss:$12 sps:$4 sm:$0xff]   ;;  %v523_v38 = vld [vmem:[%s707_s3 + $0x38] ss:$12 sps:$4 sm:$0xff]  }
   0x8   :  { %v517_v34 = vld [vmem:[%s707_s3 + $0x34] ss:$12 sps:$4 sm:$0xff]   ;;  %v521_v37 = vld [vmem:[%s707_s3 + $0x1c] ss:$12 sps:$4 sm:$0xff]   ;;  %v524_v40 = vld [vmem:[%s707_s3 + $0x18] ss:$12 sps:$4 sm:$0xff]  }
   0x9   :  { %274 = vmatpush1.bf16.msra.mxu0 %v504_v24  ;;  %480 = vmatpush3.bf16.msra.mxu1 %v507_v26  ;;  %v525_v41 = vld [vmem:[%s707_s3 + $0x4] ss:$12 sps:$4 sm:$0xff]   ;;  %v527_v42 = vld [vmem:[%s707_s3 + $0x20] ss:$12 sps:$4 sm:$0xff]   ;;  %v529_v44 = vld [vmem:[%s707_s3 + $0x8] ss:$12 sps:$4 sm:$0xff]  }
   0xa   :  { %275 = vmatprep.subr.bf16.mxu0 %v505_v25  ;;  %481 = vmatprep.subr.bf16.mxu1 %v511_v29  ;;  %v528_v43 = vld [vmem:[%s707_s3] ss:$12 sps:$4 sm:$0xff]  }
   0xb   :  { %v425_v59 = vld [vmem:[%s708_s1] ss:$0 sm:$0xff] }
   0xd   :  { %276 = vmatpush1.bf16.msra.mxu0 %v508_v27  ;;  %482 = vmatpush3.bf16.msra.mxu1 %v511_v29 }
   0xe   :  { %277 = vmatprep.subr.bf16.mxu0 %v509_v28  ;;  %483 = vmatprep.subr.bf16.mxu1 %v515_v32 }
  0x11   :  { %278 = vmatpush1.bf16.msra.mxu0 %v512_v30  ;;  %484 = vmatpush3.bf16.msra.mxu1 %v515_v32 }
  0x12   :  { %279 = vmatprep.subr.bf16.mxu0 %v513_v31  ;;  %485 = vmatprep.subr.bf16.mxu1 %v519_v35 }
  0x15   :  { %280 = vmatpush1.bf16.msra.mxu0 %v516_v33  ;;  %486 = vmatpush3.bf16.msra.mxu1 %v519_v35 }
  0x16   :  { %281 = vmatprep.subr.bf16.mxu0 %v517_v34  ;;  %487 = vmatprep.subr.bf16.mxu1 %v523_v38 }
  0x19   :  { %282 = vmatpush1.bf16.msra.mxu0 %v520_v36  ;;  %488 = vmatpush3.bf16.msra.mxu1 %v523_v38 }
  0x1a   :  { %283 = vmatprep.subr.bf16.mxu0 %v521_v37  ;;  %489 = vmatprep.subr.bf16.mxu1 %v527_v42 }
  0x1d   :  { %284 = vmatpush1.bf16.msra.mxu0 %v524_v40  ;;  %490 = vmatpush3.bf16.msra.mxu1 %v527_v42 }
  0x1e   :  { %285 = vmatprep.subr.bf16.mxu0 %v525_v41  ;;  %491 = vmatprep.subr.bf16.mxu1 %v529_v44 }
  0x21   :  { %286 = vmatpush1.bf16.msra.mxu0 %v528_v43  ;;  %492 = vmatpush3.bf16.msra.mxu1 %v529_v44 }
  0x8b   :  { %v26_v6 = vpop.xlane.xlu0 %25  ;;  %v30_v7 = vpop.xlane.xlu1 %29 }
  0x8c   :  { %v34_v8 = vmul.f32 0.0078125, %v26_v6  ;;  %v36_v9 = vmul.f32 0.0078125, %v30_v7 }
  0x8e   :  { %v587_v10 = vsub.f32 %v21_v0, %v34_v8  ;;  %v589_v11 = vsub.f32 %v23_v1, %v36_v9  ;;  %v426_v0 = vld [vmem:[%s709_s2] ss:$0 sm:$0xff] }
  0x8f   :  { %v28_v12 = vpop.xlane.xlu0 %27  ;;  %v32_v13 = vpop.xlane.xlu1 %31 }
  0x90   :  { %v35_v14 = vmul.f32 0.0078125, %v28_v12  ;;  %v42_v15 = vmul.f32 %v587_v10, %v587_v10  ;;  %v37_v16 = vmul.f32 0.0078125, %v32_v13  ;;  %v44_v19 = vmul.f32 %v589_v11, %v589_v11 }
  0x92   :  { %v593_v17 = vsub.f32 %v22_v2, %v35_v14  ;;  %46 = vadd.xlane.f32.xlu0 %v42_v15  ;;  %v595_v18 = vsub.f32 %v24_v3, %v37_v16  ;;  %v128_v14 = vlaneseq }
  0x94   :  { %v43_v20 = vmul.f32 %v593_v17, %v593_v17  ;;  %v45_v21 = vmul.f32 %v595_v18, %v595_v18  ;;  %v129_v15 = vshrl.u32 %v128_v14, 7 }
  0x96   :  { %50 = vadd.xlane.f32.xlu0 %v44_v19  ;;  %48 = vadd.xlane.f32.xlu1 %v43_v20  ;;  %v134_v16 = vsub.s32 1, %v129_v15 }
  0x9a   :  { %52 = vadd.xlane.f32.xlu1 %v45_v21 }
 0x11b   :  { %v47_v45 = vpop.xlane.xlu0 %46 }
 0x11c   :  { %v54_v46 = vmul.f32 0.0078125, %v47_v45 }
 0x11e   :  { %v58_v47 = vadd.f32 1e-06, %v54_v46 }
 0x11f   :  { %v49_v48 = vpop.xlane.xlu1 %48  ;;  %v51_v49 = vpop.xlane.xlu0 %50 }
 0x120   :  { %530 = vrsqrt.f32 %v58_v47  ;;  %v55_v50 = vmul.f32 0.0078125, %v49_v48  ;;  %v56_v51 = vmul.f32 0.0078125, %v51_v49 }
 0x122   :  { %v59_v52 = vadd.f32 1e-06, %v55_v50  ;;  %v60_v53 = vadd.f32 1e-06, %v56_v51 }
 0x123   :  { %v53_v54 = vpop.xlane.xlu1 %52 }
 0x124   :  { %532 = vrsqrt.f32 %v59_v52  ;;  %v57_v55 = vmul.f32 0.0078125, %v53_v54 }
 0x125   :  { %534 = vrsqrt.f32 %v60_v53 }
 0x126   :  { %v61_v56 = vadd.f32 1e-06, %v57_v55 }
 0x128   :  { %536 = vrsqrt.f32 %v61_v56 }
 0x12d   :  { %v531_v57 = vpop.eup %530 }
 0x12e   :  { %v66_v58 = vmul.f32 %v531_v57, %v587_v10 }
 0x130   :  { %v77_v63 = vmul.f32 %v425_v59, %v66_v58 }
 0x131   :  { %v533_v60 = vpop.eup %532 }
 0x132   :  { %v535_v61 = vpop.eup %534  ;;  %v67_v62 = vmul.f32 %v533_v60, %v593_v17  ;;  %v88_v4 = vadd.f32 %v426_v0, %v77_v63  ;;  %v126_v17 = vld [vmem:[%s710_s4] sm:$0x7] }
 0x133   :  { %v68_v1 = vmul.f32 %v535_v61, %v589_v11  ;;  %v130_v11 = vsub.s32 0, %v129_v15  ;;  %v135_v20 = vrot.slane %v126_v17, %v134_v16 }
 0x134   :  { %v78_v2 = vmul.f32 %v425_v59, %v67_v62 }
 0x135   :  { %v537_v3 = vpop.eup %536  ;;  %v79_v7 = vmul.f32 %v425_v59, %v68_v1  ;;  %v131_v19 = vrot.slane %v126_v17, %v130_v11 }
 0x136   :  { %v89_v5 = vadd.f32 %v426_v0, %v78_v2  ;;  %v69_v6 = vmul.f32 %v537_v3, %v595_v18  ;;  %v138_v18 = vsub.s32 2, %v129_v15 }
 0x137   :  { %v90_v10 = vadd.f32 %v426_v0, %v79_v7 }
 0x138   :  { %v92_v8 = vpack.c.bf16 %v89_v5, %v88_v4  ;;  %v80_v9 = vmul.f32 %v425_v59, %v69_v6  ;;  %v139_v22 = vrot.slane %v126_v17, %v138_v18 }
 0x13a   :  { %304 = vmatmul.mubr.bf16.vlgmr.msra.gmra.mxu0 %v92_v8  ;;  %493 = vmatprep.mubr.bf16.mxu1 %v92_v8  ;;  %v91_v12 = vadd.f32 %v426_v0, %v80_v9 }
 0x13b   :  { %313 = vmatprep.mubr.bf16.mxu0 %v538_v39 }
 0x13c   :  { %v93_v13 = vpack.c.bf16 %v91_v12, %v90_v10 }
 0x13e   :  { %494 = vmatmul.mubr.bf16.vlgmr.msra.gmra.mxu1 %v93_v13 }
 0x142   :  { %314 = vmatmul.mubr.bf16.gmra.mxu0 %v93_v13 }
 0x1fa   :  { %v305_v21 = vpop.f32.mrf.mxu0 }
 0x1fb   :  { %v306_v24 = vadd.f32 %v305_v21, %v131_v19 }
 0x1fc   :  { %v307_v23 = vpop.f32.mrf.mxu0 }
 0x1fd   :  { %v308_v25 = vadd.f32 %v307_v23, %v135_v20 }
 0x1fe   :  { %v309_v26 = vpop.f32.mrf.mxu0  ;;  %v495_v27 = vpop.f32.mrf.mxu1 }
 0x1ff   :  { %v459_v28 = vpack.c.bf16 %v308_v25, %v306_v24  ;;  %v367_v29 = vadd.f32 %v495_v27, %v139_v22  ;;  %v310_v32 = vadd.f32 %v309_v26, %v131_v19 }
 0x200   :  { %v311_v30 = vpop.f32.mrf.mxu0  ;;  %v358_v31 = vpop.f32.mrf.mxu1 }
 0x201   :  { %413 = vst [vmem:[%s711_s5] sm:$0xff] %v459_v28  ;;  %v464_v33 = vpack.c.bf16 %v367_v29, %v367_v29  ;;  %v312_v34 = vadd.f32 %v311_v30, %v135_v20  ;;  %v359_v35 = vadd.f32 %v358_v31, %v139_v22 }
 0x202   :  { %v315_v36 = vpop.f32.mrf.mxu0  ;;  %v496_v37 = vpop.f32.mrf.mxu1 }
 0x203   :  { %418 = vst [vmem:[%s711_s5 + $0x20] sm:$0xf] %v464_v33  ;;  %v461_v38 = vpack.c.bf16 %v312_v34, %v310_v32  ;;  %v460_v39 = vpack.c.bf16 %v359_v35, %v359_v35  ;;  %v370_v40 = vadd.f32 %v496_v37, %v139_v22  ;;  %v316_v43 = vadd.f32 %v315_v36, %v131_v19 }
 0x204   :  { %v317_v41 = vpop.f32.mrf.mxu0  ;;  %v361_v42 = vpop.f32.mrf.mxu1 }
 0x205   :  { %415 = vst [vmem:[%s711_s5 + $0xc] sm:$0xff] %v461_v38  ;;  %414 = vst [vmem:[%s711_s5 + $0x8] sm:$0xf] %v460_v39  ;;  %v466_v44 = vpack.c.bf16 %v370_v40, %v370_v40  ;;  %v318_v45 = vadd.f32 %v317_v41, %v135_v20  ;;  %v362_v46 = vadd.f32 %v361_v42, %v139_v22 }
 0x206   :  { %v319_v47 = vpop.f32.mrf.mxu0 }
 0x207   :  { %420 = vst [vmem:[%s711_s5 + $0x2c] sm:$0xf] %v466_v44  ;;  %v463_v48 = vpack.c.bf16 %v318_v45, %v316_v43  ;;  %v462_v49 = vpack.c.bf16 %v362_v46, %v362_v46  ;;  %v320_v51 = vadd.f32 %v319_v47, %v131_v19 }
 0x208   :  { %v321_v50 = vpop.f32.mrf.mxu0 }
 0x209   :  { %417 = vst [vmem:[%s711_s5 + $0x18] sm:$0xff] %v463_v48  ;;  %416 = vst [vmem:[%s711_s5 + $0x14] sm:$0xf] %v462_v49  ;;  %v322_v52 = vadd.f32 %v321_v50, %v135_v20 }
 0x20b   :  { %v465_v53 = vpack.c.bf16 %v322_v52, %v320_v51 }
 0x20d   :  { %419 = vst [vmem:[%s711_s5 + $0x24] sm:$0xff] %v465_v53 }

// kernel: _lambda_.18
= control target key start
LH: loop header
LB: loop body
LE: loop exit
PB: predicated region body
PF: predicated region fallthrough
CT: control target
= control target key end

     0   :  { %s275_s1 = inlined_call_operand.vmem [shape: bf16[128,128], index: 1, kind: input, shape index: {}]   ;;  %s276_s0 = inlined_call_operand.vmem [shape: bf16[32,128], index: 0, kind: input, shape index: {}]   ;;  %s277_s2 = inlined_call_operand.vmem [shape: f32[1,128], index: 2, kind: input, shape index: {}]   ;;  %s278_s3 = inlined_call_operand.vmem [shape: f32[32,128], index: 3, kind: output, shape index: {}]  }
   0x1   :  { %v200_v0 = vld [vmem:[%s275_s1 + $0x38] sm:$0xff]   ;;  %v201_v1 = vld [vmem:[%s275_s1 + $0x30] sm:$0xff]   ;;  %v202_v2 = vld [vmem:[%s275_s1 + $0x28] sm:$0xff]  }
   0x2   :  { %180 = vmatprep.subr.bf16.mxu0 %v200_v0  ;;  %v203_v3 = vld [vmem:[%s275_s1 + $0x20] sm:$0xff]   ;;  %v204_v5 = vld [vmem:[%s275_s1 + $0x18] sm:$0xff]   ;;  %v205_v6 = vld [vmem:[%s275_s1 + $0x10] sm:$0xff]  }
   0x3   :  { %181 = vmatpush3.bf16.msra.mxu0 %v200_v0  ;;  %v208_v4 = vld [vmem:[%s276_s0] sm:$0xff]   ;;  %v206_v7 = vld [vmem:[%s275_s1 + $0x8] sm:$0xff]  }
   0x4   :  { %182 = vmatprep.subr.bf16.mxu0 %v201_v1  ;;  %196 = vmatprep.mubr.bf16.mxu0 %v208_v4  ;;  %v207_v8 = vld [vmem:[%s275_s1] sm:$0xff]   ;;  %v209_v9 = vld [vmem:[%s276_s0 + $0x8] sm:$0xff]  }
   0x5   :  { %v159_v10 = vld [vmem:[%s277_s2] ss:$0 sm:$0xff] }
   0x7   :  { %183 = vmatpush3.bf16.msra.mxu0 %v201_v1 }
   0x8   :  { %184 = vmatprep.subr.bf16.mxu0 %v202_v2 }
   0xb   :  { %185 = vmatpush3.bf16.msra.mxu0 %v202_v2 }
   0xc   :  { %186 = vmatprep.subr.bf16.mxu0 %v203_v3 }
   0xf   :  { %187 = vmatpush3.bf16.msra.mxu0 %v203_v3 }
  0x10   :  { %188 = vmatprep.subr.bf16.mxu0 %v204_v5 }
  0x13   :  { %189 = vmatpush3.bf16.msra.mxu0 %v204_v5 }
  0x14   :  { %190 = vmatprep.subr.bf16.mxu0 %v205_v6 }
  0x17   :  { %191 = vmatpush3.bf16.msra.mxu0 %v205_v6 }
  0x18   :  { %192 = vmatprep.subr.bf16.mxu0 %v206_v7 }
  0x1b   :  { %193 = vmatpush3.bf16.msra.mxu0 %v206_v7 }
  0x1c   :  { %194 = vmatprep.subr.bf16.mxu0 %v207_v8 }
  0x1f   :  { %195 = vmatpush3.bf16.msra.mxu0 %v207_v8 }
  0x22   :  { %197 = vmatmul.mubr.bf16.vlgmr.msra.gmra.mxu0 %v209_v9 }
  0xe2   :  { %v198_v11 = vpop.f32.mrf.mxu0 }
  0xe3   :  { %v145_v12 = vadd.f32 %v198_v11, %v159_v10 }
  0xe4   :  { %v136_v13 = vpop.f32.mrf.mxu0 }
  0xe5   :  { %153 = vst [vmem:[%s278_s3 + $0x10] sm:$0xff] %v145_v12  ;;  %v137_v14 = vadd.f32 %v159_v10, %v136_v13 }
  0xe6   :  { %v199_v15 = vpop.f32.mrf.mxu0 }
  0xe7   :  { %151 = vst [vmem:[%s278_s3] sm:$0xff] %v137_v14  ;;  %v148_v16 = vadd.f32 %v199_v15, %v159_v10 }
  0xe8   :  { %v139_v17 = vpop.f32.mrf.mxu0 }
  0xe9   :  { %154 = vst [vmem:[%s278_s3 + $0x18] sm:$0xff] %v148_v16  ;;  %v140_v18 = vadd.f32 %v159_v10, %v139_v17 }
  0xeb   :  { %152 = vst [vmem:[%s278_s3 + $0x8] sm:$0xff] %v140_v18 }

// kernel: _lambda_.20
= control target key start
LH: loop header
LB: loop body
LE: loop exit
PB: predicated region body
PF: predicated region fallthrough
CT: control target
= control target key end

     0   :  { %s756_s1 = inlined_call_operand.vmem [shape: bf16[512,128], index: 1, kind: input, shape index: {}]   ;;  %s757_s0 = inlined_call_operand.vmem [shape: bf16[32,512], index: 0, kind: input, shape index: {}]   ;;  %s758_s2 = inlined_call_operand.vmem [shape: f32[1,128], index: 2, kind: input, shape index: {}]   ;;  %s759_s3 = inlined_call_operand.vmem [shape: f32[32,128], index: 3, kind: input, shape index: {}]   ;;  %s760_s4 = inlined_call_operand.vmem [shape: f32[32,128], index: 4, kind: output, shape index: {}]  }
   0x1   :  { %v540_v0 = vld [vmem:[%s756_s1 + $0x78] sm:$0xff]   ;;  %v544_v4 = vld [vmem:[%s756_s1 + $0x70] sm:$0xff]   ;;  %v548_v8 = vld [vmem:[%s756_s1 + $0x68] sm:$0xff]  }
   0x2   :  { %v541_v1 = vld [vmem:[%s756_s1 + $0xf8] sm:$0xff]   ;;  %484 = vmatprep.subr.bf16.mxu0 %v540_v0  ;;  %v545_v5 = vld [vmem:[%s756_s1 + $0xf0] sm:$0xff]   ;;  %v549_v9 = vld [vmem:[%s756_s1 + $0xe8] sm:$0xff]  }
   0x3   :  { %v542_v2 = vld [vmem:[%s756_s1 + $0x38] sm:$0xff]   ;;  %512 = vmatprep.subr.bf16.mxu1 %v541_v1  ;;  %v546_v6 = vld [vmem:[%s756_s1 + $0x30] sm:$0xff]   ;;  %v550_v10 = vld [vmem:[%s756_s1 + $0x28] sm:$0xff]  }
   0x4   :  { %v543_v3 = vld [vmem:[%s756_s1 + $0xb8] sm:$0xff]   ;;  %485 = vmatpush3.bf16.msra.mxu0 %v542_v2  ;;  %v547_v7 = vld [vmem:[%s756_s1 + $0xb0] sm:$0xff]   ;;  %v551_v11 = vld [vmem:[%s756_s1 + $0xa8] sm:$0xff]  }
   0x5   :  { %513 = vmatpush3.bf16.msra.mxu1 %v543_v3  ;;  %486 = vmatprep.subr.bf16.mxu0 %v544_v4  ;;  %v552_v12 = vld [vmem:[%s756_s1 + $0x60] sm:$0xff]   ;;  %v556_v16 = vld [vmem:[%s756_s1 + $0x58] sm:$0xff]   ;;  %v560_v20 = vld [vmem:[%s756_s1 + $0x50] sm:$0xff]  }
   0x6   :  { %514 = vmatprep.subr.bf16.mxu1 %v545_v5  ;;  %v553_v13 = vld [vmem:[%s756_s1 + $0xe0] sm:$0xff]   ;;  %v557_v17 = vld [vmem:[%s756_s1 + $0xd8] sm:$0xff]   ;;  %v561_v21 = vld [vmem:[%s756_s1 + $0xd0] sm:$0xff]  }
   0x7   :  { %v554_v14 = vld [vmem:[%s756_s1 + $0x20] sm:$0xff]   ;;  %v558_v18 = vld [vmem:[%s756_s1 + $0x18] sm:$0xff]   ;;  %v562_v22 = vld [vmem:[%s756_s1 + $0x10] sm:$0xff]  }
   0x8   :  { %487 = vmatpush3.bf16.msra.mxu0 %v546_v6  ;;  %v555_v15 = vld [vmem:[%s756_s1 + $0xa0] sm:$0xff]   ;;  %v559_v19 = vld [vmem:[%s756_s1 + $0x98] sm:$0xff]   ;;  %v563_v23 = vld [vmem:[%s756_s1 + $0x90] sm:$0xff]  }
   0x9   :  { %515 = vmatpush3.bf16.msra.mxu1 %v547_v7  ;;  %488 = vmatprep.subr.bf16.mxu0 %v548_v8  ;;  %v564_v24 = vld [vmem:[%s756_s1 + $0x48] sm:$0xff]   ;;  %v568_v28 = vld [vmem:[%s756_s1 + $0x40] sm:$0xff]   ;;  %v429_v6 = vld [vmem:[%s759_s3 + $0x10] sm:$0xff] }
   0xa   :  { %516 = vmatprep.subr.bf16.mxu1 %v549_v9  ;;  %v565_v25 = vld [vmem:[%s756_s1 + $0xc8] sm:$0xff]   ;;  %v569_v29 = vld [vmem:[%s756_s1 + $0xc0] sm:$0xff]  }
   0xb   :  { %v566_v26 = vld [vmem:[%s756_s1 + $0x8] sm:$0xff]   ;;  %v570_v30 = vld [vmem:[%s756_s1] sm:$0xff]  }
   0xc   :  { %489 = vmatpush3.bf16.msra.mxu0 %v550_v10  ;;  %v567_v27 = vld [vmem:[%s756_s1 + $0x88] sm:$0xff]   ;;  %v571_v31 = vld [vmem:[%s756_s1 + $0x80] sm:$0xff]  }
   0xd   :  { %517 = vmatpush3.bf16.msra.mxu1 %v551_v11  ;;  %490 = vmatprep.subr.bf16.mxu0 %v552_v12  ;;  %v572_v32 = vld [vmem:[%s757_s0] ss:$16 sps:$4 sm:$0xff]   ;;  %v574_v33 = vld [vmem:[%s757_s0 + $0x4] ss:$16 sps:$4 sm:$0xff]   ;;  %v575_v34 = vld [vmem:[%s757_s0 + $0x8] ss:$16 sps:$4 sm:$0xff]  }
   0xe   :  { %518 = vmatprep.subr.bf16.mxu1 %v553_v13  ;;  %v577_v35 = vld [vmem:[%s757_s0 + $0xc] ss:$16 sps:$4 sm:$0xff]   ;;  %361 = vmatprep.mubr.bf16.mxu0 %v574_v33  ;;  %v578_v36 = vld [vmem:[%s757_s0 + $0x24] ss:$16 sps:$4 sm:$0xff]   ;;  %v582_v38 = vld [vmem:[%s757_s0 + $0x20] ss:$16 sps:$4 sm:$0xff]  }
   0xf   :  { %410 = vmatprep.mubr.bf16.mxu1 %v577_v35  ;;  %v580_v37 = vld [vmem:[%s757_s0 + $0x2c] ss:$16 sps:$4 sm:$0xff]   ;;  %v583_v39 = vld [vmem:[%s757_s0 + $0x28] ss:$16 sps:$4 sm:$0xff]   ;;  %v443_v42 = vld [vmem:[%s758_s2] ss:$0 sm:$0xff] }
  0x10   :  { %491 = vmatpush3.bf16.msra.mxu0 %v554_v14  ;;  %v427_v50 = vld [vmem:[%s759_s3] sm:$0xff]  ;;  %v428_v60 = vld [vmem:[%s759_s3 + $0x8] sm:$0xff]  ;;  %v430_v14 = vld [vmem:[%s759_s3 + $0x18] sm:$0xff] }
  0x11   :  { %519 = vmatpush3.bf16.msra.mxu1 %v555_v15  ;;  %492 = vmatprep.subr.bf16.mxu0 %v556_v16 }
  0x12   :  { %520 = vmatprep.subr.bf16.mxu1 %v557_v17 }
  0x14   :  { %493 = vmatpush3.bf16.msra.mxu0 %v558_v18 }
  0x15   :  { %521 = vmatpush3.bf16.msra.mxu1 %v559_v19  ;;  %494 = vmatprep.subr.bf16.mxu0 %v560_v20 }
  0x16   :  { %522 = vmatprep.subr.bf16.mxu1 %v561_v21 }
  0x18   :  { %495 = vmatpush3.bf16.msra.mxu0 %v562_v22 }
  0x19   :  { %523 = vmatpush3.bf16.msra.mxu1 %v563_v23  ;;  %496 = vmatprep.subr.bf16.mxu0 %v564_v24 }
  0x1a   :  { %524 = vmatprep.subr.bf16.mxu1 %v565_v25 }
  0x1c   :  { %497 = vmatpush3.bf16.msra.mxu0 %v566_v26 }
  0x1d   :  { %525 = vmatpush3.bf16.msra.mxu1 %v567_v27  ;;  %498 = vmatprep.subr.bf16.mxu0 %v568_v28 }
  0x1e   :  { %526 = vmatprep.subr.bf16.mxu1 %v569_v29 }
  0x20   :  { %499 = vmatpush3.bf16.msra.mxu0 %v570_v30 }
  0x21   :  { %527 = vmatpush3.bf16.msra.mxu1 %v571_v31 }
  0x23   :  { %362 = vmatmul.mubr.bf16.vlgmr.msra.gmra.mxu0 %v572_v32 }
  0x24   :  { %411 = vmatmul.mubr.bf16.vlgmr.msra.gmra.mxu1 %v575_v34  ;;  %369 = vmatprep.mubr.bf16.mxu0 %v578_v36 }
  0x25   :  { %418 = vmatprep.mubr.bf16.mxu1 %v580_v37 }
  0x2b   :  { %370 = vmatmul.mubr.bf16.gmra.mxu0 %v582_v38 }
  0x2c   :  { %419 = vmatmul.mubr.bf16.gmra.mxu1 %v583_v39 }
  0xe3   :  { %v500_v40 = vpop.f32.mrf.mxu0 }
  0xe4   :  { %v528_v41 = vpop.f32.mrf.mxu1 }
  0xe5   :  { %v501_v43 = vpop.f32.mrf.mxu0 }
  0xe6   :  { %v502_v44 = vadd.f32 %v501_v43, %v500_v40  ;;  %v529_v45 = vpop.f32.mrf.mxu1 }
  0xe7   :  { %v503_v46 = vpop.f32.mrf.mxu0  ;;  %v530_v48 = vadd.f32 %v529_v45, %v528_v41 }
  0xe8   :  { %v364_v47 = vadd.f32 %v502_v44, %v443_v42  ;;  %v531_v49 = vpop.f32.mrf.mxu1 }
  0xe9   :  { %v504_v51 = vpop.f32.mrf.mxu0 }
  0xea   :  { %v413_v52 = vadd.f32 %v530_v48, %v364_v47  ;;  %v505_v53 = vadd.f32 %v504_v51, %v503_v46  ;;  %v532_v54 = vpop.f32.mrf.mxu1 }
  0xeb   :  { %v506_v55 = vpop.f32.mrf.mxu0  ;;  %v533_v58 = vadd.f32 %v532_v54, %v531_v49 }
  0xec   :  { %v431_v56 = vadd.f32 %v427_v50, %v413_v52  ;;  %v367_v57 = vadd.f32 %v505_v53, %v443_v42  ;;  %v534_v59 = vpop.f32.mrf.mxu1 }
  0xed   :  { %v507_v61 = vpop.f32.mrf.mxu0 }
  0xee   :  { %435 = vst [vmem:[%s760_s4] sm:$0xff] %v431_v56  ;;  %v416_v62 = vadd.f32 %v533_v58, %v367_v57  ;;  %v508_v63 = vadd.f32 %v507_v61, %v506_v55  ;;  %v535_v0 = vpop.f32.mrf.mxu1 }
  0xef   :  { %v509_v1 = vpop.f32.mrf.mxu0  ;;  %v536_v4 = vadd.f32 %v535_v0, %v534_v59 }
  0xf0   :  { %v432_v2 = vadd.f32 %v428_v60, %v416_v62  ;;  %v372_v3 = vadd.f32 %v508_v63, %v443_v42  ;;  %v537_v5 = vpop.f32.mrf.mxu1 }
  0xf1   :  { %v510_v7 = vpop.f32.mrf.mxu0 }
  0xf2   :  { %436 = vst [vmem:[%s760_s4 + $0x8] sm:$0xff] %v432_v2  ;;  %v421_v8 = vadd.f32 %v536_v4, %v372_v3  ;;  %v511_v9 = vadd.f32 %v510_v7, %v509_v1  ;;  %v538_v10 = vpop.f32.mrf.mxu1 }
  0xf3   :  { %v539_v13 = vadd.f32 %v538_v10, %v537_v5 }
  0xf4   :  { %v433_v11 = vadd.f32 %v429_v6, %v421_v8  ;;  %v375_v12 = vadd.f32 %v511_v9, %v443_v42 }
  0xf6   :  { %437 = vst [vmem:[%s760_s4 + $0x10] sm:$0xff] %v433_v11  ;;  %v424_v15 = vadd.f32 %v539_v13, %v375_v12 }
  0xf8   :  { %v434_v16 = vadd.f32 %v430_v14, %v424_v15 }
  0xfa   :  { %438 = vst [vmem:[%s760_s4 + $0x18] sm:$0xff] %v434_v16 }

// kernel: _lambda_.19
= control target key start
LH: loop header
LB: loop body
LE: loop exit
PB: predicated region body
PF: predicated region fallthrough
CT: control target
= control target key end

     0   :  { %v693_v46 = vmov 0   ;;  %s945_s0 = inlined_call_operand.vmem [shape: f32[32,128], index: 0, kind: input, shape index: {}]   ;;  %s946_s3 = inlined_call_operand.vmem [shape: bf16[128,512], index: 3, kind: input, shape index: {}]   ;;  %s947_s1 = inlined_call_operand.vmem [shape: f32[1,128], index: 1, kind: input, shape index: {}]   ;;  %s948_s2 = inlined_call_operand.vmem [shape: f32[1,128], index: 2, kind: input, shape index: {}]   ;;  %s949_s4 = inlined_call_operand.vmem [shape: f32[1,512], index: 4, kind: input, shape index: {}]   ;;  %s950_s5 = inlined_call_operand.vmem [shape: bf16[32,512], index: 5, kind: output, shape index: {}]  }
   0x1   :  { %v21_v0 = vld [vmem:[%s945_s0] sm:$0xff]  ;;  %v23_v1 = vld [vmem:[%s945_s0 + $0x10] sm:$0xff]  ;;  %v22_v2 = vld [vmem:[%s945_s0 + $0x8] sm:$0xff]  ;;  %340 = vmatprep.mubr.bf16.mxu0 %v693_v46  ;;  %393 = vmatprep.mubr.bf16.mxu1 %v693_v46 }
   0x2   :  { %25 = vadd.xlane.f32.xlu0 %v21_v0  ;;  %29 = vadd.xlane.f32.xlu1 %v23_v1  ;;  %v24_v3 = vld [vmem:[%s945_s0 + $0x18] sm:$0xff]  ;;  %v605_v4 = vld [vmem:[%s946_s3 + $0xe4] ss:$16 sps:$4 sm:$0xff]   ;;  %v609_v6 = vld [vmem:[%s946_s3 + $0xe0] ss:$16 sps:$4 sm:$0xff]  }
   0x3   :  { %v607_v5 = vld [vmem:[%s946_s3 + $0xec] ss:$16 sps:$4 sm:$0xff]   ;;  %308 = vmatprep.subr.bf16.mxu0 %v605_v4  ;;  %v610_v7 = vld [vmem:[%s946_s3 + $0xe8] ss:$16 sps:$4 sm:$0xff]   ;;  %v611_v24 = vld [vmem:[%s946_s3 + $0xc4] ss:$16 sps:$4 sm:$0xff]  }
   0x4   :  { %361 = vmatprep.subr.bf16.mxu1 %v607_v5  ;;  %309 = vmatpush1.bf16.msra.mxu0 %v609_v6  ;;  %v613_v25 = vld [vmem:[%s946_s3 + $0xcc] ss:$16 sps:$4 sm:$0xff]   ;;  %v615_v26 = vld [vmem:[%s946_s3 + $0xc0] ss:$16 sps:$4 sm:$0xff]   ;;  %v616_v27 = vld [vmem:[%s946_s3 + $0xc8] ss:$16 sps:$4 sm:$0xff]  }
   0x5   :  { %362 = vmatpush1.bf16.msra.mxu1 %v610_v7  ;;  %310 = vmatprep.subr.bf16.mxu0 %v611_v24  ;;  %v617_v28 = vld [vmem:[%s946_s3 + $0xa4] ss:$16 sps:$4 sm:$0xff]   ;;  %v619_v29 = vld [vmem:[%s946_s3 + $0xac] ss:$16 sps:$4 sm:$0xff]   ;;  %v621_v30 = vld [vmem:[%s946_s3 + $0xa0] ss:$16 sps:$4 sm:$0xff]  }
   0x6   :  { %27 = vadd.xlane.f32.xlu0 %v22_v2  ;;  %31 = vadd.xlane.f32.xlu1 %v24_v3  ;;  %v622_v31 = vld [vmem:[%s946_s3 + $0xa8] ss:$16 sps:$4 sm:$0xff]   ;;  %v623_v32 = vld [vmem:[%s946_s3 + $0x84] ss:$16 sps:$4 sm:$0xff]   ;;  %v625_v33 = vld [vmem:[%s946_s3 + $0x8c] ss:$16 sps:$4 sm:$0xff]  }
   0x7   :  { %363 = vmatprep.subr.bf16.mxu1 %v613_v25  ;;  %v627_v34 = vld [vmem:[%s946_s3 + $0x80] ss:$16 sps:$4 sm:$0xff]   ;;  %v628_v35 = vld [vmem:[%s946_s3 + $0x88] ss:$16 sps:$4 sm:$0xff]   ;;  %v629_v36 = vld [vmem:[%s946_s3 + $0x64] ss:$16 sps:$4 sm:$0xff]  }
   0x8   :  { %311 = vmatpush1.bf16.msra.mxu0 %v615_v26  ;;  %v631_v37 = vld [vmem:[%s946_s3 + $0x6c] ss:$16 sps:$4 sm:$0xff]   ;;  %v633_v38 = vld [vmem:[%s946_s3 + $0x60] ss:$16 sps:$4 sm:$0xff]   ;;  %v634_v39 = vld [vmem:[%s946_s3 + $0x68] ss:$16 sps:$4 sm:$0xff]  }
   0x9   :  { %364 = vmatpush1.bf16.msra.mxu1 %v616_v27  ;;  %312 = vmatprep.subr.bf16.mxu0 %v617_v28  ;;  %v635_v40 = vld [vmem:[%s946_s3 + $0x44] ss:$16 sps:$4 sm:$0xff]   ;;  %v637_v41 = vld [vmem:[%s946_s3 + $0x4c] ss:$16 sps:$4 sm:$0xff]   ;;  %v639_v42 = vld [vmem:[%s946_s3 + $0x40] ss:$16 sps:$4 sm:$0xff]  }
   0xa   :  { %365 = vmatprep.subr.bf16.mxu1 %v619_v29  ;;  %v640_v43 = vld [vmem:[%s946_s3 + $0x48] ss:$16 sps:$4 sm:$0xff]   ;;  %v641_v44 = vld [vmem:[%s946_s3 + $0x24] ss:$16 sps:$4 sm:$0xff]   ;;  %v643_v45 = vld [vmem:[%s946_s3 + $0x2c] ss:$16 sps:$4 sm:$0xff]  }
   0xb   :  { %v645_v47 = vld [vmem:[%s946_s3 + $0x20] ss:$16 sps:$4 sm:$0xff]   ;;  %v646_v48 = vld [vmem:[%s946_s3 + $0x28] ss:$16 sps:$4 sm:$0xff]   ;;  %v647_v49 = vld [vmem:[%s946_s3 + $0x4] ss:$16 sps:$4 sm:$0xff]  }
   0xc   :  { %313 = vmatpush1.bf16.msra.mxu0 %v621_v30  ;;  %v649_v50 = vld [vmem:[%s946_s3 + $0xc] ss:$16 sps:$4 sm:$0xff]   ;;  %v651_v51 = vld [vmem:[%s946_s3] ss:$16 sps:$4 sm:$0xff]   ;;  %v652_v52 = vld [vmem:[%s946_s3 + $0x8] ss:$16 sps:$4 sm:$0xff]  }
   0xd   :  { %366 = vmatpush1.bf16.msra.mxu1 %v622_v31  ;;  %314 = vmatprep.subr.bf16.mxu0 %v623_v32 }
   0xe   :  { %367 = vmatprep.subr.bf16.mxu1 %v625_v33 }
  0x10   :  { %315 = vmatpush1.bf16.msra.mxu0 %v627_v34 }
  0x11   :  { %368 = vmatpush1.bf16.msra.mxu1 %v628_v35  ;;  %316 = vmatprep.subr.bf16.mxu0 %v629_v36 }
  0x12   :  { %369 = vmatprep.subr.bf16.mxu1 %v631_v37 }
  0x14   :  { %317 = vmatpush1.bf16.msra.mxu0 %v633_v38 }
  0x15   :  { %370 = vmatpush1.bf16.msra.mxu1 %v634_v39  ;;  %318 = vmatprep.subr.bf16.mxu0 %v635_v40 }
  0x16   :  { %371 = vmatprep.subr.bf16.mxu1 %v637_v41 }
  0x18   :  { %319 = vmatpush1.bf16.msra.mxu0 %v639_v42 }
  0x19   :  { %372 = vmatpush1.bf16.msra.mxu1 %v640_v43  ;;  %320 = vmatprep.subr.bf16.mxu0 %v641_v44 }
  0x1a   :  { %373 = vmatprep.subr.bf16.mxu1 %v643_v45 }
  0x1c   :  { %321 = vmatpush1.bf16.msra.mxu0 %v645_v47 }
  0x1d   :  { %374 = vmatpush1.bf16.msra.mxu1 %v646_v48  ;;  %322 = vmatprep.subr.bf16.mxu0 %v647_v49 }
  0x1e   :  { %375 = vmatprep.subr.bf16.mxu1 %v649_v50 }
  0x20   :  { %323 = vmatpush1.bf16.msra.mxu0 %v651_v51 }
  0x21   :  { %376 = vmatpush1.bf16.msra.mxu1 %v652_v52 }
  0x8b   :  { %v26_v8 = vpop.xlane.xlu0 %25  ;;  %v30_v9 = vpop.xlane.xlu1 %29 }
  0x8c   :  { %v34_v10 = vmul.f32 0.0078125, %v26_v8  ;;  %v36_v11 = vmul.f32 0.0078125, %v30_v9  ;;  %v555_v8 = vld [vmem:[%s948_s2] ss:$0 sm:$0xff] }
  0x8e   :  { %v748_v12 = vsub.f32 %v21_v0, %v34_v10  ;;  %v750_v13 = vsub.f32 %v23_v1, %v36_v11 }
  0x8f   :  { %v28_v14 = vpop.xlane.xlu0 %27  ;;  %v32_v15 = vpop.xlane.xlu1 %31 }
  0x90   :  { %v35_v16 = vmul.f32 0.0078125, %v28_v14  ;;  %v42_v17 = vmul.f32 %v748_v12, %v748_v12  ;;  %v37_v18 = vmul.f32 0.0078125, %v32_v15  ;;  %v44_v21 = vmul.f32 %v750_v13, %v750_v13 }
  0x92   :  { %v754_v19 = vsub.f32 %v22_v2, %v35_v16  ;;  %46 = vadd.xlane.f32.xlu0 %v42_v17  ;;  %v756_v20 = vsub.f32 %v24_v3, %v37_v18  ;;  %v554_v3 = vld [vmem:[%s947_s1] ss:$0 sm:$0xff] }
  0x94   :  { %v43_v22 = vmul.f32 %v754_v19, %v754_v19  ;;  %v45_v23 = vmul.f32 %v756_v20, %v756_v20 }
  0x96   :  { %50 = vadd.xlane.f32.xlu0 %v44_v21  ;;  %48 = vadd.xlane.f32.xlu1 %v43_v22 }
  0x9a   :  { %52 = vadd.xlane.f32.xlu1 %v45_v23  ;;  %v128_v23 = vlaneseq }
  0x9c   :  { %v129_v24 = vshrl.u32 %v128_v23, 7 }
  0x9e   :  { %v130_v25 = vsub.s32 0, %v129_v24  ;;  %v138_v26 = vsub.s32 2, %v129_v24  ;;  %v142_v27 = vsub.s32 3, %v129_v24 }
 0x11b   :  { %v47_v53 = vpop.xlane.xlu0 %46 }
 0x11c   :  { %v54_v54 = vmul.f32 0.0078125, %v47_v53 }
 0x11e   :  { %v58_v55 = vadd.f32 1e-06, %v54_v54 }
 0x11f   :  { %v49_v56 = vpop.xlane.xlu1 %48  ;;  %v51_v57 = vpop.xlane.xlu0 %50 }
 0x120   :  { %653 = vrsqrt.f32 %v58_v55  ;;  %v55_v58 = vmul.f32 0.0078125, %v49_v56  ;;  %v56_v59 = vmul.f32 0.0078125, %v51_v57 }
 0x122   :  { %v59_v60 = vadd.f32 1e-06, %v55_v58  ;;  %v60_v61 = vadd.f32 1e-06, %v56_v59 }
 0x123   :  { %v53_v62 = vpop.xlane.xlu1 %52 }
 0x124   :  { %655 = vrsqrt.f32 %v59_v60  ;;  %v57_v63 = vmul.f32 0.0078125, %v53_v62 }
 0x125   :  { %657 = vrsqrt.f32 %v60_v61 }
 0x126   :  { %v61_v0 = vadd.f32 1e-06, %v57_v63 }
 0x128   :  { %659 = vrsqrt.f32 %v61_v0 }
 0x12d   :  { %v654_v1 = vpop.eup %653 }
 0x12e   :  { %v66_v2 = vmul.f32 %v654_v1, %v748_v12 }
 0x130   :  { %v77_v6 = vmul.f32 %v554_v3, %v66_v2 }
 0x131   :  { %v656_v4 = vpop.eup %655 }
 0x132   :  { %v67_v5 = vmul.f32 %v656_v4, %v754_v19  ;;  %v658_v7 = vpop.eup %657  ;;  %v88_v11 = vadd.f32 %v555_v8, %v77_v6 }
 0x133   :  { %v68_v15 = vmul.f32 %v658_v7, %v750_v13  ;;  %v126_v13 = vld [vmem:[%s949_s4] sm:$0xf] }
 0x134   :  { %v78_v9 = vmul.f32 %v554_v3, %v67_v5  ;;  %v131_v28 = vrot.slane %v126_v13, %v130_v25  ;;  %v139_v29 = vrot.slane %v126_v13, %v138_v26  ;;  %v143_v33 = vrot.slane %v126_v13, %v142_v27 }
 0x135   :  { %v660_v10 = vpop.eup %659  ;;  %v79_v18 = vmul.f32 %v554_v3, %v68_v15 }
 0x136   :  { %v89_v14 = vadd.f32 %v555_v8, %v78_v9  ;;  %v69_v12 = vmul.f32 %v660_v10, %v756_v20  ;;  %v134_v20 = vsub.s32 1, %v129_v24 }
 0x137   :  { %v90_v21 = vadd.f32 %v555_v8, %v79_v18 }
 0x138   :  { %v92_v16 = vpack.c.bf16 %v89_v14, %v88_v11  ;;  %v80_v17 = vmul.f32 %v554_v3, %v69_v12  ;;  %v135_v32 = vrot.slane %v126_v13, %v134_v20 }
 0x13a   :  { %341 = vmatmul.mubr.bf16.vlgmr.msra.gmra.mxu0 %v92_v16  ;;  %394 = vmatmul.mubr.bf16.vlgmr.msra.gmra.mxu1 %v92_v16  ;;  %v91_v19 = vadd.f32 %v555_v8, %v80_v17 }
 0x13b   :  { %350 = vmatprep.mubr.bf16.mxu0 %v693_v46  ;;  %403 = vmatprep.mubr.bf16.mxu1 %v693_v46 }
 0x13c   :  { %v93_v22 = vpack.c.bf16 %v91_v19, %v90_v21 }
 0x142   :  { %351 = vmatmul.mubr.bf16.gmra.mxu0 %v93_v22  ;;  %404 = vmatmul.mubr.bf16.gmra.mxu1 %v93_v22 }
 0x1fa   :  { %v342_v30 = vpop.f32.mrf.mxu0  ;;  %v395_v31 = vpop.f32.mrf.mxu1 }
 0x1fb   :  { %v861_v34 = vadd.f32 %v342_v30, %v131_v28  ;;  %v863_v35 = vadd.f32 %v395_v31, %v139_v29 }
 0x1fc   :  { %v344_v36 = vpop.f32.mrf.mxu0  ;;  %v397_v37 = vpop.f32.mrf.mxu1 }
 0x1fd   :  { %v430_v38 = vmul.f32 0.70710677, %v861_v34  ;;  %v432_v39 = vmul.f32 0.70710677, %v863_v35  ;;  %v345_v40 = vadd.f32 %v344_v36, %v135_v32  ;;  %v867_v41 = vadd.f32 %v397_v37, %v143_v33 }
 0x1fe   :  { %v346_v42 = vpop.f32.mrf.mxu0  ;;  %v399_v43 = vpop.f32.mrf.mxu1  ;;  %v414_v24 = vmul.f32 0.5, %v861_v34  ;;  %v416_v20 = vmul.f32 0.5, %v863_v35 }
 0x1ff   :  { %661 = verf.f32 %v430_v38  ;;  %v869_v44 = vadd.f32 %v346_v42, %v131_v28  ;;  %v871_v45 = vadd.f32 %v399_v43, %v139_v29  ;;  %v431_v46 = vmul.f32 0.70710677, %v345_v40 }
 0x200   :  { %663 = verf.f32 %v432_v39  ;;  %v348_v47 = vpop.f32.mrf.mxu0  ;;  %v401_v48 = vpop.f32.mrf.mxu1  ;;  %v433_v49 = vmul.f32 0.70710677, %v867_v41  ;;  %v415_v25 = vmul.f32 0.5, %v345_v40  ;;  %v417_v27 = vmul.f32 0.5, %v867_v41 }
 0x201   :  { %v434_v50 = vmul.f32 0.70710677, %v869_v44  ;;  %665 = verf.f32 %v431_v46  ;;  %v436_v51 = vmul.f32 0.70710677, %v871_v45  ;;  %v876_v52 = vadd.f32 %v348_v47, %v135_v32 }
 0x202   :  { %v878_v53 = vadd.f32 %v401_v48, %v143_v33  ;;  %v352_v54 = vpop.f32.mrf.mxu0  ;;  %v405_v55 = vpop.f32.mrf.mxu1  ;;  %667 = verf.f32 %v433_v49  ;;  %v418_v34 = vmul.f32 0.5, %v869_v44  ;;  %v420_v41 = vmul.f32 0.5, %v871_v45 }
 0x203   :  { %v880_v56 = vadd.f32 %v352_v54, %v131_v28  ;;  %v882_v57 = vadd.f32 %v405_v55, %v139_v29  ;;  %669 = verf.f32 %v434_v50  ;;  %v435_v58 = vmul.f32 0.70710677, %v876_v52 }
 0x204   :  { %v354_v59 = vpop.f32.mrf.mxu0  ;;  %v407_v60 = vpop.f32.mrf.mxu1  ;;  %671 = verf.f32 %v436_v51  ;;  %v437_v61 = vmul.f32 0.70710677, %v878_v53  ;;  %v419_v40 = vmul.f32 0.5, %v876_v52  ;;  %v421_v47 = vmul.f32 0.5, %v878_v53 }
 0x205   :  { %v438_v62 = vmul.f32 0.70710677, %v880_v56  ;;  %673 = verf.f32 %v435_v58  ;;  %v440_v63 = vmul.f32 0.70710677, %v882_v57  ;;  %v888_v0 = vadd.f32 %v354_v59, %v135_v32 }
 0x206   :  { %v356_v1 = vpop.f32.mrf.mxu0  ;;  %v409_v2 = vpop.f32.mrf.mxu1  ;;  %675 = verf.f32 %v437_v61  ;;  %v890_v3 = vadd.f32 %v407_v60, %v143_v33  ;;  %v422_v53 = vmul.f32 0.5, %v880_v56 }
 0x207   :  { %v892_v4 = vadd.f32 %v356_v1, %v131_v28  ;;  %v894_v5 = vadd.f32 %v409_v2, %v139_v29  ;;  %677 = verf.f32 %v438_v62  ;;  %v439_v6 = vmul.f32 0.70710677, %v888_v0 }
 0x208   :  { %v358_v7 = vpop.f32.mrf.mxu0  ;;  %v411_v8 = vpop.f32.mrf.mxu1  ;;  %679 = verf.f32 %v440_v63  ;;  %v441_v9 = vmul.f32 0.70710677, %v890_v3  ;;  %v423_v60 = vmul.f32 0.5, %v888_v0  ;;  %v424_v1 = vmul.f32 0.5, %v882_v57 }
 0x209   :  { %681 = verf.f32 %v439_v6  ;;  %v442_v10 = vmul.f32 0.70710677, %v892_v4  ;;  %v444_v11 = vmul.f32 0.70710677, %v894_v5  ;;  %v900_v14 = vadd.f32 %v358_v7, %v135_v32 }
 0x20a   :  { %683 = verf.f32 %v441_v9  ;;  %v902_v15 = vadd.f32 %v411_v8, %v143_v33  ;;  %v425_v2 = vmul.f32 0.5, %v890_v3 }
 0x20b   :  { %685 = verf.f32 %v442_v10  ;;  %v443_v17 = vmul.f32 0.70710677, %v900_v14 }
 0x20c   :  { %v662_v12 = vpop.eup %661  ;;  %687 = verf.f32 %v444_v11  ;;  %v445_v19 = vmul.f32 0.70710677, %v902_v15 }
 0x20d   :  { %v664_v16 = vpop.eup %663  ;;  %v462_v18 = vadd.f32 1.0, %v662_v12  ;;  %689 = verf.f32 %v443_v17  ;;  %v426_v17 = vmul.f32 0.5, %v892_v4 }
 0x20e   :  { %v666_v21 = vpop.eup %665  ;;  %v464_v22 = vadd.f32 1.0, %v664_v16  ;;  %691 = verf.f32 %v445_v19 }
 0x20f   :  { %v668_v23 = vpop.eup %667  ;;  %v463_v26 = vadd.f32 1.0, %v666_v21  ;;  %v478_v30 = vmul.f32 %v462_v18, %v414_v24  ;;  %v427_v18 = vmul.f32 0.5, %v900_v14  ;;  %v428_v21 = vmul.f32 0.5, %v894_v5 }
 0x210   :  { %v670_v13 = vpop.eup %669  ;;  %v465_v28 = vadd.f32 1.0, %v668_v23  ;;  %v480_v36 = vmul.f32 %v464_v22, %v416_v20  ;;  %v429_v22 = vmul.f32 0.5, %v902_v15 }
 0x211   :  { %v672_v29 = vpop.eup %671  ;;  %v479_v31 = vmul.f32 %v463_v26, %v415_v25  ;;  %v466_v32 = vadd.f32 1.0, %v670_v13 }
 0x212   :  { %v674_v33 = vpop.eup %673  ;;  %v481_v37 = vmul.f32 %v465_v28, %v417_v27  ;;  %v468_v38 = vadd.f32 1.0, %v672_v29 }
 0x213   :  { %v676_v39 = vpop.eup %675  ;;  %v596_v42 = vpack.c.bf16 %v479_v31, %v478_v30  ;;  %v467_v43 = vadd.f32 1.0, %v674_v33  ;;  %v482_v50 = vmul.f32 %v466_v32, %v418_v34 }
 0x214   :  { %v678_v46 = vpop.eup %677  ;;  %v597_v35 = vpack.c.bf16 %v481_v37, %v480_v36  ;;  %v469_v48 = vadd.f32 1.0, %v676_v39  ;;  %v484_v44 = vmul.f32 %v468_v38, %v420_v41 }
 0x215   :  { %v680_v49 = vpop.eup %679  ;;  %542 = vst [vmem:[%s950_s5] sm:$0xff] %v596_v42  ;;  %v483_v51 = vmul.f32 %v467_v43, %v419_v40  ;;  %v470_v54 = vadd.f32 1.0, %v678_v46 }
 0x216   :  { %v682_v55 = vpop.eup %681  ;;  %543 = vst [vmem:[%s950_s5 + $0x8] sm:$0xff] %v597_v35  ;;  %v485_v52 = vmul.f32 %v469_v48, %v421_v47  ;;  %v472_v58 = vadd.f32 1.0, %v680_v49 }
 0x217   :  { %v684_v45 = vpop.eup %683  ;;  %v598_v59 = vpack.c.bf16 %v483_v51, %v482_v50  ;;  %v471_v61 = vadd.f32 1.0, %v682_v55  ;;  %v486_v8 = vmul.f32 %v470_v54, %v422_v53 }
 0x218   :  { %v686_v62 = vpop.eup %685  ;;  %v599_v63 = vpack.c.bf16 %v485_v52, %v484_v44  ;;  %v473_v6 = vadd.f32 1.0, %v684_v45  ;;  %v488_v56 = vmul.f32 %v472_v58, %v424_v1 }
 0x219   :  { %v688_v7 = vpop.eup %687  ;;  %544 = vst [vmem:[%s950_s5 + $0x10] sm:$0xff] %v598_v59  ;;  %v487_v9 = vmul.f32 %v471_v61, %v423_v60  ;;  %v474_v10 = vadd.f32 1.0, %v686_v62 }
 0x21a   :  { %545 = vst [vmem:[%s950_s5 + $0x18] sm:$0xff] %v599_v63  ;;  %v489_v0 = vmul.f32 %v473_v6, %v425_v2  ;;  %v690_v11 = vpop.eup %689  ;;  %v476_v57 = vadd.f32 1.0, %v688_v7 }
 0x21b   :  { %v600_v12 = vpack.c.bf16 %v487_v9, %v486_v8  ;;  %v692_v16 = vpop.eup %691  ;;  %v475_v19 = vadd.f32 1.0, %v690_v11  ;;  %v490_v24 = vmul.f32 %v474_v10, %v426_v17 }
 0x21c   :  { %v601_v3 = vpack.c.bf16 %v489_v0, %v488_v56  ;;  %v477_v23 = vadd.f32 1.0, %v692_v16  ;;  %v492_v26 = vmul.f32 %v476_v57, %v428_v21 }
 0x21d   :  { %546 = vst [vmem:[%s950_s5 + $0x20] sm:$0xff] %v600_v12  ;;  %v491_v25 = vmul.f32 %v475_v19, %v427_v18 }
 0x21e   :  { %547 = vst [vmem:[%s950_s5 + $0x28] sm:$0xff] %v601_v3  ;;  %v493_v4 = vmul.f32 %v477_v23, %v429_v22 }
 0x21f   :  { %v602_v13 = vpack.c.bf16 %v491_v25, %v490_v24 }
 0x220   :  { %v603_v14 = vpack.c.bf16 %v493_v4, %v492_v26 }
 0x221   :  { %548 = vst [vmem:[%s950_s5 + $0x30] sm:$0xff] %v602_v13 }
 0x222   :  { %549 = vst [vmem:[%s950_s5 + $0x38] sm:$0xff] %v603_v14 }

// kernel: _lambda_.17
= control target key start
LH: loop header
LB: loop body
LE: loop exit
PB: predicated region body
PF: predicated region fallthrough
CT: control target
= control target key end

     0   :  { %s1299_s18 = smov 0   ;;  %s1301_s19 = smov 0   ;;  %s1498_s0 = inlined_call_operand.vmem [shape: bf16[8,4,384], index: 0, kind: input, shape index: {}, may-alias: {0,1,2}]   ;;  %s1499_s1 = inlined_call_operand.vmem [shape: bf16[8,4,384], index: 1, kind: input, shape index: {}, may-alias: {0,1,2}]   ;;  %s1500_s2 = inlined_call_operand.vmem [shape: bf16[8,4,384], index: 2, kind: input, shape index: {}, may-alias: {0,1,2}]   ;;  %s1501_s3 = inlined_call_operand.vmem [shape: bf16[8,2,4,2], index: 3, kind: input, shape index: {}]   ;;  %s1502_s4 = inlined_call_operand.vmem [shape: bf16[8,2,4,2], index: 4, kind: input, shape index: {}]   ;;  %s1503_s5 = inlined_call_operand.vmem [shape: bf16[8,4,128], index: 5, kind: output, shape index: {}]  }
   0x1   :  { %s1303_s20 = smov 0  }
   0x2 LB: > { %s34_s21 = sadd.s32 1, %s1254_s19  ;;  %p1135_p0 = scmp.ge.s32.totalorder %s1258_s20, 1  ;;  %s1258_s20 = sphi %s1303_s20, %s15_s20   ;;  %s1254_s19 = sphi %s1301_s19, %s1505_s19   ;;  %s1250_s18 = sphi %s1299_s18, %s1504_s18  }
   0x3   : > { %p36_p1 = scmp.ge.s32.totalorder %s34_s21, 8  ;;  %p278_p2 = scmp.lt.s32.totalorder %s1258_s20, 9 }
   0x5   : > { %s1507_s21 = smov (%p36_p1, %s34_s21), 0  ;;  %p279_p3 = pnand %p1135_p0, %p278_p2 }
   0x6   : > { %p348_p4 = scmp.lt.s32.totalorder (!%p279_p3), %s1250_s18, 7  ;;  %s1266_s11 = smov (!%p279_p3), 2  }
   0x7   : > { %282 = sbr.rel (%p279_p3) target bundleno = 1450 (0x5aa), region = 40  ;;  %s1268_s12 = smov (!%p279_p3), 64  }
   0xc   : > { %v468_v0 = vlaneseq  ;;  %v1260_v1 = vmov 0.0   ;;  %s1509_s18 = smov (!%p348_p4, %s1250_s18), 7  ;;  %vm1261_vm0 = vmmov 0   ;;  %vm416_vm1 = vcmask 523264  }
   0xd   : > { %1164 = vmatprep.subr.bf16.mxu0 %v1260_v1  ;;  %1170 = vmatprep.subr.bf16.mxu1 %v1260_v1  ;;  %s1154_s22 = sshll.u32 %s1509_s18, 2  ;;  %s1329_s23 = smul.u32 6, %s1509_s18  ;;  %v1262_v16 = vmov 1966171168   ;;  %v1263_v27 = vmov 1983009808  }
   0xe   : > { %v1321_v2 = vshrl.u32 %v468_v0, 7  ;;  %1166 = vmatprep.mubr.msk.bf16.mxu0 %vm1261_vm0, %v1260_v1  ;;  %1172 = vmatprep.mubr.msk.bf16.mxu1 %vm1261_vm0, %v1260_v1  ;;  %s1336_s26 = scalar_lea.vmem %s1501_s3, %s1154_s22  ;;  %v498_v17 = vunpack.c.l.s4 %v1262_v16  ;;  %s1376_s10 = scalar_lea.vmem %s1502_s4, %s1154_s22  ;;  %v547_v28 = vunpack.c.l.s4 %v1263_v27  ;;  %v1264_v35 = vmov 1934713408  }
   0xf   : > { %v464_v5 = vld [vmem:[%s1336_s26] sm:$0x3]  ;;  %s1051_s29 = scalar_lea.vmem %s1499_s1, %s1329_s23  ;;  %s356_s7 = scalar_lea.vmem %s1498_s0, %s1329_s23  ;;  %v563_v36 = vunpack.c.l.s4 %v1264_v35  ;;  %vm405_vm2 = vcmask 3072   ;;  %v1265_v52 = vmov -inf   ;;  %vm574_vm3 = vcmask 15360  }
  0x10   : > { %v484_v3 = vsub.s32 2, %v1321_v2  ;;  %v1340_v4 = vsub.s32 0, %v1321_v2  ;;  %v465_v6 = vunpack.c.l.bf16 %v464_v5  ;;  %v491_v7 = vsub.s32 3, %v1321_v2  ;;  %v1349_v9 = vld [vmem:[%s1051_s29 + $0x2] sm:$0x3]  ;;  %s1057_s15 = scalar_lea.vmem %s1500_s2, %s1329_s23  ;;  %s1143_s16 = sshll.u32 %s1509_s18, 1 }
  0x11   : > { %v477_v8 = vsub.s32 1, %v1321_v2  ;;  %v421_v10 = vsel %vm416_vm1, %v1349_v9, 0  ;;  %v1365_v15 = vld [vmem:[%s356_s7] sm:$0x3]  ;;  %v499_v18 = vunpack.c.0.s8 %v498_v17  ;;  %v548_v32 = vunpack.c.0.s8 %v547_v28  ;;  %406 = vst.msk [vmem:[#allocation2] sm:$0xf] %vm405_vm2, %v1265_v52  ;;  %s399_s23 = scalar_lea.vmem %s1503_s5, %s1143_s16 }
  0x12   : > { %v485_v11 = vrot.slane %v465_v6, %v484_v3  ;;  %v471_v12 = vrot.slane %v465_v6, %v1340_v4  ;;  %1165 = vmatpush3.bf16.xpose.msra.mxu0 %v421_v10  ;;  %v492_v13 = vrot.slane %v465_v6, %v491_v7  ;;  %v466_v19 = vld [vmem:[%s1376_s10] sm:$0x3]  ;;  %v564_v47 = vunpack.c.0.s8 %v563_v36  ;;  %407 = vst.msk [vmem:[#allocation2 + $0x4] sm:$0xf] %vm405_vm2, %v1265_v52 }
  0x13   : > { %1182 = vmatprep.subr.bf16.mxu0 %v1260_v1  ;;  %v478_v14 = vrot.slane %v465_v6, %v477_v8  ;;  %v467_v20 = vunpack.c.l.bf16 %v466_v19  ;;  %v1380_v21 = vsub.s32 %v499_v18, %v1321_v2  ;;  %v1390_v41 = vsub.s32 %v548_v32, %v1321_v2  ;;  %408 = vst.msk [vmem:[#allocation3] sm:$0xf] %vm405_vm2, %v1260_v1  ;;  %v1430_v18 = vld [vmem:[%s1057_s15 + $0x4] sm:$0x3] }
  0x14   : > { %487 = vbcast.lane.b32.xlu1 %v485_v11, 256  ;;  %473 = vbcast.lane.b32.xlu0 %v471_v12, 256  ;;  %v1395_v51 = vsub.s32 %v564_v47, %v1321_v2  ;;  %409 = vst.msk [vmem:[#allocation3 + $0x4] sm:$0xf] %vm405_vm2, %v1260_v1  ;;  %vm578_vm4 = vcmask 27648   ;;  %v1267_v5 = vmov 0  }
  0x15   : > { %v503_v22 = vrot.slane %v467_v20, %v1380_v21  ;;  %1222 = vset.pattern.permute.xlu0 %v1267_v5  ;;  %1223 = vset.pattern.permute.xlu1 %v1267_v5  ;;  %v679_v12 = vrot.slane %v1349_v9, %v1390_v41  ;;  %v669_v16 = vrot.slane %v1365_v15, %v1390_v41  ;;  %vm614_vm5 = vcmask 1041408  }
  0x16   : > { %vm610_vm6 = vcmask 31744   ;;  %vm410_vm7 = vcmask 519168  }
  0x17   : > { %v511_v23 = vrot.slane %v503_v22, %v1380_v21  ;;  %v504_v24 = vcombine.high %v503_v22, %v503_v22  ;;  %412 = vst.msk [vmem:[#allocation4 + $0x4] sm:$0xf] %vm410_vm7, %v1260_v1  ;;  %411 = vst.msk [vmem:[#allocation4] sm:$0xf] %vm410_vm7, %v1260_v1 }
  0x18   : > { %494 = vbcast.lane.b32.xlu1 %v492_v13, 256  ;;  %480 = vbcast.lane.b32.xlu0 %v478_v14, 256  ;;  %v1408_v6 = vld [vmem:[#allocation2] sm:$0xf] }
  0x19   : > { %1167 = vmatmul.mubr.msk.bf16.vlgmr.msra.gmra.mxu0 %vm416_vm1, %v1365_v15  ;;  %v519_v25 = vcombine.high %v511_v23, %v511_v23  ;;  %v518_v26 = vrot.slane %v504_v24, %v1380_v21  ;;  %v524_v30 = vrot.slane %v511_v23, %v1340_v4  ;;  %v1149_v14 = vld [vmem:[%s1336_s26 + $0x2] sm:$0x3]  ;;  %v616_v15 = vsel %vm614_vm5, %v1430_v18, 0 }
  0x1a   : > { %1184 = vmatprep.mubr.msk.bf16.mxu0 %vm1261_vm0, %v1260_v1  ;;  %v731_v17 = vunpack.c.l.bf16 %v1149_v14  ;;  %1171 = vmatpush3.bf16.msra.mxu1 %v616_v15  ;;  %v1150_v23 = vld [vmem:[%s1376_s10 + $0x2] sm:$0x3]  ;;  %v844_v14 = vld [vmem:[#allocation2 + $0x4] sm:$0xf] }
  0x1b   : > { %v532_v29 = vrot.slane %v519_v25, %v1340_v4  ;;  %v520_v31 = vcombine.high %v518_v26, %v518_v26  ;;  %v528_v40 = vrot.slane %v518_v26, %v1340_v4  ;;  %1176 = vmatprep.subr.bf16.mxu1 %v1260_v1  ;;  %v734_v26 = vunpack.c.l.bf16 %v1150_v23 }
  0x1c   : > { %v738_v9 = vrot.slane %v731_v17, %v1340_v4  ;;  %v745_v19 = vrot.slane %v731_v17, %v477_v8  ;;  %v752_v20 = vrot.slane %v731_v17, %v484_v3  ;;  %v759_v22 = vrot.slane %v731_v17, %v491_v7 }
  0x1d   : > { %v536_v39 = vrot.slane %v520_v31, %v1340_v4  ;;  %v770_v28 = vrot.slane %v734_v26, %v1380_v21 }
  0x1f   : > { %v771_v31 = vcombine.high %v770_v28, %v770_v28 }
  0x21   : > { %v785_v3 = vrot.slane %v771_v31, %v1380_v21  ;;  %v861_v31 = vld [vmem:[#allocation3 + $0x4] sm:$0xf] }
  0x23   : > { %v787_v35 = vcombine.high %v785_v3, %v785_v3 }
  0x86   : > { %v488_v33 = vpop.permute.xlu1 %487  ;;  %v474_v34 = vpop.permute.xlu0 %473 }
  0x87   : > { %v543_v37 = vadd.f32 %v532_v29, %v488_v33  ;;  %v541_v38 = vadd.f32 %v524_v30, %v474_v34  ;;  %v778_v30 = vrot.slane %v770_v28, %v1380_v21  ;;  %v803_v21 = vrot.slane %v787_v35, %v1340_v4 }
  0x89   : > { %v545_v44 = vcombine.low %v541_v38, %v543_v37  ;;  %v786_v33 = vcombine.high %v778_v30, %v778_v30  ;;  %v791_v2 = vrot.slane %v778_v30, %v1340_v4 }
  0x8a   : > { %v495_v42 = vpop.permute.xlu1 %494  ;;  %v481_v43 = vpop.permute.xlu0 %480 }
  0x8b   : > { %v544_v45 = vadd.f32 %v536_v39, %v495_v42  ;;  %v542_v46 = vadd.f32 %v528_v40, %v481_v43  ;;  %v552_v49 = vrot.slane %v545_v44, %v1390_v41  ;;  %v799_v34 = vrot.slane %v786_v33, %v1340_v4 }
  0x8c   : > { %v795_v39 = vrot.slane %v785_v3, %v1340_v4 }
  0x8d   : > { %v553_v48 = vcombine.low %v542_v46, %v544_v45 }
  0x8f   : > { %v560_v50 = vrot.slane %v553_v48, %v1390_v41 }
  0x91   : > { %v561_v53 = vcombine.low %v552_v49, %v560_v50 }
  0x93   : > { %v568_v54 = vrot.slane %v561_v53, %v1395_v51 }
  0x95   : > { %v569_v55 = vcombine.high %v568_v54, %v1260_v1 }
  0x97   : > { %571 = vrot.lane.b32.xlu0 %v569_v55, %s1266_s11 }
  0xd9   : > { %v457_v56 = vpop.f32.mrf.mxu0 }
  0xda   : > { %v463_v60 = vmul.f32 0.125, %v457_v56 }
  0xdb   : > { %v1168_v57 = vpop.f32.mrf.mxu0 }
  0xdd   : > { %v460_v58 = vpop.f32.mrf.mxu0 }
  0xdf   : > { %v1169_v59 = vpop.f32.mrf.mxu0 }
 0x109   : > { %v572_v61 = vpop.permute.xlu0 %571 }
 0x10a   : > { %v575_v62 = vsel %vm574_vm3, %v568_v54, %v572_v61 }
 0x10b   : > { %v576_v63 = vadd.f32 %v575_v62, %v463_v60 }
 0x10d   : > { %v579_v0 = vsel %vm578_vm4, %v576_v63, -inf }
 0x10e   : > { %580 = vmax.xlane.f32.xlu1 %v579_v0 }
 0x197   : > { %v581_v10 = vpop.xlane.xlu1 %580 }
 0x198   : > { %v1411_v11 = vmax.f32 %v1408_v6, %v581_v10  ;;  %v884_v10 = vrot.slane %v1430_v18, %v1390_v41 }
 0x19a   : > { %v583_v13 = vsub.f32 %v1408_v6, %v1411_v11  ;;  %661 = vst.msk [vmem:[#allocation2] sm:$0xf] %vm405_vm2, %v1411_v11  ;;  %588 = vperm.xlu0 %1222, %v1411_v11  }
 0x19e   : > { %680 = vrot.lane.b32.xlu0 %v679_v12, %s1268_s12 }
 0x1a2   : > { %670 = vrot.lane.b32.xlu0 %v669_v16, %s1268_s12 }
 0x1a6   : > { %740 = vbcast.lane.b32.xlu0 %v738_v9, 256 }
 0x1aa   : > { %747 = vbcast.lane.b32.xlu0 %v745_v19, 256 }
 0x1ae   : > { %754 = vbcast.lane.b32.xlu0 %v752_v20, 256  ;;  %v594_v20 = vld [vmem:[#allocation3] sm:$0xf] }
 0x1b2   : > { %761 = vbcast.lane.b32.xlu0 %v759_v22, 256 }
 0x215   : > { %v589_v24 = vpop.permute.xlu0 %588 }
 0x216   : > { %v591_v25 = vsub.f32 %v576_v63, %v589_v24 }
 0x218   : > { %v592_v8 = vmul.f32 1.442695, %v591_v25 }
 0x219   : > { %v681_v27 = vpop.permute.xlu0 %680 }
 0x21a   : > { %1224 = vpow2.f32 %v592_v8  ;;  %v686_v37 = vsel %vm416_vm1, %v681_v27, 0 }
 0x21d   : > { %v671_v29 = vpop.permute.xlu0 %670 }
 0x221   : > { %v741_v32 = vpop.permute.xlu0 %740 }
 0x222   : > { %v808_v38 = vadd.f32 %v791_v2, %v741_v32 }
 0x225   : > { %v748_v7 = vpop.permute.xlu0 %747 }
 0x226   : > { %v809_v44 = vadd.f32 %v795_v39, %v748_v7  ;;  %v602_v7 = vld [vmem:[#allocation4] sm:$0xf] }
 0x227   : > { %v1225_v36 = vpop.eup %1224 }
 0x228   : > { %v609_v40 = vpack.c.bf16 %v1225_v36, %v1225_v36  ;;  %v596_v12 = vsel %vm578_vm4, %v1225_v36, 0.0 }
 0x229   : > { %v755_v42 = vpop.permute.xlu0 %754 }
 0x22a   : > { %v810_v43 = vadd.f32 %v799_v34, %v755_v42  ;;  %1173 = vmatmul.mubr.msk.bf16.vlgmr.msra.gmra.mxu1 %vm610_vm6, %v609_v40 }
 0x22b   : > { %1177 = vmatpush3.bf16.xpose.msra.mxu1 %v686_v37  ;;  %1178 = vmatprep.mubr.msk.bf16.mxu1 %vm1261_vm0, %v1260_v1 }
 0x22c   : > { %v812_v45 = vcombine.low %v808_v38, %v810_v43  ;;  %v869_v38 = vld [vmem:[#allocation4 + $0x4] sm:$0xf] }
 0x22d   : > { %v762_v46 = vpop.permute.xlu0 %761 }
 0x22e   : > { %v811_v47 = vadd.f32 %v803_v21, %v762_v46  ;;  %v819_v48 = vrot.slane %v812_v45, %v1390_v41 }
 0x230   : > { %v820_v49 = vcombine.low %v809_v44, %v811_v47 }
 0x232   : > { %v827_v50 = vrot.slane %v820_v49, %v1390_v41  ;;  %1179 = vmatmul.mubr.msk.bf16.vlgmr.msra.gmra.mxu1 %vm416_vm1, %v671_v29  ;;  %v584_v41 = vmul.f32 1.442695, %v583_v13 }
 0x234   : > { %v828_v52 = vcombine.low %v819_v48, %v827_v50  ;;  %1226 = vpow2.f32 %v584_v41 }
 0x236   : > { %v835_v53 = vrot.slane %v828_v52, %v1395_v51 }
 0x238   : > { %v836_v4 = vcombine.high %v835_v53, %v1260_v1 }
 0x23a   : > { %838 = vrot.lane.b32.xlu0 %v836_v4, %s1266_s11 }
 0x241   : > { %v1227_v18 = vpop.eup %1226 }
 0x242   : > { %v595_v22 = vmul.f32 %v1227_v18, %v594_v20 }
 0x2ac   : > { %v839_v58 = vpop.permute.xlu0 %838 }
 0x2ad   : > { %v841_v61 = vsel %vm574_vm3, %v835_v53, %v839_v58 }
 0x2ea   : > { %v1459_v54 = vpop.f32.mrf.mxu1 }
 0x2ec   : > { %v1174_v55 = vpop.f32.mrf.mxu1 }
 0x2ee   : > { %v655_v56 = vpop.f32.mrf.mxu1 }
 0x2f0   : > { %v1175_v57 = vpop.f32.mrf.mxu1 }
 0x2f2   : > { %v722_v59 = vpop.f32.mrf.mxu1 }
 0x2f3   : > { %v728_v60 = vmul.f32 0.125, %v722_v59 }
 0x2f4   : > { %v1180_v62 = vpop.f32.mrf.mxu1 }
 0x2f5   : > { %v842_v63 = vadd.f32 %v841_v61, %v728_v60 }
 0x2f6   : > { %v725_v0 = vpop.f32.mrf.mxu1 }
 0x2f7   : > { %v845_v5 = vsel %vm578_vm4, %v842_v63, -inf }
 0x2f8   : > { %v1181_v51 = vpop.f32.mrf.mxu1  ;;  %846 = vmax.xlane.f32.xlu1 %v845_v5 }
 0x309   : > { %885 = vrot.lane.b32.xlu1 %v884_v10, %s1268_s12 }
 0x32d   : > { %597 = vadd.xlane.f32.xlu1 %v596_v12 }
 0x381   : > { %v847_v16 = vpop.xlane.xlu1 %846 }
 0x382   : > { %v848_v17 = vmax.f32 %v844_v14, %v847_v16 }
 0x384   : > { %v849_v9 = vsub.f32 %v844_v14, %v848_v17  ;;  %935 = vst.msk [vmem:[#allocation2 + $0x4] sm:$0xf] %vm405_vm2, %v848_v17  ;;  %854 = vperm.xlu0 %1222, %v848_v17  }
 0x385   : > { %v886_v19 = vpop.permute.xlu1 %885 }
 0x386   : > { %v891_v15 = vsel %vm614_vm5, %v886_v19, 0  ;;  %v850_v6 = vmul.f32 1.442695, %v849_v9 }
 0x387   : > { %1183 = vmatpush3.bf16.msra.mxu0 %v891_v15 }
 0x3b6   : > { %v598_v23 = vpop.xlane.xlu1 %597 }
 0x3b7   : > { %v599_v24 = vadd.f32 %v598_v23, %v595_v22 }
 0x3b9   : > { %601 = vst.msk [vmem:[#allocation3] sm:$0xf] %vm405_vm2, %v599_v24 }
 0x3c0   : > { %v940_v11 = vld [vmem:[#allocation3] sm:$0xf] }
 0x3ff   : > { %v855_v25 = vpop.permute.xlu0 %854 }
 0x400   : > { %v857_v26 = vsub.f32 %v842_v63, %v855_v25 }
 0x402   : > { %v858_v8 = vmul.f32 1.442695, %v857_v26 }
 0x404   : > { %1228 = vpow2.f32 %v858_v8 }
 0x405   : > { %1230 = vpow2.f32 %v850_v6 }
 0x406   : > { %1232 = vrcp.f32 %v940_v11 }
 0x411   : > { %v1229_v27 = vpop.eup %1228 }
 0x412   : > { %v863_v28 = vsel %vm578_vm4, %v1229_v27, 0.0  ;;  %v876_v29 = vpack.c.bf16 %v1229_v27, %v1229_v27  ;;  %v1231_v13 = vpop.eup %1230 }
 0x413   : > { %864 = vadd.xlane.f32.xlu0 %v863_v28  ;;  %v1233_v30 = vpop.eup %1232  ;;  %v862_v32 = vmul.f32 %v1231_v13, %v861_v31 }
 0x414   : > { %1185 = vmatmul.mubr.msk.bf16.vlgmr.msra.gmra.mxu0 %vm610_vm6, %v876_v29 }
 0x429   : > { %872 = vperm.xlu0 %1222, %v1231_v13  }
 0x42d   : > { %605 = vperm.xlu0 %1222, %v1227_v18  }
 0x431   : > { %944 = vperm.xlu0 %1222, %v1233_v30  }
 0x49c   : > { %v865_v3 = vpop.xlane.xlu0 %864 }
 0x49d   : > { %v866_v33 = vadd.f32 %v865_v3, %v862_v32 }
 0x49f   : > { %867 = vst.msk [vmem:[#allocation3 + $0x4] sm:$0xf] %vm405_vm2, %v866_v33 }
 0x4a4   : > { %v873_v2 = vpop.permute.xlu0 %872 }
 0x4a5   : > { %v875_v39 = vmul.f32 %v873_v2, %v869_v38 }
 0x4a6   : > { %v949_v34 = vld [vmem:[#allocation3 + $0x4] sm:$0xf] }
 0x4a7   : > { %1234 = vrcp.f32 %v949_v34 }
 0x4a8   : > { %v606_v35 = vpop.permute.xlu0 %605 }
 0x4a9   : > { %v608_v36 = vmul.f32 %v606_v35, %v602_v7 }
 0x4ab   : > { %v658_v1 = vadd.f32 %v1459_v54, %v608_v36 }
 0x4ac   : > { %v945_v49 = vpop.permute.xlu0 %944 }
 0x4ad   : > { %660 = vst.msk [vmem:[#allocation4] sm:$0xf] %vm410_vm7, %v658_v1 }
 0x4b4   : > { %v1235_v37 = vpop.eup %1234  ;;  %v939_v48 = vld [vmem:[#allocation4] sm:$0xf] }
 0x4b5   : > { %953 = vperm.xlu1 %1223, %v1235_v37   ;;  %v947_v50 = vmul.f32 %v945_v49, %v939_v48 }
 0x4d4   : > { %v927_v40 = vpop.f32.mrf.mxu0 }
 0x4d5   : > { %v933_v42 = vadd.f32 %v927_v40, %v875_v39 }
 0x4d6   : > { %v1186_v43 = vpop.f32.mrf.mxu0 }
 0x4d7   : > { %934 = vst.msk [vmem:[#allocation4 + $0x4] sm:$0xf] %vm410_vm7, %v933_v42 }
 0x4d8   : > { %v930_v21 = vpop.f32.mrf.mxu0 }
 0x4da   : > { %v1187_v44 = vpop.f32.mrf.mxu0 }
 0x4de   : > { %v948_v46 = vld [vmem:[#allocation4 + $0x4] sm:$0xf] }
 0x530   : > { %v954_v45 = vpop.permute.xlu1 %953 }
 0x531   : > { %v956_v47 = vmul.f32 %v954_v45, %v948_v46 }
 0x533   : > { %958 = vrot.lane.b32.xlu0 %v956_v47, %s1268_s12 }
 0x5a5   : > { %v959_v52 = vpop.permute.xlu0 %958 }
 0x5a6   : > { %v961_v53 = vsel %vm416_vm1, %v947_v50, %v959_v52 }
 0x5a7   : > { %v962_v4 = vpack.c.bf16 %v961_v53, %v961_v53 }
 0x5a9   : > { %963 = vst [vmem:[%s399_s23] sm:$0x3] %v962_v4 }
 0x5aa PF: > { %s15_s20 = sadd.s32 1, %s1258_s20   ;;  %s1504_s18 = smov %s1254_s19 }
 0x5ab   : > { %p12_p5 = scmp.ge.s32.totalorder %s15_s20, 10   ;;  %s1505_s19 = smov %s1507_s21 }
 0x5ad   :  { %14 = sbr.rel (!%p12_p5) target bundleno = 2 (0x2), region = 95 }

// kernel: _lambda_.26
= control target key start
LH: loop header
LB: loop body
LE: loop exit
PB: predicated region body
PF: predicated region fallthrough
CT: control target
= control target key end

     0   :  { %vm141_vm0 = vcmask 261120   ;;  %s268_s1 = inlined_call_operand.vmem [shape: bf16[128,32], index: 1, kind: input, shape index: {}]   ;;  %s269_s0 = inlined_call_operand.vmem [shape: f32[32,128], index: 0, kind: input, shape index: {}]   ;;  %s270_s2 = inlined_call_operand.vmem [shape: f32[1,32], index: 2, kind: input, shape index: {}]   ;;  %s271_s3 = inlined_call_operand.vmem [shape: f32[32,32], index: 3, kind: output, shape index: {}]  }
   0x1   :  { %v189_v0 = vld [vmem:[%s268_s1 + $0x38] sm:$0xff]   ;;  %v190_v1 = vld [vmem:[%s268_s1 + $0x30] sm:$0xff]   ;;  %v191_v2 = vld [vmem:[%s268_s1 + $0x28] sm:$0xff]  }
   0x2   :  { %169 = vmatprep.subr.bf16.mxu0 %v189_v0  ;;  %v192_v3 = vld [vmem:[%s268_s1 + $0x20] sm:$0xff]   ;;  %v16_v5 = vld [vmem:[%s269_s0 + $0x8] sm:$0xff]  ;;  %v193_v7 = vld [vmem:[%s268_s1 + $0x18] sm:$0xff]  }
   0x3   :  { %170 = vmatpush3.bf16.msra.mxu0 %v189_v0  ;;  %v15_v4 = vld [vmem:[%s269_s0] sm:$0xff]  ;;  %v194_v8 = vld [vmem:[%s268_s1 + $0x10] sm:$0xff]   ;;  %v195_v9 = vld [vmem:[%s268_s1 + $0x8] sm:$0xff]  }
   0x4   :  { %171 = vmatprep.subr.bf16.mxu0 %v190_v1  ;;  %v19_v6 = vpack.c.bf16 %v16_v5, %v15_v4  ;;  %v196_v10 = vld [vmem:[%s268_s1] sm:$0xff]   ;;  %v17_v11 = vld [vmem:[%s269_s0 + $0x10] sm:$0xff]  ;;  %v18_v12 = vld [vmem:[%s269_s0 + $0x18] sm:$0xff] }
   0x5   :  { %v20_v13 = vpack.c.bf16 %v18_v12, %v17_v11  ;;  %v150_v14 = vld [vmem:[%s270_s2] ss:$0 sm:$0xff] }
   0x6   :  { %185 = vmatprep.mubr.bf16.mxu0 %v19_v6 }
   0x7   :  { %172 = vmatpush3.bf16.msra.mxu0 %v190_v1 }
   0x8   :  { %173 = vmatprep.subr.bf16.mxu0 %v191_v2 }
   0xb   :  { %174 = vmatpush3.bf16.msra.mxu0 %v191_v2 }
   0xc   :  { %175 = vmatprep.subr.bf16.mxu0 %v192_v3 }
   0xf   :  { %176 = vmatpush3.bf16.msra.mxu0 %v192_v3 }
  0x10   :  { %177 = vmatprep.subr.bf16.mxu0 %v193_v7 }
  0x13   :  { %178 = vmatpush3.bf16.msra.mxu0 %v193_v7 }
  0x14   :  { %179 = vmatprep.subr.bf16.mxu0 %v194_v8 }
  0x17   :  { %180 = vmatpush3.bf16.msra.mxu0 %v194_v8 }
  0x18   :  { %181 = vmatprep.subr.bf16.mxu0 %v195_v9 }
  0x1b   :  { %182 = vmatpush3.bf16.msra.mxu0 %v195_v9 }
  0x1c   :  { %183 = vmatprep.subr.bf16.mxu0 %v196_v10 }
  0x1f   :  { %184 = vmatpush3.bf16.msra.mxu0 %v196_v10 }
  0x22   :  { %186 = vmatmul.mubr.bf16.vlgmr.msra.gmra.mxu0 %v20_v13 }
  0xe2   :  { %v187_v15 = vpop.f32.mrf.mxu0 }
  0xe3   :  { %v135_v16 = vadd.f32 %v187_v15, %v150_v14 }
  0xe4   :  { %v126_v17 = vpop.f32.mrf.mxu0 }
  0xe5   :  { %144 = vst.msk [vmem:[%s271_s3 + $0x10] sm:$0xff] %vm141_vm0, %v135_v16  ;;  %v127_v18 = vadd.f32 %v150_v14, %v126_v17 }
  0xe6   :  { %v188_v19 = vpop.f32.mrf.mxu0 }
  0xe7   :  { %142 = vst.msk [vmem:[%s271_s3] sm:$0xff] %vm141_vm0, %v127_v18  ;;  %v138_v20 = vadd.f32 %v188_v19, %v150_v14 }
  0xe8   :  { %v129_v21 = vpop.f32.mrf.mxu0 }
  0xe9   :  { %145 = vst.msk [vmem:[%s271_s3 + $0x18] sm:$0xff] %vm141_vm0, %v138_v20  ;;  %v130_v22 = vadd.f32 %v150_v14, %v129_v21 }
  0xeb   :  { %143 = vst.msk [vmem:[%s271_s3 + $0x8] sm:$0xff] %vm141_vm0, %v130_v22 }

// kernel: _lambda_.27
= control target key start
LH: loop header
LB: loop body
LE: loop exit
PB: predicated region body
PF: predicated region fallthrough
CT: control target
= control target key end

     0   :  { %vm18_vm0 = vcmask 261120   ;;  %vm110_vm1 = vcmask 257024   ;;  %s199_s0 = inlined_call_operand.vmem [shape: f32[32,32], index: 0, kind: input, shape index: {}]   ;;  %s200_s1 = inlined_call_operand.vmem [shape: f32[1,32], index: 1, kind: input, shape index: {}]   ;;  %s201_s2 = inlined_call_operand.vmem [shape: f32[1,32], index: 2, kind: input, shape index: {}]   ;;  %s202_s3 = inlined_call_operand.vmem [shape: bf16[32,32], index: 3, kind: output, shape index: {}]  }
   0x1   :  { %v14_v0 = vld [vmem:[%s199_s0] sm:$0xff]  ;;  %v16_v1 = vld [vmem:[%s199_s0 + $0x10] sm:$0xff]  ;;  %v15_v2 = vld [vmem:[%s199_s0 + $0x8] sm:$0xff] }
   0x2   :  { %v19_v3 = vsel %vm18_vm0, %v14_v0, 0.0  ;;  %v25_v4 = vsel %vm18_vm0, %v16_v1, 0.0  ;;  %v17_v5 = vld [vmem:[%s199_s0 + $0x18] sm:$0xff]  ;;  %v22_v6 = vsel %vm18_vm0, %v15_v2, 0.0  ;;  %v119_v41 = vld [vmem:[%s200_s1] ss:$0 sm:$0xff] }
   0x3   :  { %20 = vadd.xlane.f32.xlu0 %v19_v3  ;;  %26 = vadd.xlane.f32.xlu1 %v25_v4  ;;  %v28_v7 = vsel %vm18_vm0, %v17_v5, 0.0  ;;  %v120_v43 = vld [vmem:[%s201_s2] ss:$0 sm:$0xff] }
   0x7   :  { %23 = vadd.xlane.f32.xlu0 %v22_v6  ;;  %29 = vadd.xlane.f32.xlu1 %v28_v7 }
  0x8c   :  { %v21_v8 = vpop.xlane.xlu0 %20  ;;  %v27_v9 = vpop.xlane.xlu1 %26 }
  0x8d   :  { %v32_v10 = vmul.f32 0.03125, %v21_v8  ;;  %v34_v11 = vmul.f32 0.03125, %v27_v9 }
  0x8f   :  { %v36_v12 = vsub.f32 %v14_v0, %v32_v10  ;;  %v38_v13 = vsub.f32 %v16_v1, %v34_v11 }
  0x90   :  { %v24_v14 = vpop.xlane.xlu0 %23  ;;  %v30_v15 = vpop.xlane.xlu1 %29 }
  0x91   :  { %v33_v16 = vmul.f32 0.03125, %v24_v14  ;;  %v35_v17 = vmul.f32 0.03125, %v30_v15  ;;  %v40_v18 = vmul.f32 %v36_v12, %v36_v12  ;;  %v42_v19 = vmul.f32 %v38_v13, %v38_v13 }
  0x93   :  { %v37_v20 = vsub.f32 %v15_v2, %v33_v16  ;;  %v39_v21 = vsub.f32 %v17_v5, %v35_v17  ;;  %v44_v22 = vsel %vm18_vm0, %v40_v18, 0.0  ;;  %v50_v23 = vsel %vm18_vm0, %v42_v19, 0.0 }
  0x94   :  { %45 = vadd.xlane.f32.xlu0 %v44_v22 }
  0x95   :  { %v41_v24 = vmul.f32 %v37_v20, %v37_v20  ;;  %v43_v25 = vmul.f32 %v39_v21, %v39_v21 }
  0x97   :  { %v47_v26 = vsel %vm18_vm0, %v41_v24, 0.0  ;;  %v53_v27 = vsel %vm18_vm0, %v43_v25, 0.0 }
  0x98   :  { %51 = vadd.xlane.f32.xlu0 %v50_v23  ;;  %48 = vadd.xlane.f32.xlu1 %v47_v26 }
  0x9c   :  { %54 = vadd.xlane.f32.xlu1 %v53_v27 }
 0x11d   :  { %v46_v28 = vpop.xlane.xlu0 %45 }
 0x11e   :  { %v56_v29 = vmul.f32 0.03125, %v46_v28 }
 0x120   :  { %v60_v30 = vadd.f32 1e-06, %v56_v29 }
 0x121   :  { %v49_v31 = vpop.xlane.xlu1 %48  ;;  %v52_v32 = vpop.xlane.xlu0 %51 }
 0x122   :  { %129 = vrsqrt.f32 %v60_v30  ;;  %v57_v33 = vmul.f32 0.03125, %v49_v31  ;;  %v58_v34 = vmul.f32 0.03125, %v52_v32 }
 0x124   :  { %v61_v35 = vadd.f32 1e-06, %v57_v33  ;;  %v62_v36 = vadd.f32 1e-06, %v58_v34 }
 0x125   :  { %v55_v37 = vpop.xlane.xlu1 %54 }
 0x126   :  { %131 = vrsqrt.f32 %v61_v35  ;;  %v59_v38 = vmul.f32 0.03125, %v55_v37 }
 0x127   :  { %133 = vrsqrt.f32 %v62_v36 }
 0x128   :  { %v63_v39 = vadd.f32 1e-06, %v59_v38 }
 0x12a   :  { %135 = vrsqrt.f32 %v63_v39 }
 0x12f   :  { %v130_v40 = vpop.eup %129 }
 0x130   :  { %v68_v42 = vmul.f32 %v130_v40, %v36_v12 }
 0x132   :  { %v79_v44 = vmul.f32 %v119_v41, %v68_v42 }
 0x133   :  { %v132_v45 = vpop.eup %131 }
 0x134   :  { %v134_v46 = vpop.eup %133  ;;  %v90_v47 = vadd.f32 %v120_v43, %v79_v44  ;;  %v69_v48 = vmul.f32 %v132_v45, %v37_v20 }
 0x135   :  { %v70_v49 = vmul.f32 %v134_v46, %v38_v13 }
 0x136   :  { %v125_v50 = vpack.c.bf16 %v90_v47, %v90_v47  ;;  %v80_v51 = vmul.f32 %v119_v41, %v69_v48 }
 0x137   :  { %v136_v52 = vpop.eup %135  ;;  %v81_v53 = vmul.f32 %v119_v41, %v70_v49 }
 0x138   :  { %111 = vst.msk [vmem:[%s202_s3] sm:$0xf] %vm110_vm1, %v125_v50  ;;  %v91_v54 = vadd.f32 %v120_v43, %v80_v51  ;;  %v71_v55 = vmul.f32 %v136_v52, %v39_v21 }
 0x139   :  { %v92_v56 = vadd.f32 %v120_v43, %v81_v53 }
 0x13a   :  { %v126_v57 = vpack.c.bf16 %v91_v54, %v91_v54  ;;  %v82_v58 = vmul.f32 %v119_v41, %v71_v55 }
 0x13b   :  { %v127_v59 = vpack.c.bf16 %v92_v56, %v92_v56 }
 0x13c   :  { %112 = vst.msk [vmem:[%s202_s3 + $0x4] sm:$0xf] %vm110_vm1, %v126_v57  ;;  %v93_v60 = vadd.f32 %v120_v43, %v82_v58 }
 0x13d   :  { %113 = vst.msk [vmem:[%s202_s3 + $0x8] sm:$0xf] %vm110_vm1, %v127_v59 }
 0x13e   :  { %v128_v61 = vpack.c.bf16 %v93_v60, %v93_v60 }
 0x140   :  { %114 = vst.msk [vmem:[%s202_s3 + $0xc] sm:$0xf] %vm110_vm1, %v128_v61 }

// kernel: _lambda_.23
= control target key start
LH: loop header
LB: loop body
LE: loop exit
PB: predicated region body
PF: predicated region fallthrough
CT: control target
= control target key end

     0   :  { %s303_s1 = inlined_call_operand.vmem [shape: bf16[128,128], index: 1, kind: input, shape index: {}]   ;;  %s304_s0 = inlined_call_operand.vmem [shape: bf16[32,128], index: 0, kind: input, shape index: {}]   ;;  %s305_s2 = inlined_call_operand.vmem [shape: f32[1,128], index: 2, kind: input, shape index: {}]   ;;  %s306_s3 = inlined_call_operand.vmem [shape: f32[32,128], index: 3, kind: input, shape index: {}]   ;;  %s307_s4 = inlined_call_operand.vmem [shape: f32[32,128], index: 4, kind: output, shape index: {}]  }
   0x1   :  { %v211_v0 = vld [vmem:[%s303_s1 + $0x38] sm:$0xff]   ;;  %v212_v1 = vld [vmem:[%s303_s1 + $0x30] sm:$0xff]   ;;  %v213_v2 = vld [vmem:[%s303_s1 + $0x28] sm:$0xff]  }
   0x2   :  { %191 = vmatprep.subr.bf16.mxu0 %v211_v0  ;;  %v214_v3 = vld [vmem:[%s303_s1 + $0x20] sm:$0xff]   ;;  %v215_v5 = vld [vmem:[%s303_s1 + $0x18] sm:$0xff]   ;;  %v216_v6 = vld [vmem:[%s303_s1 + $0x10] sm:$0xff]  }
   0x3   :  { %192 = vmatpush3.bf16.msra.mxu0 %v211_v0  ;;  %v219_v4 = vld [vmem:[%s304_s0] sm:$0xff]   ;;  %v217_v7 = vld [vmem:[%s303_s1 + $0x8] sm:$0xff]   ;;  %v156_v12 = vld [vmem:[%s306_s3 + $0x10] sm:$0xff] }
   0x4   :  { %193 = vmatprep.subr.bf16.mxu0 %v212_v1  ;;  %207 = vmatprep.mubr.bf16.mxu0 %v219_v4  ;;  %v218_v8 = vld [vmem:[%s303_s1] sm:$0xff]   ;;  %v220_v9 = vld [vmem:[%s304_s0 + $0x8] sm:$0xff]   ;;  %v157_v19 = vld [vmem:[%s306_s3 + $0x18] sm:$0xff] }
   0x5   :  { %v170_v10 = vld [vmem:[%s305_s2] ss:$0 sm:$0xff]  ;;  %v155_v23 = vld [vmem:[%s306_s3 + $0x8] sm:$0xff] }
   0x6   :  { %v154_v15 = vld [vmem:[%s306_s3] sm:$0xff] }
   0x7   :  { %194 = vmatpush3.bf16.msra.mxu0 %v212_v1 }
   0x8   :  { %195 = vmatprep.subr.bf16.mxu0 %v213_v2 }
   0xb   :  { %196 = vmatpush3.bf16.msra.mxu0 %v213_v2 }
   0xc   :  { %197 = vmatprep.subr.bf16.mxu0 %v214_v3 }
   0xf   :  { %198 = vmatpush3.bf16.msra.mxu0 %v214_v3 }
  0x10   :  { %199 = vmatprep.subr.bf16.mxu0 %v215_v5 }
  0x13   :  { %200 = vmatpush3.bf16.msra.mxu0 %v215_v5 }
  0x14   :  { %201 = vmatprep.subr.bf16.mxu0 %v216_v6 }
  0x17   :  { %202 = vmatpush3.bf16.msra.mxu0 %v216_v6 }
  0x18   :  { %203 = vmatprep.subr.bf16.mxu0 %v217_v7 }
  0x1b   :  { %204 = vmatpush3.bf16.msra.mxu0 %v217_v7 }
  0x1c   :  { %205 = vmatprep.subr.bf16.mxu0 %v218_v8 }
  0x1f   :  { %206 = vmatpush3.bf16.msra.mxu0 %v218_v8 }
  0x22   :  { %208 = vmatmul.mubr.bf16.vlgmr.msra.gmra.mxu0 %v220_v9 }
  0xe2   :  { %v209_v11 = vpop.f32.mrf.mxu0 }
  0xe3   :  { %v148_v13 = vadd.f32 %v209_v11, %v170_v10 }
  0xe4   :  { %v139_v14 = vpop.f32.mrf.mxu0 }
  0xe5   :  { %v160_v16 = vadd.f32 %v156_v12, %v148_v13  ;;  %v140_v17 = vadd.f32 %v170_v10, %v139_v14 }
  0xe6   :  { %v210_v18 = vpop.f32.mrf.mxu0 }
  0xe7   :  { %164 = vst [vmem:[%s307_s4 + $0x10] sm:$0xff] %v160_v16  ;;  %v158_v20 = vadd.f32 %v154_v15, %v140_v17  ;;  %v151_v21 = vadd.f32 %v210_v18, %v170_v10 }
  0xe8   :  { %v142_v22 = vpop.f32.mrf.mxu0 }
  0xe9   :  { %162 = vst [vmem:[%s307_s4] sm:$0xff] %v158_v20  ;;  %v161_v24 = vadd.f32 %v157_v19, %v151_v21  ;;  %v143_v25 = vadd.f32 %v170_v10, %v142_v22 }
  0xeb   :  { %165 = vst [vmem:[%s307_s4 + $0x18] sm:$0xff] %v161_v24  ;;  %v159_v26 = vadd.f32 %v155_v23, %v143_v25 }
  0xed   :  { %163 = vst [vmem:[%s307_s4 + $0x8] sm:$0xff] %v159_v26 }

// kernel: _lambda_.22
= control target key start
LH: loop header
LB: loop body
LE: loop exit
PB: predicated region body
PF: predicated region fallthrough
CT: control target
= control target key end

     0   :  { %s2376_s18 = smov 0   ;;  %s2378_s19 = smov 0   ;;  %s2798_s0 = inlined_call_operand.vmem [shape: bf16[2,16,384], index: 0, kind: input, shape index: {}, may-alias: {0,1,2}]   ;;  %s2799_s1 = inlined_call_operand.vmem [shape: bf16[2,16,384], index: 1, kind: input, shape index: {}, may-alias: {0,1,2}]   ;;  %s2800_s2 = inlined_call_operand.vmem [shape: bf16[2,16,384], index: 2, kind: input, shape index: {}, may-alias: {0,1,2}]   ;;  %s2801_s3 = inlined_call_operand.vmem [shape: bf16[2,2,16,4], index: 3, kind: input, shape index: {}]   ;;  %s2802_s4 = inlined_call_operand.vmem [shape: bf16[2,2,16,4], index: 4, kind: input, shape index: {}]   ;;  %s2803_s5 = inlined_call_operand.vmem [shape: bf16[2,16,128], index: 5, kind: output, shape index: {}]  }
   0x1   :  { %s2380_s20 = smov 0   ;;  %s2382_s21 = smov 0  }
   0x2   :  { %s2384_s22 = smov 0  }
   0x3 LB: > { %s34_s23 = sadd.s32 1, %s2329_s21  ;;  %p50_p1 = scmp.ne.s32.totalorder %s2321_s19, %s2317_s18  ;;  %s2333_s22 = sphi %s2384_s22, %s15_s22   ;;  %s2329_s21 = sphi %s2382_s21, %s2808_s21   ;;  %s2325_s20 = sphi %s2380_s20, %s2807_s20   ;;  %s2321_s19 = sphi %s2378_s19, %s2806_s19   ;;  %s2317_s18 = sphi %s2376_s18, %s2805_s18  }
   0x4   : > { %p36_p0 = scmp.ge.s32.totalorder %s34_s23, 2  ;;  %p51_p2 = scmp.eq.s32.totalorder %s2333_s22, 0 }
   0x5   : > { %s43_s26 = sadd.s32 1, %s2321_s19  ;;  %p2113_p5 = scmp.ge.s32.totalorder %s2333_s22, 2 }
   0x6   : > { %s2810_s23 = smov (%p36_p0, %s34_s23), 0  ;;  %p2407_p3 = por %p51_p2, %p50_p1 }
   0x7   : > { %s38_s25 = ssub.s32 %s2329_s21, %s2810_s23  ;;  %216 = sbr.rel (%p2113_p5) target bundleno = 30 (0x1e), region = 16 }
   0x8   : > { %p41_p4 = scmp.eq.s32.totalorder %s38_s25, 0 }
   0xa   : > { %s2415_s27 = scalar_select %p41_p4, %s2321_s19, %s43_s26  }
   0xc   : > { %219 = sbr.rel (!%p2407_p3) target bundleno = 18 (0x12), region = 20  ;;  %s221_s28 = sand.u32 (%p2407_p3), 1, %s2321_s19  }
   0xd   : > { %s2209_s29 = smul.u32 (%p2407_p3), 24, %s2329_s21  ;;  %s2114_s30 = sshll.u32 (%p2407_p3), %s221_s28, 3 }
   0xe   : > { %s223_s9 = scalar_lea.vmem (%p2407_p3), [#allocation5], %s2114_s30 }
   0xf   : > { %s229_s8 = scalar_lea.vmem (%p2407_p3), %s2798_s0, %s2209_s29 }
  0x10   : > { %v246_v0 = vld [vmem:[%s229_s8] sm:$0xf] (%p2407_p3)  ;;  %v248_v1 = vld [vmem:[%s229_s8 + $0xc] sm:$0xf] (%p2407_p3) }
  0x11   : > { %247 = vst [vmem:[%s223_s9] sm:$0xf] %v246_v0  ;;  %249 = vst [vmem:[%s223_s9 + $0x4] sm:$0xf] %v248_v1 }
  0x12 PF: > { %277 = sbr.rel (!%p2407_p3) target bundleno = 24 (0x18), region = 61  ;;  %s279_s10 = sand.u32 (%p2407_p3), 1, %s2321_s19  }
  0x13   : > { %s2117_s11 = smul.u32 (%p2407_p3), 24, %s2329_s21  ;;  %s2116_s12 = sshll.u32 (%p2407_p3), %s279_s10, 3 }
  0x14   : > { %s281_s16 = scalar_lea.vmem (%p2407_p3), [#allocation6], %s2116_s12 }
  0x15   : > { %s1980_s15 = scalar_lea.vmem (%p2407_p3), %s2799_s1, %s2117_s11 }
  0x16   : > { %v2118_v2 = vld [vmem:[%s1980_s15 + $0x4] sm:$0xf] (%p2407_p3)  ;;  %v2119_v3 = vld [vmem:[%s1980_s15 + $0x10] sm:$0xf] (%p2407_p3) }
  0x17   : > { %306 = vst [vmem:[%s281_s16] sm:$0xf] %v2118_v2  ;;  %308 = vst [vmem:[%s281_s16 + $0x4] sm:$0xf] %v2119_v3 }
  0x18 PF: > { %336 = sbr.rel (!%p2407_p3) target bundleno = 30 (0x1e), region = 102  ;;  %s338_s17 = sand.u32 (%p2407_p3), 1, %s2321_s19  }
  0x19   : > { %s2121_s25 = smul.u32 (%p2407_p3), 24, %s2329_s21  ;;  %s2120_s26 = sshll.u32 (%p2407_p3), %s338_s17, 3 }
  0x1a   : > { %s340_s6 = scalar_lea.vmem (%p2407_p3), [#allocation7], %s2120_s26 }
  0x1b   : > { %s1988_s30 = scalar_lea.vmem (%p2407_p3), %s2800_s2, %s2121_s25 }
  0x1c   : > { %v2122_v4 = vld [vmem:[%s1988_s30 + $0x8] sm:$0xf] (%p2407_p3)  ;;  %v2123_v5 = vld [vmem:[%s1988_s30 + $0x14] sm:$0xf] (%p2407_p3) }
  0x1d   : > { %365 = vst [vmem:[%s340_s6] sm:$0xf] %v2122_v4  ;;  %367 = vst [vmem:[%s340_s6 + $0x4] sm:$0xf] %v2123_v5 }
  0x1e PF: > { %p2124_p6 = scmp.ge.s32.totalorder %s2333_s22, 1  ;;  %p420_p7 = scmp.lt.s32.totalorder %s2333_s22, 3 }
  0x20   : > { %p421_p8 = pnand %p2124_p6, %p420_p7 }
  0x21   : > { %p502_p9 = scmp.lt.s32.totalorder (!%p421_p8), %s2325_s20, 1  ;;  %s427_s24 = sand.u32 (!%p421_p8), 1, %s2317_s18  }
  0x22   : > { %424 = sbr.rel (%p421_p8) target bundleno = 1517 (0x5ed), region = 151  ;;  %s2458_s18 = sshll.u32 (!%p421_p8), %s427_s24, 3 }
  0x23   : > { %s429_s11 = scalar_lea.vmem (!%p421_p8), [#allocation5], %s2458_s18  ;;  %s436_s12 = scalar_lea.vmem (!%p421_p8), [#allocation6], %s2458_s18 }
  0x24   : > { %s2340_s16 = smov (!%p421_p8), 4   ;;  %s2341_s17 = smov (!%p421_p8), 8  }
  0x25   : > { %s2342_s25 = smov (!%p421_p8), 12   ;;  %s2345_s26 = smov (!%p421_p8), 64  }
  0x26   : > { %s443_s28 = scalar_lea.vmem (!%p421_p8), [#allocation7], %s2458_s18 }
  0x27   : > { %v624_v6 = vlaneseq  ;;  %v2335_v7 = vmov 0.0   ;;  %vm545_vm0 = vcmask 523264   ;;  %s2812_s20 = smov (!%p502_p9, %s2325_s20), 1  ;;  %vm2336_vm1 = vmmov 0   ;;  %v2487_v15 = vld [vmem:[%s436_s12] sm:$0xff]   ;;  %v2510_v27 = vld [vmem:[%s429_s11] sm:$0xff]  }
  0x28   : > { %2185 = vmatprep.subr.bf16.mxu0 %v2335_v7  ;;  %2191 = vmatprep.subr.bf16.mxu1 %v2335_v7  ;;  %546 = vst.msk [vmem:[#allocation4] sm:$0xff] %vm545_vm0, %v2335_v7  ;;  %547 = vst.msk [vmem:[#allocation4 + $0x8] sm:$0xff] %vm545_vm0, %v2335_v7  ;;  %s2149_s7 = sshll.u32 %s2812_s20, 4  ;;  %v571_v22 = vsel %vm545_vm0, %v2487_v15, 0  ;;  %v2337_v39 = vmov 1966171168  }
  0x29   : > { %v2448_v8 = vshrl.u32 %v624_v6, 7  ;;  %548 = vst.msk [vmem:[#allocation4 + $0x10] sm:$0xff] %vm545_vm0, %v2335_v7  ;;  %549 = vst.msk [vmem:[#allocation4 + $0x18] sm:$0xff] %vm545_vm0, %v2335_v7  ;;  %2187 = vmatprep.mubr.msk.bf16.mxu0 %vm2336_vm1, %v2335_v7  ;;  %2193 = vmatprep.mubr.msk.bf16.mxu1 %vm2336_vm1, %v2335_v7  ;;  %s2470_s10 = scalar_lea.vmem %s2801_s3, %s2149_s7  ;;  %v740_v40 = vunpack.c.l.s4 %v2337_v39  ;;  %s2531_s15 = scalar_lea.vmem %s2802_s4, %s2149_s7  ;;  %v2338_v59 = vmov 1983009808   ;;  %vm536_vm2 = vcmask 7168  }
  0x2a   : > { %v2155_v11 = vld [vmem:[%s2470_s10] sm:$0xff]   ;;  %2186 = vmatpush3.bf16.xpose.msra.mxu0 %v571_v22  ;;  %v934_v60 = vunpack.c.l.s4 %v2338_v59  ;;  %v2339_v22 = vmov 1934713408   ;;  %541 = vst.msk [vmem:[#allocation3] sm:$0xff] %vm536_vm2, %v2335_v7  ;;  %542 = vst.msk [vmem:[#allocation3 + $0x8] sm:$0xff] %vm536_vm2, %v2335_v7  ;;  %vm1092_vm3 = vcmask 31744  }
  0x2b   : > { %v2473_v9 = vsub.s32 0, %v2448_v8  ;;  %v2476_v10 = vsub.s32 2, %v2448_v8  ;;  %v2481_v12 = vsub.s32 3, %v2448_v8  ;;  %v2156_v13 = vunpack.c.l.bf16 %v2155_v11  ;;  %2203 = vmatprep.subr.bf16.mxu0 %v2335_v7  ;;  %v2159_v42 = vld [vmem:[%s2531_s15] sm:$0xff]   ;;  %543 = vst.msk [vmem:[#allocation3 + $0x10] sm:$0xff] %vm536_vm2, %v2335_v7  ;;  %544 = vst.msk [vmem:[#allocation3 + $0x18] sm:$0xff] %vm536_vm2, %v2335_v7 }
  0x2c   : > { %v2485_v14 = vsub.s32 1, %v2448_v8  ;;  %v2492_v18 = vsub.s32 5, %v2448_v8  ;;  %v2497_v21 = vsub.s32 4, %v2448_v8  ;;  %v2505_v25 = vsub.s32 7, %v2448_v8  ;;  %s2151_s29 = sshll.u32 %s2812_s20, 3 }
  0x2d   : > { %v641_v16 = vrot.slane %v2156_v13, %v2476_v10  ;;  %v627_v17 = vrot.slane %v2156_v13, %v2473_v9  ;;  %v648_v19 = vrot.slane %v2156_v13, %v2481_v12  ;;  %v2508_v26 = vsub.s32 6, %v2448_v8  ;;  %s529_s24 = scalar_lea.vmem %s2803_s5, %s2151_s29 }
  0x2e   : > { %v634_v20 = vrot.slane %v2156_v13, %v2485_v14  ;;  %v662_v23 = vrot.slane %v2156_v13, %v2492_v18  ;;  %v655_v24 = vrot.slane %v2156_v13, %v2497_v21  ;;  %v676_v28 = vrot.slane %v2156_v13, %v2505_v25 }
  0x2f   : > { %643 = vbcast.lane.b32.xlu1 %v641_v16, 256  ;;  %629 = vbcast.lane.b32.xlu0 %v627_v17, 256  ;;  %v669_v29 = vrot.slane %v2156_v13, %v2508_v26  ;;  %v2157_v30 = vunpack.c.h.bf16 %v2155_v11  ;;  %v741_v41 = vunpack.c.0.s8 %v740_v40  ;;  %v2160_v44 = vunpack.c.l.bf16 %v2159_v42 }
  0x30   : > { %v2161_v52 = vunpack.c.h.bf16 %v2159_v42  ;;  %v935_v13 = vunpack.c.0.s8 %v934_v60  ;;  %vm1095_vm4 = vcmask 64512   ;;  %vm1098_vm5 = vcmask 97280  }
  0x31   : > { %2188 = vmatmul.mubr.msk.bf16.vlgmr.msra.gmra.mxu0 %vm545_vm0, %v2510_v27  ;;  %v690_v31 = vrot.slane %v2157_v30, %v2485_v14  ;;  %v683_v32 = vrot.slane %v2157_v30, %v2473_v9  ;;  %v704_v33 = vrot.slane %v2157_v30, %v2481_v12  ;;  %v697_v34 = vrot.slane %v2157_v30, %v2476_v10 }
  0x32   : > { %2205 = vmatprep.mubr.msk.bf16.mxu0 %vm2336_vm1, %v2335_v7  ;;  %v718_v35 = vrot.slane %v2157_v30, %v2492_v18  ;;  %v711_v36 = vrot.slane %v2157_v30, %v2497_v21  ;;  %v732_v37 = vrot.slane %v2157_v30, %v2505_v25  ;;  %v725_v38 = vrot.slane %v2157_v30, %v2508_v26 }
  0x33   : > { %650 = vbcast.lane.b32.xlu1 %v648_v19, 256  ;;  %636 = vbcast.lane.b32.xlu0 %v634_v20, 256  ;;  %v2535_v43 = vsub.s32 %v741_v41, %v2448_v8  ;;  %v738_v47 = vcombine.high %v2160_v44, %v2160_v44  ;;  %v787_v17 = vcombine.high %v2161_v52, %v2161_v52  ;;  %vm1105_vm6 = vcmask 130048  }
  0x35   : > { %v745_v45 = vrot.slane %v2160_v44, %v2535_v43  ;;  %v752_v50 = vrot.slane %v738_v47, %v2535_v43  ;;  %v794_v61 = vrot.slane %v2161_v52, %v2535_v43 }
  0x37   : > { %664 = vbcast.lane.b32.xlu1 %v662_v23, 256  ;;  %657 = vbcast.lane.b32.xlu0 %v655_v24, 256  ;;  %v753_v46 = vcombine.high %v745_v45, %v745_v45  ;;  %v761_v49 = vrot.slane %v745_v45, %v2535_v43  ;;  %v754_v54 = vcombine.high %v752_v50, %v752_v50  ;;  %v967_v23 = vunpack.c.l.s4 %v2339_v22 }
  0x38   : > { %v768_v1 = vrot.slane %v752_v50, %v2535_v43  ;;  %v802_v16 = vcombine.high %v794_v61, %v794_v61 }
  0x39   : > { %v775_v48 = vrot.slane %v753_v46, %v2535_v43  ;;  %v783_v53 = vcombine.high %v761_v49, %v761_v49  ;;  %v839_v63 = vrot.slane %v761_v49, %v2473_v9  ;;  %v782_v0 = vrot.slane %v754_v54, %v2535_v43 }
  0x3a   : > { %v784_v11 = vcombine.high %v768_v1, %v768_v1  ;;  %v968_v39 = vunpack.c.0.s8 %v967_v23 }
  0x3b   : > { %678 = vbcast.lane.b32.xlu1 %v676_v28, 256  ;;  %671 = vbcast.lane.b32.xlu0 %v669_v29, 256  ;;  %v785_v51 = vcombine.high %v775_v48, %v775_v48  ;;  %v843_v58 = vrot.slane %v775_v48, %v2473_v9  ;;  %v847_v62 = vrot.slane %v783_v53, %v2473_v9 }
  0x3c   : > { %v786_v6 = vcombine.high %v782_v0, %v782_v0  ;;  %v859_v30 = vrot.slane %v782_v0, %v2473_v9  ;;  %v2561_v54 = vsub.s32 %v968_v39, %v2448_v8 }
  0x3d   : > { %v851_v57 = vrot.slane %v785_v51, %v2473_v9 }
  0x3f   : > { %692 = vbcast.lane.b32.xlu1 %v690_v31, 256  ;;  %685 = vbcast.lane.b32.xlu0 %v683_v32, 256  ;;  %v855_v31 = vrot.slane %v768_v1, %v2473_v9  ;;  %v867_v32 = vrot.slane %v786_v6, %v2473_v9 }
  0x43   : > { %706 = vbcast.lane.b32.xlu1 %v704_v33, 256  ;;  %699 = vbcast.lane.b32.xlu0 %v697_v34, 256  ;;  %v863_v33 = vrot.slane %v784_v11, %v2473_v9  ;;  %v2553_v34 = vsub.s32 %v935_v13, %v2448_v8 }
  0x47   : > { %720 = vbcast.lane.b32.xlu1 %v718_v35, 256  ;;  %713 = vbcast.lane.b32.xlu0 %v711_v36, 256  ;;  %v824_v35 = vrot.slane %v802_v16, %v2535_v43  ;;  %v810_v36 = vrot.slane %v794_v61, %v2535_v43 }
  0x49   : > { %v834_v44 = vcombine.high %v824_v35, %v824_v35  ;;  %v832_v45 = vcombine.high %v810_v36, %v810_v36 }
  0x4b   : > { %734 = vbcast.lane.b32.xlu1 %v732_v37, 256  ;;  %727 = vbcast.lane.b32.xlu0 %v725_v38, 256  ;;  %v801_v37 = vrot.slane %v787_v17, %v2535_v43  ;;  %v883_v61 = vrot.slane %v834_v44, %v2473_v9 }
  0x4d   : > { %v803_v50 = vcombine.high %v801_v37, %v801_v37  ;;  %v817_v8 = vrot.slane %v801_v37, %v2535_v43 }
  0x4f   : > { %v831_v0 = vrot.slane %v803_v50, %v2535_v43  ;;  %v833_v11 = vcombine.high %v817_v8, %v817_v8 }
  0x51   : > { %v835_v6 = vcombine.high %v831_v0, %v831_v0  ;;  %v895_v37 = vrot.slane %v833_v11, %v2473_v9 }
  0xa1   : > { %v644_v55 = vpop.permute.xlu1 %643  ;;  %v630_v56 = vpop.permute.xlu0 %629 }
  0xa2   : > { %v918_v19 = vadd.f32 %v847_v62, %v644_v55  ;;  %v916_v20 = vadd.f32 %v839_v63, %v630_v56  ;;  %v875_v62 = vrot.slane %v824_v35, %v2473_v9  ;;  %v871_v63 = vrot.slane %v810_v36, %v2473_v9 }
  0xa3   : > { %v891_v35 = vrot.slane %v831_v0, %v2473_v9  ;;  %v899_v36 = vrot.slane %v835_v6, %v2473_v9 }
  0xa4   : > { %v932_v38 = vcombine.low %v916_v20, %v918_v19 }
  0xa5   : > { %v651_v2 = vpop.permute.xlu1 %650  ;;  %v637_v3 = vpop.permute.xlu0 %636 }
  0xa6   : > { %v919_v4 = vadd.f32 %v851_v57, %v651_v2  ;;  %v917_v5 = vadd.f32 %v843_v58, %v637_v3  ;;  %v939_v51 = vrot.slane %v932_v38, %v2553_v34  ;;  %v879_v57 = vrot.slane %v832_v45, %v2473_v9 }
  0xa8   : > { %v940_v24 = vcombine.low %v917_v5, %v919_v4 }
  0xa9   : > { %v665_v28 = vpop.permute.xlu1 %664  ;;  %v658_v29 = vpop.permute.xlu0 %657 }
  0xaa   : > { %v947_v40 = vrot.slane %v940_v24, %v2553_v34  ;;  %v921_v46 = vadd.f32 %v859_v30, %v665_v28  ;;  %v920_v47 = vadd.f32 %v855_v31, %v658_v29  ;;  %v887_v31 = vrot.slane %v817_v8, %v2473_v9 }
  0xab   : > { %v2343_v8 = vmov -inf  }
  0xac   : > { %v964_v58 = vcombine.low %v939_v51, %v947_v40  ;;  %v965_v3 = vcombine.high %v939_v51, %v947_v40  ;;  %537 = vst.msk [vmem:[#allocation2] sm:$0xff] %vm536_vm2, %v2343_v8  ;;  %538 = vst.msk [vmem:[#allocation2 + $0x8] sm:$0xff] %vm536_vm2, %v2343_v8 }
  0xad   : > { %v679_v41 = vpop.permute.xlu1 %678  ;;  %v672_v42 = vpop.permute.xlu0 %671  ;;  %539 = vst.msk [vmem:[#allocation2 + $0x10] sm:$0xff] %vm536_vm2, %v2343_v8  ;;  %540 = vst.msk [vmem:[#allocation2 + $0x18] sm:$0xff] %vm536_vm2, %v2343_v8 }
  0xae   : > { %v923_v48 = vadd.f32 %v867_v32, %v679_v41  ;;  %v922_v49 = vadd.f32 %v863_v33, %v672_v42  ;;  %v2572_v17 = vrot.slane %v964_v58, %v2561_v54  ;;  %v979_v38 = vrot.slane %v965_v3, %v2561_v54 }
  0xb0   : > { %v956_v52 = vcombine.low %v921_v46, %v923_v48  ;;  %v948_v53 = vcombine.low %v920_v47, %v922_v49 }
  0xb1   : > { %v693_v55 = vpop.permute.xlu1 %692  ;;  %v686_v56 = vpop.permute.xlu0 %685 }
  0xb2   : > { %v963_v59 = vrot.slane %v956_v52, %v2553_v34  ;;  %v955_v60 = vrot.slane %v948_v53, %v2553_v34  ;;  %v925_v20 = vadd.f32 %v875_v62, %v693_v55  ;;  %v924_v22 = vadd.f32 %v871_v63, %v686_v56 }
  0xb4   : > { %v980_v1 = vcombine.low %v955_v60, %v963_v59  ;;  %v981_v2 = vcombine.high %v955_v60, %v963_v59 }
  0xb5   : > { %v707_v4 = vpop.permute.xlu1 %706  ;;  %v700_v5 = vpop.permute.xlu0 %699 }
  0xb6   : > { %v927_v13 = vadd.f32 %v883_v61, %v707_v4  ;;  %v926_v16 = vadd.f32 %v879_v57, %v700_v5  ;;  %v2575_v19 = vrot.slane %v980_v1, %v2561_v54  ;;  %v995_v24 = vrot.slane %v981_v2, %v2561_v54 }
  0xb8   : > { %v997_v23 = vcombine.high %v2572_v17, %v2575_v19  ;;  %v1008_v28 = vcombine.low %v925_v20, %v927_v13  ;;  %v1000_v29 = vcombine.low %v924_v22, %v926_v16  ;;  %v996_v33 = vcombine.low %v2572_v17, %v2575_v19 }
  0xb9   : > { %v721_v30 = vpop.permute.xlu1 %720  ;;  %v714_v32 = vpop.permute.xlu0 %713  ;;  %v998_v39 = vcombine.low %v979_v38, %v995_v24  ;;  %v999_v51 = vcombine.high %v979_v38, %v995_v24 }
  0xba   : > { %1070 = vrot.lane.b32.xlu0 %v997_v23, %s2340_s16  ;;  %v1015_v40 = vrot.slane %v1008_v28, %v2553_v34  ;;  %v1007_v41 = vrot.slane %v1000_v29, %v2553_v34  ;;  %v929_v45 = vadd.f32 %v891_v35, %v721_v30  ;;  %v928_v46 = vadd.f32 %v887_v31, %v714_v32 }
  0xbc   : > { %v1032_v52 = vcombine.low %v1007_v41, %v1015_v40  ;;  %v1033_v58 = vcombine.high %v1007_v41, %v1015_v40  ;;  %v2175_v40 = vld [vmem:[%s2470_s10 + $0x8] sm:$0xff]  }
  0xbd   : > { %v735_v42 = vpop.permute.xlu1 %734  ;;  %v728_v44 = vpop.permute.xlu0 %727 }
  0xbe   : > { %v931_v47 = vadd.f32 %v899_v36, %v735_v42  ;;  %v930_v48 = vadd.f32 %v895_v37, %v728_v44  ;;  %1078 = vrot.lane.b32.xlu0 %v998_v39, %s2341_s17  ;;  %v1040_v59 = vrot.slane %v1032_v52, %v2561_v54  ;;  %v1047_v0 = vrot.slane %v1033_v58, %v2561_v54  ;;  %v2627_v39 = vld [vmem:[#allocation2] sm:$0xff] }
  0xbf   : > { %v2344_v36 = vmov 0   ;;  %v2164_v44 = vunpack.c.l.bf16 %v2175_v40 }
  0xc0   : > { %v1024_v49 = vcombine.low %v929_v45, %v931_v47  ;;  %v1016_v50 = vcombine.low %v928_v46, %v930_v48  ;;  %2261 = vset.pattern.permute.xlu0 %v2344_v36  ;;  %2262 = vset.pattern.permute.xlu1 %v2344_v36  ;;  %v2165_v48 = vunpack.c.h.bf16 %v2175_v40 }
  0xc1   : > { %v1316_v46 = vrot.slane %v2164_v44, %v2497_v21  ;;  %v1330_v47 = vrot.slane %v2164_v44, %v2508_v26  ;;  %v1288_v58 = vrot.slane %v2164_v44, %v2473_v9 }
  0xc2   : > { %v1031_v53 = vrot.slane %v1024_v49, %v2553_v34  ;;  %v1023_v55 = vrot.slane %v1016_v50, %v2553_v34  ;;  %1086 = vrot.lane.b32.xlu0 %v999_v51, %s2342_s25  ;;  %v1344_v49 = vrot.slane %v2165_v48, %v2473_v9  ;;  %v2641_v50 = vld [vmem:[#allocation2 + $0x8] sm:$0xff]  ;;  %v1358_v51 = vrot.slane %v2165_v48, %v2476_v10 }
  0xc4   : > { %v1048_v56 = vcombine.low %v1023_v55, %v1031_v53  ;;  %v1049_v57 = vcombine.high %v1023_v55, %v1031_v53 }
  0xc6   : > { %v1056_v60 = vrot.slane %v1048_v56, %v2561_v54  ;;  %v1063_v62 = vrot.slane %v1049_v57, %v2561_v54  ;;  %v1372_v56 = vrot.slane %v2165_v48, %v2497_v21  ;;  %v1386_v57 = vrot.slane %v2165_v48, %v2508_v26 }
  0xc7   : > { %v1309_v21 = vrot.slane %v2164_v44, %v2481_v12  ;;  %v1323_v26 = vrot.slane %v2164_v44, %v2492_v18 }
  0xc8   : > { %v1065_v61 = vcombine.high %v1040_v59, %v1056_v60  ;;  %v1064_v63 = vcombine.low %v1040_v59, %v1056_v60  ;;  %v1066_v1 = vcombine.low %v1047_v0, %v1063_v62  ;;  %v1067_v2 = vcombine.high %v1047_v0, %v1063_v62  ;;  %v2661_v60 = vld [vmem:[%s443_s28] sm:$0xff]  }
  0xc9   : > { %v1295_v59 = vrot.slane %v2164_v44, %v2485_v14  ;;  %2192 = vmatpush3.bf16.msra.mxu1 %v2661_v60  ;;  %v1365_v62 = vrot.slane %v2165_v48, %v2481_v12 }
  0xca   : > { %1072 = vrot.lane.b32.xlu1 %v1065_v61, %s2340_s16  ;;  %2197 = vmatprep.subr.bf16.mxu1 %v2335_v7  ;;  %v1351_v61 = vrot.slane %v2165_v48, %v2485_v14 }
  0xce   : > { %1080 = vrot.lane.b32.xlu1 %v1066_v1, %s2341_s17 }
  0xd2   : > { %1088 = vrot.lane.b32.xlu1 %v1067_v2, %s2342_s25 }
  0xf1   : > { %v607_v3 = vpop.f32.mrf.mxu0 }
  0xf2   : > { %v614_v16 = vmul.f32 0.125, %v607_v3  ;;  %v2176_v3 = vld [vmem:[%s2531_s15 + $0x8] sm:$0xff]  }
  0xf3   : > { %v2189_v4 = vpop.f32.mrf.mxu0  ;;  %v2168_v14 = vunpack.c.l.bf16 %v2176_v3 }
  0xf5   : > { %v610_v5 = vpop.f32.mrf.mxu0  ;;  %v1406_v12 = vrot.slane %v2168_v14, %v2535_v43 }
  0xf6   : > { %v615_v31 = vmul.f32 0.125, %v610_v5 }
  0xf7   : > { %v2190_v6 = vpop.f32.mrf.mxu0 }
 0x12c   : > { %v1071_v11 = vpop.permute.xlu0 %1070 }
 0x12d   : > { %v1093_v17 = vsel %vm1092_vm3, %v996_v33, %v1071_v11  ;;  %v1414_v11 = vcombine.high %v1406_v12, %v1406_v12 }
 0x130   : > { %v1079_v13 = vpop.permute.xlu0 %1078 }
 0x131   : > { %v1096_v19 = vsel %vm1095_vm4, %v1093_v17, %v1079_v13  ;;  %v1399_v13 = vcombine.high %v2168_v14, %v2168_v14 }
 0x134   : > { %v1087_v20 = vpop.permute.xlu0 %1086 }
 0x135   : > { %v1099_v22 = vsel %vm1098_vm5, %v1096_v19, %v1087_v20  ;;  %v1436_v19 = vrot.slane %v1414_v11, %v2535_v43  ;;  %v1413_v20 = vrot.slane %v1399_v13, %v2535_v43 }
 0x136   : > { %v2616_v23 = vadd.f32 %v1099_v22, %v614_v16 }
 0x138   : > { %v1106_v24 = vsel %vm1105_vm6, %v2616_v23, -inf }
 0x139   : > { %1107 = vmax.xlane.f32.xlu0 %v1106_v24 }
 0x13c   : > { %v1073_v28 = vpop.permute.xlu1 %1072 }
 0x13d   : > { %v1094_v30 = vsel %vm1092_vm3, %v1064_v63, %v1073_v28  ;;  %v1379_v63 = vrot.slane %v2165_v48, %v2492_v18 }
 0x140   : > { %v1081_v29 = vpop.permute.xlu1 %1080 }
 0x141   : > { %v1097_v32 = vsel %vm1095_vm4, %v1094_v30, %v1081_v29  ;;  %v1446_v30 = vcombine.high %v1436_v19, %v1436_v19 }
 0x144   : > { %v1089_v33 = vpop.permute.xlu1 %1088 }
 0x145   : > { %v1100_v35 = vsel %vm1098_vm5, %v1097_v32, %v1089_v33 }
 0x146   : > { %v2623_v37 = vadd.f32 %v1100_v35, %v615_v31  ;;  %v1415_v31 = vcombine.high %v1413_v20, %v1413_v20  ;;  %v1504_v35 = vrot.slane %v1436_v19, %v2473_v9 }
 0x148   : > { %v1109_v38 = vsel %vm1105_vm6, %v2623_v37, -inf }
 0x149   : > { %1110 = vmax.xlane.f32.xlu1 %v1109_v38 }
 0x1c2   : > { %v1108_v41 = vpop.xlane.xlu0 %1107 }
 0x1c3   : > { %v2631_v42 = vmax.f32 %v2627_v39, %v1108_v41  ;;  %v2169_v41 = vunpack.c.h.bf16 %v2176_v3 }
 0x1c5   : > { %v1114_v45 = vsub.f32 %v2627_v39, %v2631_v42  ;;  %1220 = vst.msk [vmem:[#allocation2] sm:$0xff] %vm536_vm2, %v2631_v42  ;;  %1122 = vperm.xlu0 %2261, %v2631_v42  }
 0x1c9   : > { %1318 = vbcast.lane.b32.xlu0 %v1316_v46, 256  ;;  %v1512_v46 = vrot.slane %v1446_v30, %v2473_v9 }
 0x1cd   : > { %1332 = vbcast.lane.b32.xlu0 %v1330_v47, 256  ;;  %v1443_v47 = vrot.slane %v1415_v31, %v2535_v43 }
 0x1d1   : > { %1346 = vbcast.lane.b32.xlu0 %v1344_v49, 256 }
 0x1d2   : > { %v1111_v52 = vpop.xlane.xlu1 %1110 }
 0x1d3   : > { %v2645_v53 = vmax.f32 %v2641_v50, %v1111_v52 }
 0x1d5   : > { %v1115_v55 = vsub.f32 %v2641_v50, %v2645_v53  ;;  %1221 = vst.msk [vmem:[#allocation2 + $0x8] sm:$0xff] %vm536_vm2, %v2645_v53  ;;  %1127 = vperm.xlu1 %2262, %v2645_v53   ;;  %1360 = vbcast.lane.b32.xlu0 %v1358_v51, 256 }
 0x1d9   : > { %1224 = vrot.lane.b32.xlu1 %v2487_v15, %s2345_s26  ;;  %1374 = vbcast.lane.b32.xlu0 %v1372_v56, 256  ;;  %v1302_v15 = vrot.slane %v2164_v44, %v2476_v10  ;;  %v1393_v10 = vrot.slane %v2165_v48, %v2505_v25  ;;  %v1455_v48 = vrot.slane %v2169_v41, %v2535_v43 }
 0x1dd   : > { %1222 = vrot.lane.b32.xlu1 %v2510_v27, %s2345_s26  ;;  %1388 = vbcast.lane.b32.xlu0 %v1386_v57, 256  ;;  %v1337_v27 = vrot.slane %v2164_v44, %v2505_v25  ;;  %v1422_v25 = vrot.slane %v1406_v12, %v2535_v43 }
 0x1df   : > { %v1444_v22 = vcombine.high %v1422_v25, %v1422_v25  ;;  %v1500_v33 = vrot.slane %v1422_v25, %v2473_v9 }
 0x1e1   : > { %1290 = vbcast.lane.b32.xlu1 %v1288_v58, 256  ;;  %v1508_v36 = vrot.slane %v1444_v22, %v2473_v9 }
 0x1e5   : > { %1297 = vbcast.lane.b32.xlu1 %v1295_v59, 256 }
 0x1e9   : > { %1304 = vbcast.lane.b32.xlu1 %v1302_v15, 256  ;;  %v1448_v15 = vcombine.high %v2169_v41, %v2169_v41 }
 0x1ed   : > { %1311 = vbcast.lane.b32.xlu1 %v1309_v21, 256 }
 0x1f1   : > { %1325 = vbcast.lane.b32.xlu1 %v1323_v26, 256  ;;  %v1447_v26 = vcombine.high %v1443_v47, %v1443_v47 }
 0x1f3   : > { %v1528_v3 = vrot.slane %v1447_v26, %v2473_v9 }
 0x1f5   : > { %1339 = vbcast.lane.b32.xlu1 %v1337_v27, 256  ;;  %v1463_v27 = vcombine.high %v1455_v48, %v1455_v48 }
 0x1f9   : > { %1353 = vbcast.lane.b32.xlu1 %v1351_v61, 256  ;;  %v1520_v61 = vrot.slane %v1443_v47, %v2473_v9 }
 0x1fd   : > { %1367 = vbcast.lane.b32.xlu1 %v1365_v62, 256  ;;  %v1471_v62 = vrot.slane %v1455_v48, %v2535_v43 }
 0x201   : > { %1381 = vbcast.lane.b32.xlu1 %v1379_v63, 256 }
 0x205   : > { %1395 = vbcast.lane.b32.xlu1 %v1393_v10, 256 }
 0x240   : > { %v1123_v0 = vpop.permute.xlu0 %1122 }
 0x241   : > { %v1130_v8 = vsub.f32 %v2616_v23, %v1123_v0  ;;  %v1429_v23 = vrot.slane %v1413_v20, %v2535_v43  ;;  %v1532_v20 = vrot.slane %v1471_v62, %v2473_v9 }
 0x243   : > { %v1132_v1 = vmul.f32 1.442695, %v1130_v8  ;;  %v1445_v40 = vcombine.high %v1429_v23, %v1429_v23  ;;  %v1516_v49 = vrot.slane %v1429_v23, %v2473_v9 }
 0x244   : > { %v1319_v16 = vpop.permute.xlu0 %1318 }
 0x245   : > { %2271 = vpow2.f32 %v1132_v1  ;;  %v1524_v58 = vrot.slane %v1445_v40, %v2473_v9  ;;  %v1581_v0 = vadd.f32 %v1516_v49, %v1319_v16 }
 0x248   : > { %v1333_v28 = vpop.permute.xlu0 %1332 }
 0x249   : > { %v1583_v8 = vadd.f32 %v1524_v58, %v1333_v28 }
 0x24b   : > { %v1609_v13 = vcombine.low %v1581_v0, %v1583_v8 }
 0x24c   : > { %v1347_v51 = vpop.permute.xlu0 %1346 }
 0x24d   : > { %v1616_v28 = vrot.slane %v1609_v13, %v2553_v34  ;;  %v1585_v40 = vadd.f32 %v1532_v20, %v1347_v51 }
 0x250   : > { %v1128_v2 = vpop.permute.xlu1 %1127  ;;  %v1361_v1 = vpop.permute.xlu0 %1360 }
 0x251   : > { %v1131_v4 = vsub.f32 %v2623_v37, %v1128_v2  ;;  %v1462_v2 = vrot.slane %v1448_v15, %v2535_v43 }
 0x252   : > { %v2681_v29 = vpop.eup %2271 }
 0x253   : > { %v1134_v5 = vmul.f32 1.442695, %v1131_v4  ;;  %v1485_v4 = vrot.slane %v1463_v27, %v2535_v43  ;;  %v1478_v14 = vrot.slane %v1462_v2, %v2535_v43  ;;  %v1464_v16 = vcombine.high %v1462_v2, %v1462_v2 }
 0x254   : > { %v1225_v6 = vpop.permute.xlu1 %1224  ;;  %v1375_v22 = vpop.permute.xlu0 %1374 }
 0x255   : > { %2273 = vpow2.f32 %v1134_v5  ;;  %v1230_v37 = vsel %vm545_vm0, %v1225_v6, 0  ;;  %v1493_v5 = vcombine.high %v1471_v62, %v1471_v62  ;;  %v1495_v19 = vcombine.high %v1485_v4, %v1485_v4 }
 0x256   : > { %v1494_v23 = vcombine.high %v1478_v14, %v1478_v14  ;;  %v1536_v31 = vrot.slane %v1485_v4, %v2473_v9 }
 0x258   : > { %v1223_v18 = vpop.permute.xlu1 %1222 }
 0x25c   : > { %v1291_v17 = vpop.permute.xlu1 %1290 }
 0x25d   : > { %v1577_v52 = vadd.f32 %v1500_v33, %v1291_v17 }
 0x260   : > { %v1298_v24 = vpop.permute.xlu1 %1297 }
 0x261   : > { %v1578_v56 = vadd.f32 %v1504_v35, %v1298_v24  ;;  %v1492_v35 = vrot.slane %v1464_v16, %v2535_v43 }
 0x262   : > { %v2683_v32 = vpop.eup %2273 }
 0x263   : > { %v1165_v38 = vpack.c.bf16 %v2683_v32, %v2681_v29  ;;  %v1496_v58 = vcombine.high %v1492_v35, %v1492_v35  ;;  %v1552_v26 = vrot.slane %v1492_v35, %v2473_v9 }
 0x264   : > { %v1305_v44 = vpop.permute.xlu1 %1304 }
 0x265   : > { %2194 = vmatmul.mubr.msk.bf16.vlgmr.msra.gmra.mxu1 %vm1105_vm6, %v1165_v38  ;;  %v1579_v57 = vadd.f32 %v1508_v36, %v1305_v44  ;;  %v1544_v38 = vrot.slane %v1495_v19, %v2473_v9  ;;  %v1548_v44 = vrot.slane %v1478_v14, %v2473_v9  ;;  %v1560_v8 = vrot.slane %v1496_v58, %v2473_v9 }
 0x266   : > { %2198 = vmatpush3.bf16.xpose.msra.mxu1 %v1230_v37  ;;  %2199 = vmatprep.mubr.msk.bf16.mxu1 %vm2336_vm1, %v2335_v7 }
 0x267   : > { %v1593_v63 = vcombine.low %v1577_v52, %v1579_v57  ;;  %v1389_v57 = vpop.permute.xlu0 %1388 }
 0x268   : > { %v1312_v59 = vpop.permute.xlu1 %1311 }
 0x269   : > { %v1580_v21 = vadd.f32 %v1512_v46, %v1312_v59  ;;  %v1600_v6 = vrot.slane %v1593_v63, %v2553_v34  ;;  %v1556_v46 = vrot.slane %v1494_v23, %v2473_v9 }
 0x26b   : > { %v1601_v10 = vcombine.low %v1578_v56, %v1580_v21  ;;  %v1591_v63 = vadd.f32 %v1556_v46, %v1389_v57 }
 0x26c   : > { %v1326_v7 = vpop.permute.xlu1 %1325 }
 0x26d   : > { %2200 = vmatmul.mubr.msk.bf16.vlgmr.msra.gmra.mxu1 %vm545_vm0, %v1223_v18  ;;  %v1608_v12 = vrot.slane %v1601_v10, %v2553_v34  ;;  %v1582_v11 = vadd.f32 %v1520_v61, %v1326_v7  ;;  %v1540_v18 = vrot.slane %v1493_v5, %v2473_v9  ;;  %v1589_v61 = vadd.f32 %v1548_v44, %v1375_v22 }
 0x26f   : > { %v1625_v24 = vcombine.low %v1600_v6, %v1608_v12  ;;  %v1626_v36 = vcombine.high %v1600_v6, %v1608_v12  ;;  %v1587_v41 = vadd.f32 %v1540_v18, %v1361_v1  ;;  %v1677_v4 = vcombine.low %v1589_v61, %v1591_v63  ;;  %v1762_v61 = vld [vmem:[#allocation2 + $0x10] sm:$0xff] }
 0x270   : > { %v1340_v25 = vpop.permute.xlu1 %1339 }
 0x271   : > { %v1584_v17 = vadd.f32 %v1528_v3, %v1340_v25  ;;  %v1633_v52 = vrot.slane %v1625_v24, %v2561_v54  ;;  %v1640_v15 = vrot.slane %v1626_v36, %v2561_v54  ;;  %v1661_v21 = vcombine.low %v1585_v40, %v1587_v41 }
 0x273   : > { %v1617_v30 = vcombine.low %v1582_v11, %v1584_v17  ;;  %v1668_v1 = vrot.slane %v1661_v21, %v2553_v34  ;;  %v1684_v11 = vrot.slane %v1677_v4, %v2553_v34 }
 0x274   : > { %v1354_v33 = vpop.permute.xlu1 %1353 }
 0x275   : > { %v1624_v37 = vrot.slane %v1617_v30, %v2553_v34  ;;  %v1586_v49 = vadd.f32 %v1536_v31, %v1354_v33 }
 0x277   : > { %v1641_v47 = vcombine.low %v1616_v28, %v1624_v37  ;;  %v1642_v48 = vcombine.high %v1616_v28, %v1624_v37 }
 0x278   : > { %v1368_v56 = vpop.permute.xlu1 %1367 }
 0x279   : > { %v1588_v43 = vadd.f32 %v1544_v38, %v1368_v56  ;;  %v1649_v59 = vrot.slane %v1641_v47, %v2561_v54  ;;  %v1656_v51 = vrot.slane %v1642_v48, %v2561_v54 }
 0x27b   : > { %v1669_v27 = vcombine.low %v1586_v49, %v1588_v43  ;;  %v1658_v62 = vcombine.high %v1633_v52, %v1649_v59  ;;  %v1657_v0 = vcombine.low %v1633_v52, %v1649_v59  ;;  %v1659_v7 = vcombine.low %v1640_v15, %v1656_v51 }
 0x27c   : > { %v1382_v10 = vpop.permute.xlu1 %1381  ;;  %v1660_v6 = vcombine.high %v1640_v15, %v1656_v51 }
 0x27d   : > { %1731 = vrot.lane.b32.xlu0 %v1658_v62, %s2340_s16  ;;  %v1676_v2 = vrot.slane %v1669_v27, %v2553_v34  ;;  %v1590_v3 = vadd.f32 %v1552_v26, %v1382_v10  ;;  %v1763_v10 = vld [vmem:[#allocation2 + $0x18] sm:$0xff] }
 0x27f   : > { %v1693_v12 = vcombine.low %v1668_v1, %v1676_v2  ;;  %v1694_v25 = vcombine.high %v1668_v1, %v1676_v2 }
 0x280   : > { %v1396_v5 = vpop.permute.xlu1 %1395 }
 0x281   : > { %v1592_v14 = vadd.f32 %v1560_v8, %v1396_v5  ;;  %1739 = vrot.lane.b32.xlu0 %v1659_v7, %s2341_s17  ;;  %v1701_v19 = vrot.slane %v1693_v12, %v2561_v54  ;;  %v1708_v18 = vrot.slane %v1694_v25, %v2561_v54 }
 0x283   : > { %v1685_v13 = vcombine.low %v1590_v3, %v1592_v14 }
 0x285   : > { %v1692_v16 = vrot.slane %v1685_v13, %v2553_v34  ;;  %1747 = vrot.lane.b32.xlu0 %v1660_v6, %s2342_s25 }
 0x287   : > { %v1709_v9 = vcombine.low %v1684_v11, %v1692_v16  ;;  %v1710_v17 = vcombine.high %v1684_v11, %v1692_v16 }
 0x289   : > { %v1717_v20 = vrot.slane %v1709_v9, %v2561_v54  ;;  %v1724_v22 = vrot.slane %v1710_v17, %v2561_v54  ;;  %v1143_v9 = vsel %vm1105_vm6, %v2683_v32, 0.0  ;;  %v1118_v32 = vmul.f32 1.442695, %v1115_v55  ;;  %v1136_v55 = vld [vmem:[#allocation3] sm:$0xff] }
 0x28b   : > { %v1726_v23 = vcombine.high %v1701_v19, %v1717_v20  ;;  %v1725_v24 = vcombine.low %v1701_v19, %v1717_v20  ;;  %v1727_v28 = vcombine.low %v1708_v18, %v1724_v22  ;;  %v1728_v34 = vcombine.high %v1708_v18, %v1724_v22 }
 0x28c   : > { %v1140_v19 = vsel %vm1105_vm6, %v2681_v29, 0.0 }
 0x28d   : > { %1733 = vrot.lane.b32.xlu1 %v1726_v23, %s2340_s16  ;;  %v1116_v23 = vmul.f32 1.442695, %v1114_v45 }
 0x291   : > { %1741 = vrot.lane.b32.xlu1 %v1727_v28, %s2341_s17 }
 0x295   : > { %1749 = vrot.lane.b32.xlu1 %v1728_v34, %s2342_s25 }
 0x2ef   : > { %v1732_v30 = vpop.permute.xlu0 %1731 }
 0x2f0   : > { %v1753_v41 = vsel %vm1092_vm3, %v1657_v0, %v1732_v30  ;;  %v1796_v30 = vld [vmem:[#allocation3 + $0x18] sm:$0xff] }
 0x2f3   : > { %v1740_v35 = vpop.permute.xlu0 %1739 }
 0x2f4   : > { %v1755_v46 = vsel %vm1095_vm4, %v1753_v41, %v1740_v35 }
 0x2f7   : > { %v1748_v40 = vpop.permute.xlu0 %1747 }
 0x2f8   : > { %v1757_v48 = vsel %vm1098_vm5, %v1755_v46, %v1748_v40 }
 0x2ff   : > { %v1734_v31 = vpop.permute.xlu1 %1733 }
 0x300   : > { %v1754_v57 = vsel %vm1092_vm3, %v1725_v24, %v1734_v31  ;;  %v1795_v24 = vld [vmem:[#allocation3 + $0x10] sm:$0xff]  ;;  %v1137_v31 = vld [vmem:[#allocation3 + $0x8] sm:$0xff] }
 0x303   : > { %v1742_v38 = vpop.permute.xlu1 %1741 }
 0x304   : > { %v1756_v43 = vsel %vm1095_vm4, %v1754_v57, %v1742_v38 }
 0x307   : > { %v1750_v52 = vpop.permute.xlu1 %1749 }
 0x308   : > { %v1758_v51 = vsel %vm1098_vm5, %v1756_v43, %v1750_v52 }
 0x325   : > { %v2737_v33 = vpop.f32.mrf.mxu1 }
 0x327   : > { %v2195_v36 = vpop.f32.mrf.mxu1 }
 0x329   : > { %v2739_v37 = vpop.f32.mrf.mxu1 }
 0x32b   : > { %v2196_v54 = vpop.f32.mrf.mxu1 }
 0x32d   : > { %v1266_v44 = vpop.f32.mrf.mxu1 }
 0x32e   : > { %v1273_v47 = vmul.f32 0.125, %v1266_v44 }
 0x32f   : > { %v2201_v49 = vpop.f32.mrf.mxu1 }
 0x330   : > { %v1759_v56 = vadd.f32 %v1757_v48, %v1273_v47 }
 0x331   : > { %v1269_v58 = vpop.f32.mrf.mxu1 }
 0x332   : > { %v1274_v59 = vmul.f32 0.125, %v1269_v58  ;;  %v1764_v15 = vsel %vm1105_vm6, %v1759_v56, -inf  ;;  %v1810_v58 = vld [vmem:[#allocation4 + $0x10] sm:$0xff] }
 0x333   : > { %v2202_v21 = vpop.f32.mrf.mxu1  ;;  %1765 = vmax.xlane.f32.xlu0 %v1764_v15  ;;  %v1811_v15 = vld [vmem:[#allocation4 + $0x18] sm:$0xff] }
 0x334   : > { %v1760_v26 = vadd.f32 %v1758_v51, %v1274_v59 }
 0x336   : > { %v1767_v27 = vsel %vm1105_vm6, %v1760_v26, -inf }
 0x337   : > { %1768 = vmax.xlane.f32.xlu1 %v1767_v27 }
 0x3bc   : > { %v1766_v62 = vpop.xlane.xlu0 %1765 }
 0x3bd   : > { %v1770_v63 = vmax.f32 %v1762_v61, %v1766_v62 }
 0x3bf   : > { %v1772_v0 = vsub.f32 %v1762_v61, %v1770_v63  ;;  %1876 = vst.msk [vmem:[#allocation2 + $0x10] sm:$0xff] %vm536_vm2, %v1770_v63  ;;  %1780 = vperm.xlu0 %2261, %v1770_v63  }
 0x3c0   : > { %v1769_v8 = vpop.xlane.xlu1 %1768 }
 0x3c1   : > { %v1771_v7 = vmax.f32 %v1763_v10, %v1769_v8  ;;  %v1774_v20 = vmul.f32 1.442695, %v1772_v0  ;;  %v1151_v8 = vld [vmem:[#allocation4] sm:$0xff] }
 0x3c3   : > { %v1773_v1 = vsub.f32 %v1763_v10, %v1771_v7  ;;  %1877 = vst.msk [vmem:[#allocation2 + $0x18] sm:$0xff] %vm536_vm2, %v1771_v7  ;;  %1785 = vperm.xlu1 %2262, %v1771_v7   ;;  %1825 = vrot.lane.b32.xlu0 %v2661_v60, %s2345_s26 }
 0x3c5   : > { %v1776_v16 = vmul.f32 1.442695, %v1773_v1 }
 0x43a   : > { %v1781_v2 = vpop.permute.xlu0 %1780 }
 0x43b   : > { %v1788_v3 = vsub.f32 %v1759_v56, %v1781_v2 }
 0x43d   : > { %v1790_v4 = vmul.f32 1.442695, %v1788_v3 }
 0x43e   : > { %v1786_v5 = vpop.permute.xlu1 %1785  ;;  %v1826_v14 = vpop.permute.xlu0 %1825 }
 0x43f   : > { %2275 = vpow2.f32 %v1790_v4  ;;  %v1789_v6 = vsub.f32 %v1760_v26, %v1786_v5  ;;  %2204 = vmatpush3.bf16.msra.mxu0 %v1826_v14 }
 0x441   : > { %v1792_v12 = vmul.f32 1.442695, %v1789_v6  ;;  %v1152_v6 = vld [vmem:[#allocation4 + $0x8] sm:$0xff] }
 0x443   : > { %2277 = vpow2.f32 %v1792_v12 }
 0x444   : > { %2279 = vpow2.f32 %v1776_v16 }
 0x445   : > { %2281 = vpow2.f32 %v1774_v20 }
 0x446   : > { %2283 = vpow2.f32 %v1118_v32 }
 0x447   : > { %2285 = vpow2.f32 %v1116_v23 }
 0x44c   : > { %v2276_v11 = vpop.eup %2275 }
 0x44d   : > { %v1799_v13 = vsel %vm1105_vm6, %v2276_v11, 0.0 }
 0x44e   : > { %1800 = vadd.xlane.f32.xlu1 %v1799_v13 }
 0x450   : > { %v2278_v25 = vpop.eup %2277 }
 0x451   : > { %v1802_v60 = vsel %vm1105_vm6, %v2278_v25, 0.0  ;;  %v1824_v17 = vpack.c.bf16 %v2278_v25, %v2276_v11  ;;  %v2280_v18 = vpop.eup %2279 }
 0x452   : > { %1144 = vadd.xlane.f32.xlu1 %v1143_v9  ;;  %1803 = vadd.xlane.f32.xlu0 %v1802_v60  ;;  %v2282_v22 = vpop.eup %2281  ;;  %v1798_v36 = vmul.f32 %v2280_v18, %v1796_v30 }
 0x453   : > { %2206 = vmatmul.mubr.msk.bf16.vlgmr.msra.gmra.mxu0 %vm1105_vm6, %v1824_v17  ;;  %v1797_v28 = vmul.f32 %v2282_v22, %v1795_v24  ;;  %v2284_v29 = vpop.eup %2283 }
 0x454   : > { %v1139_v38 = vmul.f32 %v2284_v29, %v1137_v31  ;;  %v2286_v54 = vpop.eup %2285 }
 0x455   : > { %v1138_v42 = vmul.f32 %v2286_v54, %v1136_v55 }
 0x456   : > { %1141 = vadd.xlane.f32.xlu0 %v1140_v19 }
 0x463   : > { %1819 = vperm.xlu1 %2262, %v2280_v18  }
 0x46c   : > { %1814 = vperm.xlu0 %2261, %v2282_v22  }
 0x4d7   : > { %v1801_v34 = vpop.xlane.xlu1 %1800 }
 0x4d8   : > { %v1805_v35 = vadd.f32 %v1801_v34, %v1797_v28 }
 0x4da   : > { %1807 = vst.msk [vmem:[#allocation3 + $0x10] sm:$0xff] %vm536_vm2, %v1805_v35 }
 0x4db   : > { %v1804_v50 = vpop.xlane.xlu0 %1803  ;;  %v1145_v53 = vpop.xlane.xlu1 %1144 }
 0x4dc   : > { %v1806_v40 = vadd.f32 %v1804_v50, %v1798_v36  ;;  %v1147_v39 = vadd.f32 %v1145_v53, %v1139_v38 }
 0x4de   : > { %1808 = vst.msk [vmem:[#allocation3 + $0x18] sm:$0xff] %vm536_vm2, %v1806_v40  ;;  %1150 = vst.msk [vmem:[#allocation3 + $0x8] sm:$0xff] %vm536_vm2, %v1147_v39 }
 0x4df   : > { %v1142_v45 = vpop.xlane.xlu0 %1141  ;;  %v1820_v51 = vpop.permute.xlu1 %1819 }
 0x4e0   : > { %v1146_v41 = vadd.f32 %v1142_v45, %v1138_v42  ;;  %v1823_v61 = vmul.f32 %v1820_v51, %v1811_v15 }
 0x4e1   : > { %v1901_v44 = vld [vmem:[#allocation3 + $0x10] sm:$0xff] }
 0x4e2   : > { %1149 = vst.msk [vmem:[#allocation3] sm:$0xff] %vm536_vm2, %v1146_v41  ;;  %2287 = vrcp.f32 %v1901_v44 }
 0x4e5   : > { %v1902_v46 = vld [vmem:[#allocation3 + $0x18] sm:$0xff]  ;;  %v1884_v48 = vld [vmem:[#allocation3 + $0x8] sm:$0xff] }
 0x4e6   : > { %2289 = vrcp.f32 %v1902_v46 }
 0x4e7   : > { %v1815_v43 = vpop.permute.xlu0 %1814 }
 0x4e8   : > { %v1822_v59 = vmul.f32 %v1815_v43, %v1810_v58 }
 0x4e9   : > { %v1883_v47 = vld [vmem:[#allocation3] sm:$0xff] }
 0x4ea   : > { %2291 = vrcp.f32 %v1883_v47 }
 0x4eb   : > { %2293 = vrcp.f32 %v1884_v48 }
 0x4ef   : > { %v2288_v49 = vpop.eup %2287 }
 0x4f0   : > { %1907 = vperm.xlu1 %2262, %v2288_v49  }
 0x4f3   : > { %v2290_v52 = vpop.eup %2289 }
 0x4f4   : > { %1155 = vperm.xlu1 %2262, %v2286_v54   ;;  %1912 = vperm.xlu0 %2261, %v2290_v52  }
 0x4f7   : > { %v2292_v56 = vpop.eup %2291 }
 0x4f8   : > { %1889 = vperm.xlu1 %2262, %v2292_v56   ;;  %1160 = vperm.xlu0 %2261, %v2284_v29   ;;  %v2294_v57 = vpop.eup %2293 }
 0x4fc   : > { %1894 = vperm.xlu0 %2261, %v2294_v57  }
 0x513   : > { %v1865_v21 = vpop.f32.mrf.mxu0 }
 0x514   : > { %v1872_v26 = vadd.f32 %v1865_v21, %v1822_v59 }
 0x515   : > { %v2207_v27 = vpop.f32.mrf.mxu0 }
 0x516   : > { %1874 = vst.msk [vmem:[#allocation4 + $0x10] sm:$0xff] %vm545_vm0, %v1872_v26 }
 0x517   : > { %v1868_v62 = vpop.f32.mrf.mxu0 }
 0x518   : > { %v1873_v63 = vadd.f32 %v1868_v62, %v1823_v61 }
 0x519   : > { %v2208_v10 = vpop.f32.mrf.mxu0 }
 0x51a   : > { %1875 = vst.msk [vmem:[#allocation4 + $0x18] sm:$0xff] %vm545_vm0, %v1873_v63 }
 0x51d   : > { %v1899_v7 = vld [vmem:[#allocation4 + $0x10] sm:$0xff] }
 0x521   : > { %v1900_v3 = vld [vmem:[#allocation4 + $0x18] sm:$0xff] }
 0x56b   : > { %v1908_v0 = vpop.permute.xlu1 %1907 }
 0x56c   : > { %v1915_v4 = vmul.f32 %v1908_v0, %v1899_v7 }
 0x56f   : > { %v1156_v1 = vpop.permute.xlu1 %1155  ;;  %v1913_v2 = vpop.permute.xlu0 %1912 }
 0x570   : > { %v1163_v5 = vmul.f32 %v1156_v1, %v1151_v8  ;;  %v1916_v14 = vmul.f32 %v1913_v2, %v1900_v3 }
 0x572   : > { %v1216_v12 = vadd.f32 %v2737_v33, %v1163_v5  ;;  %v2263_v11 = vpack.i.bf16 %v1916_v14, %v1915_v4 }
 0x573   : > { %v1161_v13 = vpop.permute.xlu0 %1160  ;;  %v1890_v9 = vpop.permute.xlu1 %1889 }
 0x574   : > { %1218 = vst.msk [vmem:[#allocation4] sm:$0xff] %vm545_vm0, %v1216_v12  ;;  %v1164_v25 = vmul.f32 %v1161_v13, %v1152_v6  ;;  %2264 = vrot.lane.b32.xlu1 %v2263_v11, %s2345_s26 }
 0x576   : > { %v1217_v16 = vadd.f32 %v2739_v37, %v1164_v25 }
 0x577   : > { %v1895_v19 = vpop.permute.xlu0 %1894 }
 0x578   : > { %1219 = vst.msk [vmem:[#allocation4 + $0x8] sm:$0xff] %vm545_vm0, %v1217_v16 }
 0x57b   : > { %v1881_v60 = vld [vmem:[#allocation4] sm:$0xff] }
 0x57c   : > { %v1897_v18 = vmul.f32 %v1890_v9, %v1881_v60 }
 0x57f   : > { %v1882_v17 = vld [vmem:[#allocation4 + $0x8] sm:$0xff] }
 0x580   : > { %v1898_v22 = vmul.f32 %v1895_v19, %v1882_v17 }
 0x5e6   : > { %v2265_v20 = vpop.permute.xlu1 %2264 }
 0x5e7   : > { %v2267_v33 = vunpack.i.h.bf16 %v2265_v20  ;;  %v2266_v32 = vunpack.i.l.bf16 %v2265_v20 }
 0x5e9   : > { %v1926_v23 = vsel %vm545_vm0, %v1898_v22, %v2267_v33  ;;  %v1925_v37 = vsel %vm545_vm0, %v1897_v18, %v2266_v32 }
 0x5ea   : > { %v2173_v24 = vpack.c.bf16 %v1926_v23, %v1925_v37 }
 0x5ec   : > { %2174 = vst [vmem:[%s529_s24] sm:$0xff] %v2173_v24  }
 0x5ed PF: > { %s15_s22 = sadd.s32 1, %s2333_s22   ;;  %s2805_s18 = smov %s2321_s19 }
 0x5ee   : > { %p12_p10 = scmp.ge.s32.totalorder %s15_s22, 4   ;;  %s2806_s19 = smov %s2415_s27 }
 0x5ef   : > { %s2807_s20 = smov %s2329_s21  ;;  %s2808_s21 = smov %s2810_s23 }
 0x5f0   :  { %14 = sbr.rel (!%p12_p10) target bundleno = 3 (0x3), region = 233 }

// kernel: _lambda_.29
= control target key start
LH: loop header
LB: loop body
LE: loop exit
PB: predicated region body
PF: predicated region fallthrough
CT: control target
= control target key end

     0   :  { %vm19_vm0 = vcmask 261120   ;;  %s206_s0 = inlined_call_operand.vmem [shape: f32[32,32], index: 0, kind: input, shape index: {}]   ;;  %s207_s1 = inlined_call_operand.vmem [shape: f32[1,32], index: 1, kind: input, shape index: {}]   ;;  %s208_s2 = inlined_call_operand.vmem [shape: f32[1,32], index: 2, kind: input, shape index: {}]   ;;  %s209_s3 = inlined_call_operand.hbm [shape: f32[32,32], index: 3, kind: output, shape index: {}]  }
   0x1   :  { %v15_v0 = vld [vmem:[%s206_s0] sm:$0xff]  ;;  %v17_v1 = vld [vmem:[%s206_s0 + $0x10] sm:$0xff]  ;;  %v16_v2 = vld [vmem:[%s206_s0 + $0x8] sm:$0xff] }
   0x2   :  { %v20_v3 = vsel %vm19_vm0, %v15_v0, 0.0  ;;  %v26_v4 = vsel %vm19_vm0, %v17_v1, 0.0  ;;  %v18_v5 = vld [vmem:[%s206_s0 + $0x18] sm:$0xff] }
   0x3   :  { %8 = vsyncpa [#allocation3], 0  ;;  %21 = vadd.xlane.f32.xlu0 %v20_v3  ;;  %27 = vadd.xlane.f32.xlu1 %v26_v4  ;;  %v23_v6 = vsel %vm19_vm0, %v16_v2, 0.0  ;;  %v29_v7 = vsel %vm19_vm0, %v18_v5, 0.0  ;;  %v115_v41 = vld [vmem:[%s207_s1] ss:$0 sm:$0xff] }
   0x4   :  { %v116_v43 = vld [vmem:[%s208_s2] ss:$0 sm:$0xff]  ;;  %s150_s1 = smov [#allocation2]  }
   0x5   :  { %s104_s23 = sshll.u32 %s150_s1, 4  ;;  %s105_s23 = int_to_ptr.vmem [resolvable:$true] %s104_s23 }
   0x6   :  { %s128_s2 = scalar_lea.vmem %s105_s23, 512  ;;  %p133_p1 = scmp.lt.s32.totalorder %s105_s23, %s105_s23 }
   0x7   :  { %24 = vadd.xlane.f32.xlu0 %v23_v6  ;;  %30 = vadd.xlane.f32.xlu1 %v29_v7  ;;  %p129_p0 = scmp.ne.s32.totalorder %s105_s23, %s128_s2  ;;  %p134_p2 = scmp.lt.s32.totalorder %s128_s2, %s128_s2 }
   0x9   :  { %p135_p3 = por %p134_p2, %p133_p1 }
   0xb   :  { %p136_p4 = pnand %p135_p3, %p129_p0 }
  0x8c   :  { %v22_v8 = vpop.xlane.xlu0 %21  ;;  %v28_v9 = vpop.xlane.xlu1 %27 }
  0x8d   :  { %v33_v10 = vmul.f32 0.03125, %v22_v8  ;;  %v35_v11 = vmul.f32 0.03125, %v28_v9 }
  0x8f   :  { %v37_v12 = vsub.f32 %v15_v0, %v33_v10  ;;  %v39_v13 = vsub.f32 %v17_v1, %v35_v11 }
  0x90   :  { %v25_v14 = vpop.xlane.xlu0 %24  ;;  %v31_v15 = vpop.xlane.xlu1 %30 }
  0x91   :  { %v34_v16 = vmul.f32 0.03125, %v25_v14  ;;  %v36_v17 = vmul.f32 0.03125, %v31_v15  ;;  %v41_v18 = vmul.f32 %v37_v12, %v37_v12  ;;  %v43_v19 = vmul.f32 %v39_v13, %v39_v13 }
  0x93   :  { %v38_v20 = vsub.f32 %v16_v2, %v34_v16  ;;  %v40_v21 = vsub.f32 %v18_v5, %v36_v17  ;;  %v45_v22 = vsel %vm19_vm0, %v41_v18, 0.0  ;;  %v51_v23 = vsel %vm19_vm0, %v43_v19, 0.0 }
  0x94   :  { %46 = vadd.xlane.f32.xlu0 %v45_v22 }
  0x95   :  { %v42_v24 = vmul.f32 %v38_v20, %v38_v20  ;;  %v44_v25 = vmul.f32 %v40_v21, %v40_v21 }
  0x97   :  { %v48_v26 = vsel %vm19_vm0, %v42_v24, 0.0  ;;  %v54_v27 = vsel %vm19_vm0, %v44_v25, 0.0 }
  0x98   :  { %52 = vadd.xlane.f32.xlu0 %v51_v23  ;;  %49 = vadd.xlane.f32.xlu1 %v48_v26 }
  0x9c   :  { %55 = vadd.xlane.f32.xlu1 %v54_v27 }
 0x11d   :  { %v47_v28 = vpop.xlane.xlu0 %46 }
 0x11e   :  { %v57_v29 = vmul.f32 0.03125, %v47_v28 }
 0x120   :  { %v61_v30 = vadd.f32 1e-06, %v57_v29 }
 0x121   :  { %v50_v31 = vpop.xlane.xlu1 %49  ;;  %v53_v32 = vpop.xlane.xlu0 %52 }
 0x122   :  { %120 = vrsqrt.f32 %v61_v30  ;;  %v58_v33 = vmul.f32 0.03125, %v50_v31  ;;  %v59_v34 = vmul.f32 0.03125, %v53_v32 }
 0x124   :  { %v62_v35 = vadd.f32 1e-06, %v58_v33  ;;  %v63_v36 = vadd.f32 1e-06, %v59_v34 }
 0x125   :  { %v56_v37 = vpop.xlane.xlu1 %55 }
 0x126   :  { %122 = vrsqrt.f32 %v62_v35  ;;  %v60_v38 = vmul.f32 0.03125, %v56_v37 }
 0x127   :  { %124 = vrsqrt.f32 %v63_v36 }
 0x128   :  { %v64_v39 = vadd.f32 1e-06, %v60_v38 }
 0x12a   :  { %126 = vrsqrt.f32 %v64_v39 }
 0x12f   :  { %v121_v40 = vpop.eup %120 }
 0x130   :  { %v69_v42 = vmul.f32 %v121_v40, %v37_v12 }
 0x132   :  { %v80_v44 = vmul.f32 %v115_v41, %v69_v42 }
 0x133   :  { %v123_v45 = vpop.eup %122 }
 0x134   :  { %v125_v46 = vpop.eup %124  ;;  %v70_v47 = vmul.f32 %v123_v45, %v38_v20  ;;  %v91_v48 = vadd.f32 %v116_v43, %v80_v44 }
 0x135   :  { %v71_v49 = vmul.f32 %v125_v46, %v39_v13 }
 0x136   :  { %v81_v50 = vmul.f32 %v115_v41, %v70_v47  ;;  %95 = vst.msk [vmem:[#allocation2] sm:$0xff] %vm19_vm0, %v91_v48 }
 0x137   :  { %v127_v51 = vpop.eup %126  ;;  %v82_v52 = vmul.f32 %v115_v41, %v71_v49 }
 0x138   :  { %v72_v53 = vmul.f32 %v127_v51, %v40_v21  ;;  %v92_v54 = vadd.f32 %v116_v43, %v81_v50 }
 0x139   :  { %v93_v55 = vadd.f32 %v116_v43, %v82_v52 }
 0x13a   :  { %v83_v56 = vmul.f32 %v115_v41, %v72_v53  ;;  %96 = vst.msk [vmem:[#allocation2 + $0x8] sm:$0xff] %vm19_vm0, %v92_v54 }
 0x13b   :  { %97 = vst.msk [vmem:[#allocation2 + $0x10] sm:$0xff] %vm19_vm0, %v93_v55 }
 0x13c   :  { %v94_v57 = vadd.f32 %v116_v43, %v83_v56 }
 0x13e   :  { %98 = vst.msk [vmem:[#allocation2 + $0x18] sm:$0xff] %vm19_vm0, %v94_v57 }
 0x13f   :  { %139 = shalt.err (!%p136_p4)
}
 0x140   :  { %s151_s24 = smov 128   ;;  %s152_s25 = smov 8  }
 0x141   :  { %110 = dma.vmem_to_hbm [thread:$0]  %s105_s23, 512, %s209_s3, [#allocation3], %s151_s24, %s151_s24, %s152_s25  }
 0x142   :  { %148 = dma.done.wait [#allocation3], 512  }
 0x143   :  { %149 = vsyncadd [#allocation3], 4294966784 }
 0x144   :  { %114 = vsyncpa [#allocation3], 1 }

// kernel: _lambda_.28
= control target key start
LH: loop header
LB: loop body
LE: loop exit
PB: predicated region body
PF: predicated region fallthrough
CT: control target
= control target key end

     0   :  { %s1321_s9 = smov 0   ;;  %s1622_s0 = inlined_call_operand.vmem [shape: bf16[2,6,6,32], index: 0, kind: input, shape index: {}]   ;;  %s1623_s1 = inlined_call_operand.vmem [shape: bf16[3,3,32,32], index: 1, kind: input, shape index: {}]   ;;  %s1624_s2 = inlined_call_operand.vmem [shape: f32[2,4,4,32], index: 2, kind: output, shape index: {}]  }
   0x1 LB: > { %s1085_s10 = sadd.s32 4294967295, %s1301_s9   ;;  %p1089_p0 = scmp.ge.s32.totalorder %s1301_s9, 1  ;;  %s1301_s9 = sphi %s1321_s9, %s12_s9  }
   0x2   : > { %p112_p1 = scmp.lt.s32.totalorder %s1301_s9, 3 }
   0x4   : > { %p113_p2 = pnand %p1089_p0, %p112_p1 }
   0x5   : > { %p134_p3 = scmp.lt.s32.totalorder (!%p113_p2), %s1085_s10, 1 }
   0x6   : > { %116 = sbr.rel (%p113_p2) target bundleno = 276 (0x114), region = 28 }
   0xb   : > { %v1272_v0 = vld [vmem:[%s1623_s1 + $0x18] sm:$0xff]   ;;  %v1303_v1 = vmov 0.0   ;;  %v1273_v2 = vld [vmem:[%s1623_s1 + $0x8] sm:$0xff]   ;;  %v162_v3 = vlaneseq  ;;  %v1274_v4 = vld [vmem:[%s1623_s1 + $0x10] sm:$0xff]   ;;  %vm1304_vm0 = vmmov 0   ;;  %s1630_s10 = smov (!%p134_p3, %s1085_s10), 1 }
   0xc   : > { %1188 = vmatprep.subr.bf16.mxu0 %v1303_v1  ;;  %1196 = vmatprep.subr.bf16.mxu1 %v1303_v1  ;;  %v1275_v5 = vld [vmem:[%s1623_s1] sm:$0xff]   ;;  %v1305_v6 = vmov 1983009808   ;;  %s1260_s19 = smul.u32 24, %s1630_s10  ;;  %vm191_vm1 = vsmask.f32 1280 }
   0xd   : > { %1189 = vmatpush3.bf16.msra.mxu0 %v1272_v0  ;;  %1192 = vmatprep.mubr.msk.bf16.mxu0 %vm1304_vm0, %v1303_v1  ;;  %v160_v7 = vunpack.c.l.s4 %v1305_v6  ;;  %v163_v8 = vshrl.u32 %v162_v3, 7  ;;  %vm192_vm2 = vsmask.f32 3336  ;;  %vm194_vm3 = vsmask.f32 5392  ;;  %s1160_s25 = sshll.u32 %s1630_s10, 4 }
   0xe   : > { %1197 = vmatpush3.bf16.msra.mxu1 %v1273_v2  ;;  %1190 = vmatprep.subr.bf16.mxu0 %v1303_v1  ;;  %s138_s22 = scalar_lea.vmem %s1622_s0, %s1260_s19  ;;  %vm196_vm4 = vsmask.f32 7448  ;;  %vm406_vm5 = vcmask 1040384   ;;  %vm407_vm6 = vcmask 1042434   ;;  %vm193_vm7 = vmor %vm191_vm1, %vm192_vm2  ;;  %vm409_vm8 = vcmask 1044484   ;;  %s143_s28 = scalar_lea.vmem %s1624_s2, %s1160_s25 }
   0xf   : > { %1198 = vmatprep.subr.bf16.mxu1 %v1303_v1  ;;  %1200 = vmatprep.mubr.msk.bf16.mxu1 %vm1304_vm0, %v1303_v1  ;;  %v161_v9 = vunpack.c.0.s8 %v160_v7  ;;  %v1357_v10 = vld [vmem:[%s138_s22] sm:$0x7]  ;;  %v1359_v11 = vld [vmem:[%s138_s22 + $0x4] sm:$0x7]  ;;  %v1361_v12 = vld [vmem:[%s138_s22 + $0x8] sm:$0x7] }
  0x10   : > { %v1365_v14 = vld [vmem:[%s138_s22 + $0xc] sm:$0x7]  ;;  %v1367_v15 = vld [vmem:[%s138_s22 + $0x10] sm:$0x7]  ;;  %v333_v21 = vcombine.low %v1357_v10, %v1359_v11  ;;  %v1409_v26 = vld [vmem:[%s138_s22 + $0x14] sm:$0x7] }
  0x11   : > { %1191 = vmatpush3.bf16.msra.mxu0 %v1274_v4  ;;  %v1363_v13 = vsub.s32 %v161_v9, %v163_v8  ;;  %vm195_vm9 = vmor %vm193_vm7, %vm194_vm3  ;;  %vm288_vm11 = vcmask 261120   ;;  %v334_v55 = vcombine.low %v1361_v12, %v1365_v14  ;;  %vm411_vm13 = vcmask 1046534  }
  0x12   : > { %1199 = vmatpush3.bf16.msra.mxu1 %v1275_v5  ;;  %1204 = vmatprep.subr.bf16.mxu0 %v1303_v1  ;;  %vm1423_vm10 = vmor %vm195_vm9, %vm196_vm4 }
  0x13   : > { %1212 = vmatprep.subr.bf16.mxu1 %v1303_v1  ;;  %v1371_v16 = vrot.slane %v1357_v10, %v1363_v13  ;;  %v1375_v17 = vrot.slane %v1359_v11, %v1363_v13  ;;  %v1379_v18 = vrot.slane %v1361_v12, %v1363_v13  ;;  %v1383_v19 = vrot.slane %v1365_v14, %v1363_v13  ;;  %vm408_vm12 = vmor %vm406_vm5, %vm407_vm6 }
  0x14   : > { %v1387_v20 = vrot.slane %v1367_v15, %v1363_v13  ;;  %v1431_v51 = vrot.slane %v1409_v26, %v1363_v13  ;;  %v341_v6 = vrot.slane %v333_v21, %v1363_v13  ;;  %vm410_vm14 = vmor %vm408_vm12, %vm409_vm8  ;;  %v1464_v21 = vrot.slane %v334_v55, %v1363_v13 }
  0x15   : > { %v1393_v22 = vcombine.high %v1371_v16, %v1371_v16  ;;  %v1397_v23 = vcombine.high %v1375_v17, %v1375_v17  ;;  %v1401_v24 = vcombine.high %v1379_v18, %v1379_v18  ;;  %v1405_v25 = vcombine.high %v1383_v19, %v1383_v19  ;;  %vm1479_vm15 = vmor %vm410_vm14, %vm411_vm13 }
  0x16   : > { %v199_v27 = vshrl.u32 %v1371_v16, 16  ;;  %v202_v28 = vshll.u32 %v1371_v16, 16  ;;  %v213_v29 = vshrl.u32 %v1375_v17, 16  ;;  %v216_v30 = vshll.u32 %v1375_v17, 16 }
  0x17   : > { %v208_v31 = vshll.u32 %v1393_v22, 16  ;;  %v222_v32 = vshll.u32 %v1397_v23, 16  ;;  %v227_v33 = vshrl.u32 %v1379_v18, 16  ;;  %v230_v34 = vshll.u32 %v1379_v18, 16 }
  0x18   : > { %v201_v35 = vrot.slane %v199_v27, 6  ;;  %v204_v36 = vrot.slane %v202_v28, 7  ;;  %v215_v37 = vrot.slane %v213_v29, 6  ;;  %v218_v38 = vrot.slane %v216_v30, 7 }
  0x19   : > { %v210_v39 = vrot.slane %v208_v31, 7  ;;  %v224_v40 = vrot.slane %v222_v32, 7  ;;  %v229_v41 = vrot.slane %v227_v33, 6  ;;  %v232_v42 = vrot.slane %v230_v34, 7  ;;  %v1280_v33 = vld [vmem:[%s1623_s1 + $0x38] sm:$0xff]  }
  0x1a   : > { %v205_v43 = vor.u32 %v204_v36, %v201_v35  ;;  %v219_v44 = vor.u32 %v218_v38, %v215_v37  ;;  %v236_v45 = vshll.u32 %v1401_v24, 16  ;;  %v241_v46 = vshrl.u32 %v1383_v19, 16 }
  0x1b   : > { %v233_v48 = vor.u32 %v232_v42, %v229_v41  ;;  %v244_v49 = vshll.u32 %v1383_v19, 16  ;;  %v250_v50 = vshll.u32 %v1405_v25, 16  ;;  %v599_v59 = vshrl.u32 %v1387_v20, 16 }
  0x1c   : > { %v206_v52 = vrot.slane %v205_v43, 2  ;;  %v220_v53 = vrot.slane %v219_v44, 2  ;;  %v243_v54 = vrot.slane %v241_v46, 6  ;;  %v238_v57 = vrot.slane %v236_v45, 7 }
  0x1d   : > { %v234_v56 = vrot.slane %v233_v48, 2  ;;  %v246_v58 = vrot.slane %v244_v49, 7  ;;  %v1444_v62 = vcombine.high %v1387_v20, %v1387_v20  ;;  %v602_v63 = vshll.u32 %v1387_v20, 16 }
  0x1e   : > { %v211_v60 = vsel %vm1423_vm10, %v206_v52, %v210_v39  ;;  %v1440_v61 = vsel %vm1423_vm10, %v220_v53, %v224_v40  ;;  %v252_v2 = vrot.slane %v250_v50, 7  ;;  %v601_v3 = vrot.slane %v599_v59, 6 }
  0x1f   : > { %v247_v0 = vor.u32 %v246_v58, %v243_v54  ;;  %v259_v4 = vcombine.low %v211_v60, %v1440_v61  ;;  %v604_v5 = vrot.slane %v602_v63, 7  ;;  %v1453_v7 = vsel %vm1423_vm10, %v234_v56, %v238_v57  ;;  %v1286_v63 = vld [vmem:[%s1623_s1 + $0x58] sm:$0xff]  }
  0x20   : > { %v858_v9 = vshrl.u32 %v1431_v51, 16  ;;  %v861_v10 = vshll.u32 %v1431_v51, 16  ;;  %v608_v28 = vshll.u32 %v1444_v62, 16  ;;  %v1461_v29 = vcombine.high %v1431_v51, %v1431_v51 }
  0x21   : > { %v248_v8 = vrot.slane %v247_v0, 2  ;;  %v605_v27 = vor.u32 %v604_v5, %v601_v3  ;;  %v1103_v34 = vrot.slane %v1371_v16, 9  ;;  %v267_v36 = vrot.slane %v259_v4, %v1363_v13 }
  0x22   : > { %v860_v31 = vrot.slane %v858_v9, 6  ;;  %v863_v32 = vrot.slane %v861_v10, 7  ;;  %v349_v37 = vcombine.low %v341_v6, %v1464_v21  ;;  %v415_v39 = vrot.slane %v1393_v22, 7  ;;  %v1288_v10 = vld [vmem:[%s1623_s1 + $0x50] sm:$0xff]  }
  0x23   : > { %v1468_v30 = vsel %vm1423_vm10, %v248_v8, %v252_v2  ;;  %v1104_v40 = vrot.slane %v1375_v17, 9  ;;  %v515_v41 = vcombine.low %v1359_v11, %v1361_v12  ;;  %v867_v42 = vshll.u32 %v1461_v29, 16  ;;  %v1279_v17 = vld [vmem:[%s1623_s1 + $0x28] sm:$0xff]   ;;  %v1282_v11 = vld [vmem:[%s1623_s1 + $0x30] sm:$0xff]  }
  0x24   : > { %v260_v35 = vcombine.low %v1453_v7, %v1468_v30  ;;  %1201 = vmatmul.mubr.msk.bf16.vlgmr.msra.gmra.mxu1 %vm288_vm11, %v349_v37  ;;  %v419_v43 = vrot.slane %v1397_v23, 7  ;;  %v1105_v44 = vrot.slane %v1379_v18, 9  ;;  %v606_v45 = vrot.slane %v605_v27, 2  ;;  %v1289_v37 = vld [vmem:[%s1623_s1 + $0x68] sm:$0xff]  }
  0x25   : > { %v610_v46 = vrot.slane %v608_v28, 7  ;;  %v864_v48 = vor.u32 %v863_v32, %v860_v31  ;;  %1213 = vmatpush3.bf16.msra.mxu1 %v1280_v33  ;;  %1216 = vmatprep.mubr.msk.bf16.mxu1 %vm1304_vm0, %v1303_v1  ;;  %v416_v12 = vsel %vm1479_vm15, %v1103_v34, %v415_v39  ;;  %v423_v23 = vrot.slane %v1401_v24, 7  ;;  %v1287_v31 = vld [vmem:[%s1623_s1 + $0x40] sm:$0xff]   ;;  %v1290_v33 = vld [vmem:[%s1623_s1 + $0x78] sm:$0xff]  }
  0x26   : > { %v1488_v16 = vrot.slane %v260_v35, %v1363_v13  ;;  %1214 = vmatprep.subr.bf16.mxu1 %v1303_v1  ;;  %v420_v22 = vsel %vm1479_vm15, %v1104_v40, %v419_v43  ;;  %v1106_v49 = vrot.slane %v1383_v19, 9  ;;  %v427_v50 = vrot.slane %v1405_v25, 7  ;;  %v1281_v19 = vld [vmem:[%s1623_s1 + $0x20] sm:$0xff]  }
  0x27   : > { %v434_v52 = vcombine.low %v416_v12, %v420_v22  ;;  %v516_v53 = vcombine.low %v1365_v14, %v1367_v15  ;;  %v869_v54 = vrot.slane %v867_v42, 7  ;;  %v424_v55 = vsel %vm1479_vm15, %v1105_v44, %v423_v23  ;;  %v1294_v44 = vld [vmem:[%s1623_s1 + $0x80] sm:$0xff]  }
  0x28   : > { %v275_v18 = vcombine.low %v267_v36, %v1488_v16  ;;  %v523_v56 = vrot.slane %v515_v41, %v1363_v13  ;;  %v611_v57 = vsel %vm1423_vm10, %v606_v45, %v610_v46  ;;  %v428_v14 = vsel %vm1479_vm15, %v1106_v49, %v427_v50 }
  0x29   : > { %1215 = vmatpush3.bf16.msra.mxu1 %v1282_v11  ;;  %v530_v24 = vrot.slane %v516_v53, %v1363_v13  ;;  %v1128_v25 = vrot.slane %v1387_v20, 9  ;;  %v865_v58 = vrot.slane %v864_v48, 2  ;;  %v435_v59 = vcombine.low %v424_v55, %v428_v14 }
  0x2a   : > { %1193 = vmatmul.mubr.msk.bf16.vlgmr.msra.gmra.mxu0 %vm288_vm11, %v275_v18  ;;  %v442_v60 = vrot.slane %v434_v52, %v1363_v13  ;;  %v694_v0 = vrot.slane %v1444_v62, 7  ;;  %1228 = vmatprep.subr.bf16.mxu1 %v1303_v1  ;;  %v701_v3 = vcombine.low %v420_v22, %v424_v55  ;;  %v617_v20 = vcombine.low %v1440_v61, %v1453_v7  ;;  %v1285_v62 = vld [vmem:[%s1623_s1 + $0x48] sm:$0xff]  }
  0x2b   : > { %1205 = vmatpush3.bf16.msra.mxu0 %v1279_v17  ;;  %1208 = vmatprep.mubr.msk.bf16.mxu0 %vm1304_vm0, %v1303_v1  ;;  %v531_v2 = vcombine.low %v523_v56, %v530_v24  ;;  %v618_v4 = vcombine.low %v1468_v30, %v611_v57  ;;  %v1539_v5 = vrot.slane %v435_v59, %v1363_v13  ;;  %v1150_v39 = vrot.slane %v1431_v51, 9 }
  0x2c   : > { %1206 = vmatprep.subr.bf16.mxu0 %v1303_v1  ;;  %v695_v6 = vsel %vm1479_vm15, %v1128_v25, %v694_v0  ;;  %v709_v9 = vrot.slane %v701_v3, %v1363_v13  ;;  %v870_v61 = vsel %vm1423_vm10, %v865_v58, %v869_v54  ;;  %v625_v47 = vrot.slane %v617_v20, %v1363_v13 }
  0x2d   : > { %1217 = vmatmul.mubr.msk.bf16.vlgmr.msra.gmra.mxu1 %vm288_vm11, %v531_v2  ;;  %v702_v8 = vcombine.low %v428_v14, %v695_v6  ;;  %v450_v7 = vcombine.low %v442_v60, %v1539_v5  ;;  %v632_v28 = vrot.slane %v618_v4, %v1363_v13  ;;  %v876_v30 = vcombine.low %v611_v57, %v870_v61 }
  0x2e   : > { %1229 = vmatpush3.bf16.msra.mxu1 %v1286_v63  ;;  %1232 = vmatprep.mubr.msk.bf16.mxu1 %vm1304_vm0, %v1303_v1  ;;  %v782_v34 = vcombine.low %v1367_v15, %v1409_v26  ;;  %v945_v40 = vrot.slane %v1461_v29, 7  ;;  %v1292_v15 = vld [vmem:[%s1623_s1 + $0x70] sm:$0xff]   ;;  %v1291_v29 = vld [vmem:[%s1623_s1 + $0x60] sm:$0xff]  }
  0x2f   : > { %1207 = vmatpush3.bf16.msra.mxu0 %v1281_v19  ;;  %1230 = vmatprep.subr.bf16.mxu1 %v1303_v1  ;;  %v716_v27 = vrot.slane %v702_v8, %v1363_v13  ;;  %v633_v35 = vcombine.low %v625_v47, %v632_v28  ;;  %v883_v36 = vrot.slane %v876_v30, %v1363_v13 }
  0x30   : > { %1220 = vmatprep.subr.bf16.mxu0 %v1303_v1  ;;  %v789_v26 = vrot.slane %v782_v34, %v1363_v13  ;;  %v946_v41 = vsel %vm1479_vm15, %v1150_v39, %v945_v40 }
  0x31   : > { %v717_v32 = vcombine.low %v709_v9, %v716_v27  ;;  %v884_v51 = vcombine.low %v1488_v16, %v883_v36  ;;  %v952_v43 = vcombine.low %v695_v6, %v946_v41  ;;  %v1293_v16 = vld [vmem:[%s1623_s1 + $0x88] sm:$0xff]  }
  0x32   : > { %1209 = vmatmul.mubr.msk.bf16.vlgmr.msra.gmra.mxu0 %vm288_vm11, %v450_v7  ;;  %1231 = vmatpush3.bf16.msra.mxu1 %v1288_v10  ;;  %v790_v42 = vcombine.low %v1464_v21, %v789_v26 }
  0x33   : > { %1221 = vmatpush3.bf16.msra.mxu0 %v1285_v62  ;;  %1224 = vmatprep.mubr.msk.bf16.mxu0 %vm1304_vm0, %v1303_v1  ;;  %v959_v38 = vrot.slane %v952_v43, %v1363_v13 }
  0x34   : > { %1222 = vmatprep.subr.bf16.mxu0 %v1303_v1  ;;  %1244 = vmatprep.subr.bf16.mxu1 %v1303_v1 }
  0x35   : > { %1233 = vmatmul.mubr.msk.bf16.vlgmr.msra.gmra.mxu1 %vm288_vm11, %v717_v32  ;;  %v960_v21 = vcombine.low %v1539_v5, %v959_v38 }
  0x36   : > { %1245 = vmatpush3.bf16.msra.mxu1 %v1290_v33  ;;  %1248 = vmatprep.mubr.msk.bf16.mxu1 %vm1304_vm0, %v1303_v1 }
  0x37   : > { %1223 = vmatpush3.bf16.msra.mxu0 %v1287_v31  ;;  %1246 = vmatprep.subr.bf16.mxu1 %v1303_v1 }
  0x38   : > { %1236 = vmatprep.subr.bf16.mxu0 %v1303_v1 }
  0x3a   : > { %1225 = vmatmul.mubr.msk.bf16.vlgmr.msra.gmra.mxu0 %vm288_vm11, %v633_v35  ;;  %1247 = vmatpush3.bf16.msra.mxu1 %v1292_v15 }
  0x3b   : > { %1237 = vmatpush3.bf16.msra.mxu0 %v1289_v37  ;;  %1240 = vmatprep.mubr.msk.bf16.mxu0 %vm1304_vm0, %v1303_v1 }
  0x3c   : > { %1238 = vmatprep.subr.bf16.mxu0 %v1303_v1 }
  0x3d   : > { %1249 = vmatmul.mubr.msk.bf16.vlgmr.msra.gmra.mxu1 %vm288_vm11, %v884_v51 }
  0x3f   : > { %1239 = vmatpush3.bf16.msra.mxu0 %v1291_v29 }
  0x40   : > { %1252 = vmatprep.subr.bf16.mxu0 %v1303_v1 }
  0x42   : > { %1241 = vmatmul.mubr.msk.bf16.vlgmr.msra.gmra.mxu0 %vm288_vm11, %v790_v42 }
  0x43   : > { %1253 = vmatpush3.bf16.msra.mxu0 %v1293_v16  ;;  %1256 = vmatprep.mubr.msk.bf16.mxu0 %vm1304_vm0, %v1303_v1  ;;  %vm1025_vm0 = vcmask 257024  }
  0x44   : > { %1254 = vmatprep.subr.bf16.mxu0 %v1303_v1 }
  0x47   : > { %1255 = vmatpush3.bf16.msra.mxu0 %v1294_v44 }
  0x4a   : > { %1257 = vmatmul.mubr.msk.bf16.vlgmr.msra.gmra.mxu0 %vm288_vm11, %v960_v21 }
  0xe4   : > { %v399_v45 = vpop.f32.mrf.mxu1 }
  0xe6   : > { %v1202_v46 = vpop.f32.mrf.mxu1 }
  0xe8   : > { %v402_v17 = vpop.f32.mrf.mxu1 }
  0xea   : > { %v326_v48 = vpop.f32.mrf.mxu0  ;;  %v1203_v11 = vpop.f32.mrf.mxu1 }
  0xeb   : > { %v400_v54 = vadd.f32 %v399_v45, %v326_v48 }
  0xec   : > { %v1194_v13 = vpop.f32.mrf.mxu0 }
  0xed   : > { %v581_v18 = vpop.f32.mrf.mxu1 }
  0xee   : > { %v329_v12 = vpop.f32.mrf.mxu0 }
  0xef   : > { %v1218_v23 = vpop.f32.mrf.mxu1  ;;  %v403_v24 = vadd.f32 %v402_v17, %v329_v12 }
  0xf0   : > { %v1195_v22 = vpop.f32.mrf.mxu0 }
  0xf1   : > { %v584_v50 = vpop.f32.mrf.mxu1 }
  0xf2   : > { %v500_v49 = vpop.f32.mrf.mxu0 }
  0xf3   : > { %v1219_v53 = vpop.f32.mrf.mxu1  ;;  %v507_v57 = vadd.f32 %v500_v49, %v400_v54 }
  0xf4   : > { %v1210_v52 = vpop.f32.mrf.mxu0 }
  0xf5   : > { %v767_v55 = vpop.f32.mrf.mxu1  ;;  %v588_v59 = vadd.f32 %v581_v18, %v507_v57 }
  0xf6   : > { %v503_v1 = vpop.f32.mrf.mxu0 }
  0xf7   : > { %v1234_v19 = vpop.f32.mrf.mxu1  ;;  %v508_v60 = vadd.f32 %v503_v1, %v403_v24 }
  0xf8   : > { %v1211_v56 = vpop.f32.mrf.mxu0 }
  0xf9   : > { %v770_v25 = vpop.f32.mrf.mxu1  ;;  %v589_v4 = vadd.f32 %v584_v50, %v508_v60 }
  0xfa   : > { %v683_v14 = vpop.f32.mrf.mxu0 }
  0xfb   : > { %v1235_v63 = vpop.f32.mrf.mxu1  ;;  %v690_v2 = vadd.f32 %v683_v14, %v588_v59 }
  0xfc   : > { %v1226_v58 = vpop.f32.mrf.mxu0 }
  0xfd   : > { %v934_v3 = vpop.f32.mrf.mxu1  ;;  %v774_v62 = vadd.f32 %v767_v55, %v690_v2 }
  0xfe   : > { %v686_v0 = vpop.f32.mrf.mxu0 }
  0xff   : > { %v1250_v5 = vpop.f32.mrf.mxu1  ;;  %v691_v8 = vadd.f32 %v686_v0, %v589_v4 }
 0x100   : > { %v1227_v20 = vpop.f32.mrf.mxu0 }
 0x101   : > { %v937_v9 = vpop.f32.mrf.mxu1  ;;  %v775_v47 = vadd.f32 %v770_v25, %v691_v8 }
 0x102   : > { %v840_v6 = vpop.f32.mrf.mxu0 }
 0x103   : > { %v847_v7 = vadd.f32 %v840_v6, %v774_v62  ;;  %v1251_v10 = vpop.f32.mrf.mxu1 }
 0x104   : > { %v1242_v61 = vpop.f32.mrf.mxu0 }
 0x105   : > { %v941_v30 = vadd.f32 %v934_v3, %v847_v7 }
 0x106   : > { %v843_v27 = vpop.f32.mrf.mxu0 }
 0x107   : > { %v848_v31 = vadd.f32 %v843_v27, %v775_v47 }
 0x108   : > { %v1243_v28 = vpop.f32.mrf.mxu0 }
 0x109   : > { %v942_v35 = vadd.f32 %v937_v9, %v848_v31 }
 0x10a   : > { %v1010_v32 = vpop.f32.mrf.mxu0 }
 0x10b   : > { %v1017_v33 = vadd.f32 %v1010_v32, %v941_v30 }
 0x10c   : > { %v1258_v34 = vpop.f32.mrf.mxu0 }
 0x10d   : > { %v1021_v36 = vcombine.high %v1017_v33, %v1017_v33  ;;  %1026 = vst.msk [vmem:[%s143_s28] sm:$0xf] %vm1025_vm0, %v1017_v33 }
 0x10e   : > { %v1013_v37 = vpop.f32.mrf.mxu0 }
 0x10f   : > { %1027 = vst.msk [vmem:[%s143_s28 + $0x4] sm:$0xf] %vm1025_vm0, %v1021_v36  ;;  %v1018_v39 = vadd.f32 %v1013_v37, %v942_v35 }
 0x110   : > { %v1259_v40 = vpop.f32.mrf.mxu0 }
 0x111   : > { %v1022_v15 = vcombine.high %v1018_v39, %v1018_v39  ;;  %1028 = vst.msk [vmem:[%s143_s28 + $0x8] sm:$0xf] %vm1025_vm0, %v1018_v39 }
 0x113   : > { %1029 = vst.msk [vmem:[%s143_s28 + $0xc] sm:$0xf] %vm1025_vm0, %v1022_v15 }
 0x114 PF: > { %s12_s9 = sadd.s32 1, %s1301_s9  }
 0x115   : > { %p9_p4 = scmp.ge.s32.totalorder %s12_s9, 4  }
 0x117   :  { %11 = sbr.rel (!%p9_p4) target bundleno = 1 (0x1), region = 66 }

</bundles_post_ra>
